<compile_context>
chip_gen: v5e
topology: v5e:2x2
jax: 0.10.0
libtpu: 0.0.40
codegen_flags: <defaults>
</compile_context>

<pallas_src>
import jax
import jax.numpy as jnp
from jax import lax
from jax.experimental import pallas as pl
from jax.experimental.pallas import tpu as pltpu

# ----------------------------- model sizes (small) -----------------------------
B = 2        # real batch
S = 8        # source length
T = 8        # target length
E = 32       # embedding dim
H = 32       # hidden dim (encoder == decoder)
A = 32       # attention dim
V = 64       # real vocab size

BP = 8       # batch padded to a sublane multiple
VP = 128     # vocab padded to full lane width (lane-dense logits / one-hots)
G = 4 * H    # LSTM gate width = 128 (one full lane tile)
SA = S * A   # 256
SH = S * H   # 256

NEG = -1e30
WSLAB = 256  # packed weight slab lane width (2 lane tiles)

# packed weight slab row offsets (all 8-sublane aligned)
R_SRC2G = 0      # (VP, G)   one-hot(src tok) -> encoder input gates (+enc_b)
R_E2G   = 128    # (VP, G)   one-hot(dec tok) -> decoder gate contribution (+dec_b)
R_E2O   = 256    # (VP, VP)  one-hot(dec tok) -> logit contribution (+bout, pad=-1e30)
R_WHH   = 384    # (H, G)    encoder recurrent weights
R_DWH   = 416    # (H, G)    decoder recurrent (h) gate weights
R_DWC   = 448    # (H, G)    decoder context gate weights
R_WOH   = 480    # (H, VP)   logits from h_new
R_WOC   = 512    # (H, VP)   logits from context
R_WAH   = 544    # (H, SA)   attention query proj, pre-tiled across S chunks
R_WAE   = 576    # (SH, SA)  attention key proj, block-diag over S
R_VBLK  = 832    # (SA, S)   attention v-dot as block-diag matmul
R_TOTAL = 1088

_VMEM = pl.BlockSpec(memory_space=pltpu.MemorySpace.VMEM)


# ----------------------------- fused forward kernel ----------------------------
def _seq2seq_kernel(tok_ref, w_ref, logits_ref):
  """Whole Seq2Seq forward in one launch.

  tok_ref:    (S+1, BP) int32   rows 0..S-1: time-major padded src; row S: trg[:,0]
  w_ref:      (R_TOTAL, WSLAB) float32   packed weight slab (see offsets above)
  logits_ref: (T-1, BP, VP) float32      lane-dense output slab
  """
  f32 = jnp.float32

  # ---- token one-hots (built once; embeddings are folded into the weights) ----
  toks = tok_ref[...]                                                  # (S+1, BP)
  lane3 = lax.broadcasted_iota(jnp.int32, (S + 1, BP, VP), 2)
  onehot_all = (toks[:, :, None] == lane3).astype(f32)                 # (S+1, BP, VP)
  onehot_src = onehot_all[:S].reshape(S * BP, VP)                      # (S*BP, VP)
  onehot = onehot_all[S]                                               # (BP, VP) trg[:,0]

  # ---- encoder: all input gates in one matmul (emb + wih + bias folded) ----
  pre = jnp.dot(onehot_src, w_ref[R_SRC2G:R_SRC2G + VP, 0:G],
                preferred_element_type=f32).reshape(S, BP, G)          # (S, BP, G)

  enc_whh = w_ref[R_WHH:R_WHH + H, 0:G]                                # encoder phase only
  h = jnp.zeros((BP, H), f32)
  c = jnp.zeros((BP, H), f32)
  h_list = []
  # TODO(synk): src_len / pack_padded_sequence masking is not modeled.
  for t in range(S):
    gates = pre[t] + jnp.dot(h, enc_whh, preferred_element_type=f32)   # (BP, G)
    i = jax.nn.sigmoid(gates[:, 0 * H:1 * H])
    f = jax.nn.sigmoid(gates[:, 1 * H:2 * H])
    g = jnp.tanh(gates[:, 2 * H:3 * H])
    o = jax.nn.sigmoid(gates[:, 3 * H:4 * H])
    c = f * c + i * g
    h = o * jnp.tanh(c)
    h_list.append(h)                                                   # values, no scratch

  # ---- loop-invariant attention key projection, lane-dense (BP, S*A) ----
  enc_cat = jnp.concatenate(h_list, axis=1)                            # (BP, S*H) = (8,256)
  ee = jnp.dot(enc_cat, w_ref[R_WAE:R_WAE + SH, 0:SA],
               preferred_element_type=f32)                             # (BP, S*A) = (8,256)

  lane_v = lax.broadcasted_iota(jnp.int32, (BP, VP), 1)

  # ---- decoder steps (fully unrolled, greedy argmax feedback in-kernel) ----
  for t in range(T - 1):
    # Independent of attention: issued at the top of the step so the MXU work
    # overlaps the EUP/VPU attention math (biases already folded in).
    pre_gate = jnp.dot(onehot, w_ref[R_E2G:R_E2G + VP, 0:G],
                       preferred_element_type=f32)                     # emb@We + dec_b
    pre_out = jnp.dot(onehot, w_ref[R_E2O:R_E2O + VP, 0:VP],
                      preferred_element_type=f32)                      # emb@Woe + bout(-1e30 pad)
    gh = jnp.dot(h, w_ref[R_DWH:R_DWH + H, 0:G],
                 preferred_element_type=f32)                           # h_prev@Wh

    # Bahdanau attention on 2 full vregs: energy (8,256), scores via block-diag v.
    he = jnp.dot(h, w_ref[R_WAH:R_WAH + H, 0:SA],
                 preferred_element_type=f32)                           # (BP, S*A)
    energy = jnp.tanh(ee + he)                                         # (BP, S*A)
    scores = jnp.dot(energy, w_ref[R_VBLK:R_VBLK + SA, 0:S],
                     preferred_element_type=f32)                       # (BP, S)
    m = jnp.max(scores, axis=1, keepdims=True)
    p = jnp.exp(scores - m)
    attn = p / jnp.sum(p, axis=1, keepdims=True)                       # exact softmax

    ctx = attn[:, 0:1] * h_list[0]
    for s in range(1, S):
      ctx = ctx + attn[:, s:s + 1] * h_list[s]                         # (BP, H)

    # Only ctx@Wc remains on the post-attention gate path.
    gc = jnp.dot(ctx, w_ref[R_DWC:R_DWC + H, 0:G], preferred_element_type=f32)
    oc = jnp.dot(ctx, w_ref[R_WOC:R_WOC + H, 0:VP], preferred_element_type=f32)

    gates = pre_gate + gh + gc                                         # (BP, G)
    i = jax.nn.sigmoid(gates[:, 0 * H:1 * H])
    f = jax.nn.sigmoid(gates[:, 1 * H:2 * H])
    g = jnp.tanh(gates[:, 2 * H:3 * H])
    o = jax.nn.sigmoid(gates[:, 3 * H:4 * H])
    c = f * c + i * g
    h = o * jnp.tanh(c)

    # Only h_new@Wout_h is behind the LSTM nonlinearities.
    logits = pre_out + oc + jnp.dot(h, w_ref[R_WOH:R_WOH + H, 0:VP],
                                    preferred_element_type=f32)        # (BP, VP)
    logits_ref[t] = logits                                             # full-tile store

    if t < T - 2:
      # greedy feedback: padded vocab lanes already hold -1e30 (folded into bout),
      # so no extra mask; first-max (min index) matches torch.argmax.
      mmax = jnp.max(logits, axis=1, keepdims=True)                    # (BP, 1)
      idx = jnp.min(jnp.where(logits == mmax, lane_v, VP),
                    axis=1, keepdims=True)                             # (BP, 1)
      onehot = (lane_v == idx).astype(f32)                             # next step's token


# ----------------------------- parameter init / packing ------------------------
def init_params(key):
  """Generates the logical Seq2Seq weights and packs them into one f32 slab."""
  ks = jax.random.split(key, 16)

  def mk(k, shape, scale=0.1):
    return (scale * jax.random.normal(k, shape)).astype(jnp.float32)

  enc_emb = mk(ks[0], (V, E))
  dec_emb = mk(ks[1], (V, E))
  enc_wih = mk(ks[2], (E, G))
  enc_whh = mk(ks[3], (H, G))
  enc_b = mk(ks[4], (1, G))
  wa_h = mk(ks[5], (H, A))
  wa_e = mk(ks[6], (H, A))
  att_v = mk(ks[7], (1, A))
  dec_w_e = mk(ks[8], (E, G))
  dec_w_c = mk(ks[9], (H, G))
  dec_w_h = mk(ks[10], (H, G))
  dec_b = mk(ks[11], (1, G))
  wout_h = mk(ks[12], (H, V))
  wout_c = mk(ks[13], (H, V))
  wout_e = mk(ks[14], (E, V))
  bout = mk(ks[15], (1, V))

  # token -> encoder input gates: one-hot @ (enc_emb @ enc_wih) + enc_b  (bias folded)
  w_src2g = jnp.zeros((VP, G), jnp.float32).at[:V].set(enc_emb @ enc_wih) + enc_b
  # token -> decoder gate contribution: one-hot @ (dec_emb @ dec_w_e) + dec_b
  w_e2g = jnp.zeros((VP, G), jnp.float32).at[:V].set(dec_emb @ dec_w_e) + dec_b
  # token -> logit contribution, vocab-pad mask folded into the bias columns
  bout_pad = jnp.full((1, VP), NEG, jnp.float32).at[:, :V].set(bout)
  w_e2o = jnp.zeros((VP, VP), jnp.float32).at[:V, :V].set(dec_emb @ wout_e) + bout_pad

  wout_h_pad = jnp.zeros((H, VP), jnp.float32).at[:, :V].set(wout_h)
  wout_c_pad = jnp.zeros((H, VP), jnp.float32).at[:, :V].set(wout_c)

  # lane-dense attention weights
  wa_h_rep = jnp.tile(wa_h, (1, S))                        # (H, S*A)
  eye_s = jnp.eye(S, dtype=jnp.float32)
  wa_e_blk = jnp.kron(eye_s, wa_e)                         # (S*H, S*A) block-diag
  v_blk = jnp.kron(eye_s, att_v.T)                         # (S*A, S)  block-diag columns

  slab = jnp.zeros((R_TOTAL, WSLAB), jnp.float32)

  def put(s, r, w):
    return s.at[r:r + w.shape[0], :w.shape[1]].set(w)

  slab = put(slab, R_SRC2G, w_src2g)
  slab = put(slab, R_E2G, w_e2g)
  slab = put(slab, R_E2O, w_e2o)
  slab = put(slab, R_WHH, enc_whh)
  slab = put(slab, R_DWH, dec_w_h)
  slab = put(slab, R_DWC, dec_w_c)
  slab = put(slab, R_WOH, wout_h_pad)
  slab = put(slab, R_WOC, wout_c_pad)
  slab = put(slab, R_WAH, wa_h_rep)
  slab = put(slab, R_WAE, wa_e_blk)
  slab = put(slab, R_VBLK, v_blk)
  return slab


# ----------------------------- full forward ------------------------------------
@jax.jit
def seq2seq_forward(w_slab, src_tokens, trg_tokens):
  """Mirrors Seq2Seq.forward(src, src_len, trg) teacher branch.

  src_tokens: (B, S) int32, trg_tokens: (B, T) int32 -> (B, T-1, V) float32.
  """
  # pack tokens into one int32 array: rows 0..S-1 = time-major src, row S = trg[:,0]
  tok = jnp.zeros((S + 1, BP), jnp.int32)
  tok = tok.at[:S, :B].set(src_tokens.T.astype(jnp.int32))
  tok = tok.at[S, :B].set(trg_tokens[:, 0].astype(jnp.int32))

  out_slab = pl.pallas_call(
      _seq2seq_kernel,
      out_shape=jax.ShapeDtypeStruct((T - 1, BP, VP), jnp.float32),
      in_specs=[_VMEM, _VMEM],
      out_specs=_VMEM,
  )(tok, w_slab)

  # (T-1, BP, VP) lane-dense slab -> (B, T-1, V)
  return jnp.transpose(out_slab[:, :B, :V], (1, 0, 2))


# TODO(synk): the trg=None greedy-translation branch (data-dependent early break
# on <eos> via host-side .item()) is not implemented; only the batched trg
# branch (which in the reference also feeds back argmax) is done.

if __name__ == "__main__":
  key = jax.random.PRNGKey(0)
  pkey, skey, tkey = jax.random.split(key, 3)
  w_slab = init_params(pkey)
  src = jax.random.randint(skey, (B, S), 0, V, dtype=jnp.int32)
  trg = jax.random.randint(tkey, (B, T), 0, V, dtype=jnp.int32)

  out = seq2seq_forward(w_slab, src, trg)
  out = jax.block_until_ready(out)
  assert out.shape == (B, T - 1, V), out.shape
  assert bool(jnp.all(jnp.isfinite(out)))
  print("KERNEL_OK")
</pallas_src>

<mosaic_0001>
module attributes {stable_mosaic.version = 11 : i64} {
  func.func @_seq2seq_kernel(%arg0: memref<9x8xi32, #tpu.memory_space<vmem>>, %arg1: memref<1088x256xf32, #tpu.memory_space<vmem>>, %arg2: memref<7x8x128xf32, #tpu.memory_space<vmem>>) attributes {dimension_semantics = [], scalar_prefetch = 0 : i64, scratch_operands = 0 : i64, tpu.core_type = #tpu.core_type<tc>} {
    %c0 = arith.constant 0 : index
    %c0_0 = arith.constant 0 : index
    %0 = vector.load %arg0[%c0, %c0_0] : memref<9x8xi32, #tpu.memory_space<vmem>>, vector<9x8xi32>
    %1 = tpu.iota {dimensions = array<i32: 2>} : vector<9x8x128xi32>
    %2 = vector.shape_cast %0 : vector<9x8xi32> to vector<9x8x1xi32>
    %3 = vector.broadcast %2 : vector<9x8x1xi32> to vector<9x8x128xi32>
    %4 = arith.cmpi eq, %3, %1 : vector<9x8x128xi32>
    %5 = arith.extui %4 : vector<9x8x128xi1> to vector<9x8x128xi32>
    %6 = arith.sitofp %5 : vector<9x8x128xi32> to vector<9x8x128xf32>
    %7 = vector.extract_strided_slice %6 {offsets = [0, 0, 0], sizes = [8, 8, 128], strides = [1, 1, 1]} : vector<9x8x128xf32> to vector<8x8x128xf32>
    %8 = vector.shape_cast %7 : vector<8x8x128xf32> to vector<64x128xf32>
    %9 = vector.extract_strided_slice %6 {offsets = [8, 0, 0], sizes = [1, 8, 128], strides = [1, 1, 1]} : vector<9x8x128xf32> to vector<1x8x128xf32>
    %10 = vector.shape_cast %9 : vector<1x8x128xf32> to vector<8x128xf32>
    %c0_1 = arith.constant 0 : index
    %c0_2 = arith.constant 0 : index
    %11 = vector.load %arg1[%c0_1, %c0_2] : memref<1088x256xf32, #tpu.memory_space<vmem>>, vector<128x128xf32>
    %cst = arith.constant dense<0.000000e+00> : vector<64x128xf32>
    %12 = tpu.matmul %8, %11, %cst {dimension_numbers = #tpu.dot_dimension_numbers<[1], [0], [0], [1], [0, 0, 1, 1], [], []>} : vector<64x128xf32>, vector<128x128xf32>, vector<64x128xf32> -> vector<64x128xf32>
    %13 = vector.shape_cast %12 : vector<64x128xf32> to vector<8x8x128xf32>
    %c384 = arith.constant 384 : index
    %c0_3 = arith.constant 0 : index
    %14 = vector.load %arg1[%c384, %c0_3] : memref<1088x256xf32, #tpu.memory_space<vmem>>, vector<32x128xf32>
    %cst_4 = arith.constant 0.000000e+00 : f32
    %15 = vector.broadcast %cst_4 : f32 to vector<8x32xf32>
    %cst_5 = arith.constant 0.000000e+00 : f32
    %16 = vector.broadcast %cst_5 : f32 to vector<8x32xf32>
    %17 = vector.extract_strided_slice %13 {offsets = [0, 0, 0], sizes = [1, 8, 128], strides = [1, 1, 1]} : vector<8x8x128xf32> to vector<1x8x128xf32>
    %18 = vector.shape_cast %17 : vector<1x8x128xf32> to vector<8x128xf32>
    %cst_6 = arith.constant dense<0.000000e+00> : vector<8x128xf32>
    %19 = tpu.matmul %15, %14, %cst_6 {dimension_numbers = #tpu.dot_dimension_numbers<[1], [0], [0], [1], [0, 0, 1, 1], [], []>} : vector<8x32xf32>, vector<32x128xf32>, vector<8x128xf32> -> vector<8x128xf32>
    %20 = arith.addf %18, %19 : vector<8x128xf32>
    %21 = vector.extract_strided_slice %20 {offsets = [0, 0], sizes = [8, 32], strides = [1, 1]} : vector<8x128xf32> to vector<8x32xf32>
    %22 = arith.negf %21 : vector<8x32xf32>
    %23 = math.exp %22 : vector<8x32xf32>
    %cst_7 = arith.constant 1.000000e+00 : f32
    %24 = vector.broadcast %cst_7 : f32 to vector<8x32xf32>
    %25 = arith.addf %24, %23 : vector<8x32xf32>
    %26 = arith.divf %24, %25 : vector<8x32xf32>
    %27 = vector.extract_strided_slice %20 {offsets = [0, 32], sizes = [8, 32], strides = [1, 1]} : vector<8x128xf32> to vector<8x32xf32>
    %28 = arith.negf %27 : vector<8x32xf32>
    %29 = math.exp %28 : vector<8x32xf32>
    %cst_8 = arith.constant 1.000000e+00 : f32
    %30 = vector.broadcast %cst_8 : f32 to vector<8x32xf32>
    %31 = arith.addf %30, %29 : vector<8x32xf32>
    %32 = arith.divf %30, %31 : vector<8x32xf32>
    %33 = vector.extract_strided_slice %20 {offsets = [0, 64], sizes = [8, 32], strides = [1, 1]} : vector<8x128xf32> to vector<8x32xf32>
    %34 = math.tanh %33 : vector<8x32xf32>
    %35 = vector.extract_strided_slice %20 {offsets = [0, 96], sizes = [8, 32], strides = [1, 1]} : vector<8x128xf32> to vector<8x32xf32>
    %36 = arith.negf %35 : vector<8x32xf32>
    %37 = math.exp %36 : vector<8x32xf32>
    %cst_9 = arith.constant 1.000000e+00 : f32
    %38 = vector.broadcast %cst_9 : f32 to vector<8x32xf32>
    %39 = arith.addf %38, %37 : vector<8x32xf32>
    %40 = arith.divf %38, %39 : vector<8x32xf32>
    %41 = arith.mulf %32, %16 : vector<8x32xf32>
    %42 = arith.mulf %26, %34 : vector<8x32xf32>
    %43 = arith.addf %41, %42 : vector<8x32xf32>
    %44 = math.tanh %43 : vector<8x32xf32>
    %45 = arith.mulf %40, %44 : vector<8x32xf32>
    %46 = vector.extract_strided_slice %13 {offsets = [1, 0, 0], sizes = [1, 8, 128], strides = [1, 1, 1]} : vector<8x8x128xf32> to vector<1x8x128xf32>
    %47 = vector.shape_cast %46 : vector<1x8x128xf32> to vector<8x128xf32>
    %cst_10 = arith.constant dense<0.000000e+00> : vector<8x128xf32>
    %48 = tpu.matmul %45, %14, %cst_10 {dimension_numbers = #tpu.dot_dimension_numbers<[1], [0], [0], [1], [0, 0, 1, 1], [], []>} : vector<8x32xf32>, vector<32x128xf32>, vector<8x128xf32> -> vector<8x128xf32>
    %49 = arith.addf %47, %48 : vector<8x128xf32>
    %50 = vector.extract_strided_slice %49 {offsets = [0, 0], sizes = [8, 32], strides = [1, 1]} : vector<8x128xf32> to vector<8x32xf32>
    %51 = arith.negf %50 : vector<8x32xf32>
    %52 = math.exp %51 : vector<8x32xf32>
    %cst_11 = arith.constant 1.000000e+00 : f32
    %53 = vector.broadcast %cst_11 : f32 to vector<8x32xf32>
    %54 = arith.addf %53, %52 : vector<8x32xf32>
    %55 = arith.divf %53, %54 : vector<8x32xf32>
    %56 = vector.extract_strided_slice %49 {offsets = [0, 32], sizes = [8, 32], strides = [1, 1]} : vector<8x128xf32> to vector<8x32xf32>
    %57 = arith.negf %56 : vector<8x32xf32>
    %58 = math.exp %57 : vector<8x32xf32>
    %cst_12 = arith.constant 1.000000e+00 : f32
    %59 = vector.broadcast %cst_12 : f32 to vector<8x32xf32>
    %60 = arith.addf %59, %58 : vector<8x32xf32>
    %61 = arith.divf %59, %60 : vector<8x32xf32>
    %62 = vector.extract_strided_slice %49 {offsets = [0, 64], sizes = [8, 32], strides = [1, 1]} : vector<8x128xf32> to vector<8x32xf32>
    %63 = math.tanh %62 : vector<8x32xf32>
    %64 = vector.extract_strided_slice %49 {offsets = [0, 96], sizes = [8, 32], strides = [1, 1]} : vector<8x128xf32> to vector<8x32xf32>
    %65 = arith.negf %64 : vector<8x32xf32>
    %66 = math.exp %65 : vector<8x32xf32>
    %cst_13 = arith.constant 1.000000e+00 : f32
    %67 = vector.broadcast %cst_13 : f32 to vector<8x32xf32>
    %68 = arith.addf %67, %66 : vector<8x32xf32>
    %69 = arith.divf %67, %68 : vector<8x32xf32>
    %70 = arith.mulf %61, %43 : vector<8x32xf32>
    %71 = arith.mulf %55, %63 : vector<8x32xf32>
    %72 = arith.addf %70, %71 : vector<8x32xf32>
    %73 = math.tanh %72 : vector<8x32xf32>
    %74 = arith.mulf %69, %73 : vector<8x32xf32>
    %75 = vector.extract_strided_slice %13 {offsets = [2, 0, 0], sizes = [1, 8, 128], strides = [1, 1, 1]} : vector<8x8x128xf32> to vector<1x8x128xf32>
    %76 = vector.shape_cast %75 : vector<1x8x128xf32> to vector<8x128xf32>
    %cst_14 = arith.constant dense<0.000000e+00> : vector<8x128xf32>
    %77 = tpu.matmul %74, %14, %cst_14 {dimension_numbers = #tpu.dot_dimension_numbers<[1], [0], [0], [1], [0, 0, 1, 1], [], []>} : vector<8x32xf32>, vector<32x128xf32>, vector<8x128xf32> -> vector<8x128xf32>
    %78 = arith.addf %76, %77 : vector<8x128xf32>
    %79 = vector.extract_strided_slice %78 {offsets = [0, 0], sizes = [8, 32], strides = [1, 1]} : vector<8x128xf32> to vector<8x32xf32>
    %80 = arith.negf %79 : vector<8x32xf32>
    %81 = math.exp %80 : vector<8x32xf32>
    %cst_15 = arith.constant 1.000000e+00 : f32
    %82 = vector.broadcast %cst_15 : f32 to vector<8x32xf32>
    %83 = arith.addf %82, %81 : vector<8x32xf32>
    %84 = arith.divf %82, %83 : vector<8x32xf32>
    %85 = vector.extract_strided_slice %78 {offsets = [0, 32], sizes = [8, 32], strides = [1, 1]} : vector<8x128xf32> to vector<8x32xf32>
    %86 = arith.negf %85 : vector<8x32xf32>
    %87 = math.exp %86 : vector<8x32xf32>
    %cst_16 = arith.constant 1.000000e+00 : f32
    %88 = vector.broadcast %cst_16 : f32 to vector<8x32xf32>
    %89 = arith.addf %88, %87 : vector<8x32xf32>
    %90 = arith.divf %88, %89 : vector<8x32xf32>
    %91 = vector.extract_strided_slice %78 {offsets = [0, 64], sizes = [8, 32], strides = [1, 1]} : vector<8x128xf32> to vector<8x32xf32>
    %92 = math.tanh %91 : vector<8x32xf32>
    %93 = vector.extract_strided_slice %78 {offsets = [0, 96], sizes = [8, 32], strides = [1, 1]} : vector<8x128xf32> to vector<8x32xf32>
    %94 = arith.negf %93 : vector<8x32xf32>
    %95 = math.exp %94 : vector<8x32xf32>
    %cst_17 = arith.constant 1.000000e+00 : f32
    %96 = vector.broadcast %cst_17 : f32 to vector<8x32xf32>
    %97 = arith.addf %96, %95 : vector<8x32xf32>
    %98 = arith.divf %96, %97 : vector<8x32xf32>
    %99 = arith.mulf %90, %72 : vector<8x32xf32>
    %100 = arith.mulf %84, %92 : vector<8x32xf32>
    %101 = arith.addf %99, %100 : vector<8x32xf32>
    %102 = math.tanh %101 : vector<8x32xf32>
    %103 = arith.mulf %98, %102 : vector<8x32xf32>
    %104 = vector.extract_strided_slice %13 {offsets = [3, 0, 0], sizes = [1, 8, 128], strides = [1, 1, 1]} : vector<8x8x128xf32> to vector<1x8x128xf32>
    %105 = vector.shape_cast %104 : vector<1x8x128xf32> to vector<8x128xf32>
    %cst_18 = arith.constant dense<0.000000e+00> : vector<8x128xf32>
    %106 = tpu.matmul %103, %14, %cst_18 {dimension_numbers = #tpu.dot_dimension_numbers<[1], [0], [0], [1], [0, 0, 1, 1], [], []>} : vector<8x32xf32>, vector<32x128xf32>, vector<8x128xf32> -> vector<8x128xf32>
    %107 = arith.addf %105, %106 : vector<8x128xf32>
    %108 = vector.extract_strided_slice %107 {offsets = [0, 0], sizes = [8, 32], strides = [1, 1]} : vector<8x128xf32> to vector<8x32xf32>
    %109 = arith.negf %108 : vector<8x32xf32>
    %110 = math.exp %109 : vector<8x32xf32>
    %cst_19 = arith.constant 1.000000e+00 : f32
    %111 = vector.broadcast %cst_19 : f32 to vector<8x32xf32>
    %112 = arith.addf %111, %110 : vector<8x32xf32>
    %113 = arith.divf %111, %112 : vector<8x32xf32>
    %114 = vector.extract_strided_slice %107 {offsets = [0, 32], sizes = [8, 32], strides = [1, 1]} : vector<8x128xf32> to vector<8x32xf32>
    %115 = arith.negf %114 : vector<8x32xf32>
    %116 = math.exp %115 : vector<8x32xf32>
    %cst_20 = arith.constant 1.000000e+00 : f32
    %117 = vector.broadcast %cst_20 : f32 to vector<8x32xf32>
    %118 = arith.addf %117, %116 : vector<8x32xf32>
    %119 = arith.divf %117, %118 : vector<8x32xf32>
    %120 = vector.extract_strided_slice %107 {offsets = [0, 64], sizes = [8, 32], strides = [1, 1]} : vector<8x128xf32> to vector<8x32xf32>
    %121 = math.tanh %120 : vector<8x32xf32>
    %122 = vector.extract_strided_slice %107 {offsets = [0, 96], sizes = [8, 32], strides = [1, 1]} : vector<8x128xf32> to vector<8x32xf32>
    %123 = arith.negf %122 : vector<8x32xf32>
    %124 = math.exp %123 : vector<8x32xf32>
    %cst_21 = arith.constant 1.000000e+00 : f32
    %125 = vector.broadcast %cst_21 : f32 to vector<8x32xf32>
    %126 = arith.addf %125, %124 : vector<8x32xf32>
    %127 = arith.divf %125, %126 : vector<8x32xf32>
    %128 = arith.mulf %119, %101 : vector<8x32xf32>
    %129 = arith.mulf %113, %121 : vector<8x32xf32>
    %130 = arith.addf %128, %129 : vector<8x32xf32>
    %131 = math.tanh %130 : vector<8x32xf32>
    %132 = arith.mulf %127, %131 : vector<8x32xf32>
    %133 = vector.extract_strided_slice %13 {offsets = [4, 0, 0], sizes = [1, 8, 128], strides = [1, 1, 1]} : vector<8x8x128xf32> to vector<1x8x128xf32>
    %134 = vector.shape_cast %133 : vector<1x8x128xf32> to vector<8x128xf32>
    %cst_22 = arith.constant dense<0.000000e+00> : vector<8x128xf32>
    %135 = tpu.matmul %132, %14, %cst_22 {dimension_numbers = #tpu.dot_dimension_numbers<[1], [0], [0], [1], [0, 0, 1, 1], [], []>} : vector<8x32xf32>, vector<32x128xf32>, vector<8x128xf32> -> vector<8x128xf32>
    %136 = arith.addf %134, %135 : vector<8x128xf32>
    %137 = vector.extract_strided_slice %136 {offsets = [0, 0], sizes = [8, 32], strides = [1, 1]} : vector<8x128xf32> to vector<8x32xf32>
    %138 = arith.negf %137 : vector<8x32xf32>
    %139 = math.exp %138 : vector<8x32xf32>
    %cst_23 = arith.constant 1.000000e+00 : f32
    %140 = vector.broadcast %cst_23 : f32 to vector<8x32xf32>
    %141 = arith.addf %140, %139 : vector<8x32xf32>
    %142 = arith.divf %140, %141 : vector<8x32xf32>
    %143 = vector.extract_strided_slice %136 {offsets = [0, 32], sizes = [8, 32], strides = [1, 1]} : vector<8x128xf32> to vector<8x32xf32>
    %144 = arith.negf %143 : vector<8x32xf32>
    %145 = math.exp %144 : vector<8x32xf32>
    %cst_24 = arith.constant 1.000000e+00 : f32
    %146 = vector.broadcast %cst_24 : f32 to vector<8x32xf32>
    %147 = arith.addf %146, %145 : vector<8x32xf32>
    %148 = arith.divf %146, %147 : vector<8x32xf32>
    %149 = vector.extract_strided_slice %136 {offsets = [0, 64], sizes = [8, 32], strides = [1, 1]} : vector<8x128xf32> to vector<8x32xf32>
    %150 = math.tanh %149 : vector<8x32xf32>
    %151 = vector.extract_strided_slice %136 {offsets = [0, 96], sizes = [8, 32], strides = [1, 1]} : vector<8x128xf32> to vector<8x32xf32>
    %152 = arith.negf %151 : vector<8x32xf32>
    %153 = math.exp %152 : vector<8x32xf32>
    %cst_25 = arith.constant 1.000000e+00 : f32
    %154 = vector.broadcast %cst_25 : f32 to vector<8x32xf32>
    %155 = arith.addf %154, %153 : vector<8x32xf32>
    %156 = arith.divf %154, %155 : vector<8x32xf32>
    %157 = arith.mulf %148, %130 : vector<8x32xf32>
    %158 = arith.mulf %142, %150 : vector<8x32xf32>
    %159 = arith.addf %157, %158 : vector<8x32xf32>
    %160 = math.tanh %159 : vector<8x32xf32>
    %161 = arith.mulf %156, %160 : vector<8x32xf32>
    %162 = vector.extract_strided_slice %13 {offsets = [5, 0, 0], sizes = [1, 8, 128], strides = [1, 1, 1]} : vector<8x8x128xf32> to vector<1x8x128xf32>
    %163 = vector.shape_cast %162 : vector<1x8x128xf32> to vector<8x128xf32>
    %cst_26 = arith.constant dense<0.000000e+00> : vector<8x128xf32>
    %164 = tpu.matmul %161, %14, %cst_26 {dimension_numbers = #tpu.dot_dimension_numbers<[1], [0], [0], [1], [0, 0, 1, 1], [], []>} : vector<8x32xf32>, vector<32x128xf32>, vector<8x128xf32> -> vector<8x128xf32>
    %165 = arith.addf %163, %164 : vector<8x128xf32>
    %166 = vector.extract_strided_slice %165 {offsets = [0, 0], sizes = [8, 32], strides = [1, 1]} : vector<8x128xf32> to vector<8x32xf32>
    %167 = arith.negf %166 : vector<8x32xf32>
    %168 = math.exp %167 : vector<8x32xf32>
    %cst_27 = arith.constant 1.000000e+00 : f32
    %169 = vector.broadcast %cst_27 : f32 to vector<8x32xf32>
    %170 = arith.addf %169, %168 : vector<8x32xf32>
    %171 = arith.divf %169, %170 : vector<8x32xf32>
    %172 = vector.extract_strided_slice %165 {offsets = [0, 32], sizes = [8, 32], strides = [1, 1]} : vector<8x128xf32> to vector<8x32xf32>
    %173 = arith.negf %172 : vector<8x32xf32>
    %174 = math.exp %173 : vector<8x32xf32>
    %cst_28 = arith.constant 1.000000e+00 : f32
    %175 = vector.broadcast %cst_28 : f32 to vector<8x32xf32>
    %176 = arith.addf %175, %174 : vector<8x32xf32>
    %177 = arith.divf %175, %176 : vector<8x32xf32>
    %178 = vector.extract_strided_slice %165 {offsets = [0, 64], sizes = [8, 32], strides = [1, 1]} : vector<8x128xf32> to vector<8x32xf32>
    %179 = math.tanh %178 : vector<8x32xf32>
    %180 = vector.extract_strided_slice %165 {offsets = [0, 96], sizes = [8, 32], strides = [1, 1]} : vector<8x128xf32> to vector<8x32xf32>
    %181 = arith.negf %180 : vector<8x32xf32>
    %182 = math.exp %181 : vector<8x32xf32>
    %cst_29 = arith.constant 1.000000e+00 : f32
    %183 = vector.broadcast %cst_29 : f32 to vector<8x32xf32>
    %184 = arith.addf %183, %182 : vector<8x32xf32>
    %185 = arith.divf %183, %184 : vector<8x32xf32>
    %186 = arith.mulf %177, %159 : vector<8x32xf32>
    %187 = arith.mulf %171, %179 : vector<8x32xf32>
    %188 = arith.addf %186, %187 : vector<8x32xf32>
    %189 = math.tanh %188 : vector<8x32xf32>
    %190 = arith.mulf %185, %189 : vector<8x32xf32>
    %191 = vector.extract_strided_slice %13 {offsets = [6, 0, 0], sizes = [1, 8, 128], strides = [1, 1, 1]} : vector<8x8x128xf32> to vector<1x8x128xf32>
    %192 = vector.shape_cast %191 : vector<1x8x128xf32> to vector<8x128xf32>
    %cst_30 = arith.constant dense<0.000000e+00> : vector<8x128xf32>
    %193 = tpu.matmul %190, %14, %cst_30 {dimension_numbers = #tpu.dot_dimension_numbers<[1], [0], [0], [1], [0, 0, 1, 1], [], []>} : vector<8x32xf32>, vector<32x128xf32>, vector<8x128xf32> -> vector<8x128xf32>
    %194 = arith.addf %192, %193 : vector<8x128xf32>
    %195 = vector.extract_strided_slice %194 {offsets = [0, 0], sizes = [8, 32], strides = [1, 1]} : vector<8x128xf32> to vector<8x32xf32>
    %196 = arith.negf %195 : vector<8x32xf32>
    %197 = math.exp %196 : vector<8x32xf32>
    %cst_31 = arith.constant 1.000000e+00 : f32
    %198 = vector.broadcast %cst_31 : f32 to vector<8x32xf32>
    %199 = arith.addf %198, %197 : vector<8x32xf32>
    %200 = arith.divf %198, %199 : vector<8x32xf32>
    %201 = vector.extract_strided_slice %194 {offsets = [0, 32], sizes = [8, 32], strides = [1, 1]} : vector<8x128xf32> to vector<8x32xf32>
    %202 = arith.negf %201 : vector<8x32xf32>
    %203 = math.exp %202 : vector<8x32xf32>
    %cst_32 = arith.constant 1.000000e+00 : f32
    %204 = vector.broadcast %cst_32 : f32 to vector<8x32xf32>
    %205 = arith.addf %204, %203 : vector<8x32xf32>
    %206 = arith.divf %204, %205 : vector<8x32xf32>
    %207 = vector.extract_strided_slice %194 {offsets = [0, 64], sizes = [8, 32], strides = [1, 1]} : vector<8x128xf32> to vector<8x32xf32>
    %208 = math.tanh %207 : vector<8x32xf32>
    %209 = vector.extract_strided_slice %194 {offsets = [0, 96], sizes = [8, 32], strides = [1, 1]} : vector<8x128xf32> to vector<8x32xf32>
    %210 = arith.negf %209 : vector<8x32xf32>
    %211 = math.exp %210 : vector<8x32xf32>
    %cst_33 = arith.constant 1.000000e+00 : f32
    %212 = vector.broadcast %cst_33 : f32 to vector<8x32xf32>
    %213 = arith.addf %212, %211 : vector<8x32xf32>
    %214 = arith.divf %212, %213 : vector<8x32xf32>
    %215 = arith.mulf %206, %188 : vector<8x32xf32>
    %216 = arith.mulf %200, %208 : vector<8x32xf32>
    %217 = arith.addf %215, %216 : vector<8x32xf32>
    %218 = math.tanh %217 : vector<8x32xf32>
    %219 = arith.mulf %214, %218 : vector<8x32xf32>
    %220 = vector.extract_strided_slice %13 {offsets = [7, 0, 0], sizes = [1, 8, 128], strides = [1, 1, 1]} : vector<8x8x128xf32> to vector<1x8x128xf32>
    %221 = vector.shape_cast %220 : vector<1x8x128xf32> to vector<8x128xf32>
    %cst_34 = arith.constant dense<0.000000e+00> : vector<8x128xf32>
    %222 = tpu.matmul %219, %14, %cst_34 {dimension_numbers = #tpu.dot_dimension_numbers<[1], [0], [0], [1], [0, 0, 1, 1], [], []>} : vector<8x32xf32>, vector<32x128xf32>, vector<8x128xf32> -> vector<8x128xf32>
    %223 = arith.addf %221, %222 : vector<8x128xf32>
    %224 = vector.extract_strided_slice %223 {offsets = [0, 0], sizes = [8, 32], strides = [1, 1]} : vector<8x128xf32> to vector<8x32xf32>
    %225 = arith.negf %224 : vector<8x32xf32>
    %226 = math.exp %225 : vector<8x32xf32>
    %cst_35 = arith.constant 1.000000e+00 : f32
    %227 = vector.broadcast %cst_35 : f32 to vector<8x32xf32>
    %228 = arith.addf %227, %226 : vector<8x32xf32>
    %229 = arith.divf %227, %228 : vector<8x32xf32>
    %230 = vector.extract_strided_slice %223 {offsets = [0, 32], sizes = [8, 32], strides = [1, 1]} : vector<8x128xf32> to vector<8x32xf32>
    %231 = arith.negf %230 : vector<8x32xf32>
    %232 = math.exp %231 : vector<8x32xf32>
    %cst_36 = arith.constant 1.000000e+00 : f32
    %233 = vector.broadcast %cst_36 : f32 to vector<8x32xf32>
    %234 = arith.addf %233, %232 : vector<8x32xf32>
    %235 = arith.divf %233, %234 : vector<8x32xf32>
    %236 = vector.extract_strided_slice %223 {offsets = [0, 64], sizes = [8, 32], strides = [1, 1]} : vector<8x128xf32> to vector<8x32xf32>
    %237 = math.tanh %236 : vector<8x32xf32>
    %238 = vector.extract_strided_slice %223 {offsets = [0, 96], sizes = [8, 32], strides = [1, 1]} : vector<8x128xf32> to vector<8x32xf32>
    %239 = arith.negf %238 : vector<8x32xf32>
    %240 = math.exp %239 : vector<8x32xf32>
    %cst_37 = arith.constant 1.000000e+00 : f32
    %241 = vector.broadcast %cst_37 : f32 to vector<8x32xf32>
    %242 = arith.addf %241, %240 : vector<8x32xf32>
    %243 = arith.divf %241, %242 : vector<8x32xf32>
    %244 = arith.mulf %235, %217 : vector<8x32xf32>
    %245 = arith.mulf %229, %237 : vector<8x32xf32>
    %246 = arith.addf %244, %245 : vector<8x32xf32>
    %247 = math.tanh %246 : vector<8x32xf32>
    %248 = arith.mulf %243, %247 : vector<8x32xf32>
    %249 = tpu.concatenate %45, %74, %103, %132, %161, %190, %219, %248 in 1 : vector<8x32xf32>, vector<8x32xf32>, vector<8x32xf32>, vector<8x32xf32>, vector<8x32xf32>, vector<8x32xf32>, vector<8x32xf32>, vector<8x32xf32> -> vector<8x256xf32>
    %c576 = arith.constant 576 : index
    %c0_38 = arith.constant 0 : index
    %250 = vector.load %arg1[%c576, %c0_38] : memref<1088x256xf32, #tpu.memory_space<vmem>>, vector<256x256xf32>
    %cst_39 = arith.constant dense<0.000000e+00> : vector<8x256xf32>
    %251 = tpu.matmul %249, %250, %cst_39 {dimension_numbers = #tpu.dot_dimension_numbers<[1], [0], [0], [1], [0, 0, 1, 1], [], []>} : vector<8x256xf32>, vector<256x256xf32>, vector<8x256xf32> -> vector<8x256xf32>
    %252 = tpu.iota {dimensions = array<i32: 1>} : vector<8x128xi32>
    %c128 = arith.constant 128 : index
    %c0_40 = arith.constant 0 : index
    %253 = vector.load %arg1[%c128, %c0_40] : memref<1088x256xf32, #tpu.memory_space<vmem>>, vector<128x128xf32>
    %cst_41 = arith.constant dense<0.000000e+00> : vector<8x128xf32>
    %254 = tpu.matmul %10, %253, %cst_41 {dimension_numbers = #tpu.dot_dimension_numbers<[1], [0], [0], [1], [0, 0, 1, 1], [], []>} : vector<8x128xf32>, vector<128x128xf32>, vector<8x128xf32> -> vector<8x128xf32>
    %c256 = arith.constant 256 : index
    %c0_42 = arith.constant 0 : index
    %255 = vector.load %arg1[%c256, %c0_42] : memref<1088x256xf32, #tpu.memory_space<vmem>>, vector<128x128xf32>
    %cst_43 = arith.constant dense<0.000000e+00> : vector<8x128xf32>
    %256 = tpu.matmul %10, %255, %cst_43 {dimension_numbers = #tpu.dot_dimension_numbers<[1], [0], [0], [1], [0, 0, 1, 1], [], []>} : vector<8x128xf32>, vector<128x128xf32>, vector<8x128xf32> -> vector<8x128xf32>
    %c416 = arith.constant 416 : index
    %c0_44 = arith.constant 0 : index
    %257 = vector.load %arg1[%c416, %c0_44] : memref<1088x256xf32, #tpu.memory_space<vmem>>, vector<32x128xf32>
    %cst_45 = arith.constant dense<0.000000e+00> : vector<8x128xf32>
    %258 = tpu.matmul %248, %257, %cst_45 {dimension_numbers = #tpu.dot_dimension_numbers<[1], [0], [0], [1], [0, 0, 1, 1], [], []>} : vector<8x32xf32>, vector<32x128xf32>, vector<8x128xf32> -> vector<8x128xf32>
    %c544 = arith.constant 544 : index
    %c0_46 = arith.constant 0 : index
    %259 = vector.load %arg1[%c544, %c0_46] : memref<1088x256xf32, #tpu.memory_space<vmem>>, vector<32x256xf32>
    %cst_47 = arith.constant dense<0.000000e+00> : vector<8x256xf32>
    %260 = tpu.matmul %248, %259, %cst_47 {dimension_numbers = #tpu.dot_dimension_numbers<[1], [0], [0], [1], [0, 0, 1, 1], [], []>} : vector<8x32xf32>, vector<32x256xf32>, vector<8x256xf32> -> vector<8x256xf32>
    %261 = arith.addf %251, %260 : vector<8x256xf32>
    %262 = math.tanh %261 : vector<8x256xf32>
    %c832 = arith.constant 832 : index
    %c0_48 = arith.constant 0 : index
    %263 = vector.load %arg1[%c832, %c0_48] : memref<1088x256xf32, #tpu.memory_space<vmem>>, vector<256x8xf32>
    %cst_49 = arith.constant dense<0.000000e+00> : vector<8x8xf32>
    %264 = tpu.matmul %262, %263, %cst_49 {dimension_numbers = #tpu.dot_dimension_numbers<[1], [0], [0], [1], [0, 0, 1, 1], [], []>} : vector<8x256xf32>, vector<256x8xf32>, vector<8x8xf32> -> vector<8x8xf32>
    %cst_50 = arith.constant dense<0xFF800000> : vector<8xf32>
    %265 = vector.multi_reduction <maximumf>, %264, %cst_50 [1] : vector<8x8xf32> to vector<8xf32>
    %266 = vector.shape_cast %265 : vector<8xf32> to vector<8x1xf32>
    %267 = vector.broadcast %266 : vector<8x1xf32> to vector<8x8xf32>
    %268 = arith.subf %264, %267 : vector<8x8xf32>
    %269 = math.exp %268 : vector<8x8xf32>
    %cst_51 = arith.constant dense<0.000000e+00> : vector<8xf32>
    %270 = vector.multi_reduction <add>, %269, %cst_51 [1] : vector<8x8xf32> to vector<8xf32>
    %271 = vector.shape_cast %270 : vector<8xf32> to vector<8x1xf32>
    %272 = vector.broadcast %271 : vector<8x1xf32> to vector<8x8xf32>
    %273 = arith.divf %269, %272 : vector<8x8xf32>
    %274 = vector.extract_strided_slice %273 {offsets = [0, 0], sizes = [8, 1], strides = [1, 1]} : vector<8x8xf32> to vector<8x1xf32>
    %275 = vector.broadcast %274 : vector<8x1xf32> to vector<8x32xf32>
    %276 = arith.mulf %275, %45 : vector<8x32xf32>
    %277 = vector.extract_strided_slice %273 {offsets = [0, 1], sizes = [8, 1], strides = [1, 1]} : vector<8x8xf32> to vector<8x1xf32>
    %278 = vector.broadcast %277 : vector<8x1xf32> to vector<8x32xf32>
    %279 = arith.mulf %278, %74 : vector<8x32xf32>
    %280 = arith.addf %276, %279 : vector<8x32xf32>
    %281 = vector.extract_strided_slice %273 {offsets = [0, 2], sizes = [8, 1], strides = [1, 1]} : vector<8x8xf32> to vector<8x1xf32>
    %282 = vector.broadcast %281 : vector<8x1xf32> to vector<8x32xf32>
    %283 = arith.mulf %282, %103 : vector<8x32xf32>
    %284 = arith.addf %280, %283 : vector<8x32xf32>
    %285 = vector.extract_strided_slice %273 {offsets = [0, 3], sizes = [8, 1], strides = [1, 1]} : vector<8x8xf32> to vector<8x1xf32>
    %286 = vector.broadcast %285 : vector<8x1xf32> to vector<8x32xf32>
    %287 = arith.mulf %286, %132 : vector<8x32xf32>
    %288 = arith.addf %284, %287 : vector<8x32xf32>
    %289 = vector.extract_strided_slice %273 {offsets = [0, 4], sizes = [8, 1], strides = [1, 1]} : vector<8x8xf32> to vector<8x1xf32>
    %290 = vector.broadcast %289 : vector<8x1xf32> to vector<8x32xf32>
    %291 = arith.mulf %290, %161 : vector<8x32xf32>
    %292 = arith.addf %288, %291 : vector<8x32xf32>
    %293 = vector.extract_strided_slice %273 {offsets = [0, 5], sizes = [8, 1], strides = [1, 1]} : vector<8x8xf32> to vector<8x1xf32>
    %294 = vector.broadcast %293 : vector<8x1xf32> to vector<8x32xf32>
    %295 = arith.mulf %294, %190 : vector<8x32xf32>
    %296 = arith.addf %292, %295 : vector<8x32xf32>
    %297 = vector.extract_strided_slice %273 {offsets = [0, 6], sizes = [8, 1], strides = [1, 1]} : vector<8x8xf32> to vector<8x1xf32>
    %298 = vector.broadcast %297 : vector<8x1xf32> to vector<8x32xf32>
    %299 = arith.mulf %298, %219 : vector<8x32xf32>
    %300 = arith.addf %296, %299 : vector<8x32xf32>
    %301 = vector.extract_strided_slice %273 {offsets = [0, 7], sizes = [8, 1], strides = [1, 1]} : vector<8x8xf32> to vector<8x1xf32>
    %302 = vector.broadcast %301 : vector<8x1xf32> to vector<8x32xf32>
    %303 = arith.mulf %302, %248 : vector<8x32xf32>
    %304 = arith.addf %300, %303 : vector<8x32xf32>
    %c448 = arith.constant 448 : index
    %c0_52 = arith.constant 0 : index
    %305 = vector.load %arg1[%c448, %c0_52] : memref<1088x256xf32, #tpu.memory_space<vmem>>, vector<32x128xf32>
    %cst_53 = arith.constant dense<0.000000e+00> : vector<8x128xf32>
    %306 = tpu.matmul %304, %305, %cst_53 {dimension_numbers = #tpu.dot_dimension_numbers<[1], [0], [0], [1], [0, 0, 1, 1], [], []>} : vector<8x32xf32>, vector<32x128xf32>, vector<8x128xf32> -> vector<8x128xf32>
    %c512 = arith.constant 512 : index
    %c0_54 = arith.constant 0 : index
    %307 = vector.load %arg1[%c512, %c0_54] : memref<1088x256xf32, #tpu.memory_space<vmem>>, vector<32x128xf32>
    %cst_55 = arith.constant dense<0.000000e+00> : vector<8x128xf32>
    %308 = tpu.matmul %304, %307, %cst_55 {dimension_numbers = #tpu.dot_dimension_numbers<[1], [0], [0], [1], [0, 0, 1, 1], [], []>} : vector<8x32xf32>, vector<32x128xf32>, vector<8x128xf32> -> vector<8x128xf32>
    %309 = arith.addf %254, %258 : vector<8x128xf32>
    %310 = arith.addf %309, %306 : vector<8x128xf32>
    %311 = vector.extract_strided_slice %310 {offsets = [0, 0], sizes = [8, 32], strides = [1, 1]} : vector<8x128xf32> to vector<8x32xf32>
    %312 = arith.negf %311 : vector<8x32xf32>
    %313 = math.exp %312 : vector<8x32xf32>
    %cst_56 = arith.constant 1.000000e+00 : f32
    %314 = vector.broadcast %cst_56 : f32 to vector<8x32xf32>
    %315 = arith.addf %314, %313 : vector<8x32xf32>
    %316 = arith.divf %314, %315 : vector<8x32xf32>
    %317 = vector.extract_strided_slice %310 {offsets = [0, 32], sizes = [8, 32], strides = [1, 1]} : vector<8x128xf32> to vector<8x32xf32>
    %318 = arith.negf %317 : vector<8x32xf32>
    %319 = math.exp %318 : vector<8x32xf32>
    %cst_57 = arith.constant 1.000000e+00 : f32
    %320 = vector.broadcast %cst_57 : f32 to vector<8x32xf32>
    %321 = arith.addf %320, %319 : vector<8x32xf32>
    %322 = arith.divf %320, %321 : vector<8x32xf32>
    %323 = vector.extract_strided_slice %310 {offsets = [0, 64], sizes = [8, 32], strides = [1, 1]} : vector<8x128xf32> to vector<8x32xf32>
    %324 = math.tanh %323 : vector<8x32xf32>
    %325 = vector.extract_strided_slice %310 {offsets = [0, 96], sizes = [8, 32], strides = [1, 1]} : vector<8x128xf32> to vector<8x32xf32>
    %326 = arith.negf %325 : vector<8x32xf32>
    %327 = math.exp %326 : vector<8x32xf32>
    %cst_58 = arith.constant 1.000000e+00 : f32
    %328 = vector.broadcast %cst_58 : f32 to vector<8x32xf32>
    %329 = arith.addf %328, %327 : vector<8x32xf32>
    %330 = arith.divf %328, %329 : vector<8x32xf32>
    %331 = arith.mulf %322, %246 : vector<8x32xf32>
    %332 = arith.mulf %316, %324 : vector<8x32xf32>
    %333 = arith.addf %331, %332 : vector<8x32xf32>
    %334 = math.tanh %333 : vector<8x32xf32>
    %335 = arith.mulf %330, %334 : vector<8x32xf32>
    %336 = arith.addf %256, %308 : vector<8x128xf32>
    %c480 = arith.constant 480 : index
    %c0_59 = arith.constant 0 : index
    %337 = vector.load %arg1[%c480, %c0_59] : memref<1088x256xf32, #tpu.memory_space<vmem>>, vector<32x128xf32>
    %cst_60 = arith.constant dense<0.000000e+00> : vector<8x128xf32>
    %338 = tpu.matmul %335, %337, %cst_60 {dimension_numbers = #tpu.dot_dimension_numbers<[1], [0], [0], [1], [0, 0, 1, 1], [], []>} : vector<8x32xf32>, vector<32x128xf32>, vector<8x128xf32> -> vector<8x128xf32>
    %339 = arith.addf %336, %338 : vector<8x128xf32>
    %c0_61 = arith.constant 0 : index
    %c0_62 = arith.constant 0 : index
    %c0_63 = arith.constant 0 : index
    %340 = vector.load %arg2[%c0_61, %c0_62, %c0_63] : memref<7x8x128xf32, #tpu.memory_space<vmem>>, vector<1x8x128xf32>
    %341 = vector.shape_cast %340 : vector<1x8x128xf32> to vector<8x128xf32>
    %342 = vector.shape_cast %339 : vector<8x128xf32> to vector<1x8x128xf32>
    tpu.vector_store %arg2[%c0_61, %c0_62, %c0_63], %342 {strides = array<i32>} : memref<7x8x128xf32, #tpu.memory_space<vmem>>, vector<1x8x128xf32>,
    %cst_64 = arith.constant dense<0xFF800000> : vector<8xf32>
    %343 = vector.multi_reduction <maximumf>, %339, %cst_64 [1] : vector<8x128xf32> to vector<8xf32>
    %344 = vector.shape_cast %343 : vector<8xf32> to vector<8x1xf32>
    %345 = vector.broadcast %344 : vector<8x1xf32> to vector<8x128xf32>
    %346 = arith.cmpf oeq, %339, %345 : vector<8x128xf32>
    %c128_i32 = arith.constant 128 : i32
    %347 = vector.broadcast %c128_i32 : i32 to vector<8x128xi32>
    %348 = arith.select %346, %252, %347 : vector<8x128xi1>, vector<8x128xi32>
    %cst_65 = arith.constant dense<2147483647> : vector<8xi32>
    %349 = vector.multi_reduction <minsi>, %348, %cst_65 [1] : vector<8x128xi32> to vector<8xi32>
    %350 = vector.shape_cast %349 : vector<8xi32> to vector<8x1xi32>
    %351 = vector.broadcast %350 : vector<8x1xi32> to vector<8x128xi32>
    %352 = arith.cmpi eq, %252, %351 : vector<8x128xi32>
    %353 = arith.extui %352 : vector<8x128xi1> to vector<8x128xi32>
    %354 = arith.sitofp %353 : vector<8x128xi32> to vector<8x128xf32>
    %c128_66 = arith.constant 128 : index
    %c0_67 = arith.constant 0 : index
    %355 = vector.load %arg1[%c128_66, %c0_67] : memref<1088x256xf32, #tpu.memory_space<vmem>>, vector<128x128xf32>
    %cst_68 = arith.constant dense<0.000000e+00> : vector<8x128xf32>
    %356 = tpu.matmul %354, %355, %cst_68 {dimension_numbers = #tpu.dot_dimension_numbers<[1], [0], [0], [1], [0, 0, 1, 1], [], []>} : vector<8x128xf32>, vector<128x128xf32>, vector<8x128xf32> -> vector<8x128xf32>
    %c256_69 = arith.constant 256 : index
    %c0_70 = arith.constant 0 : index
    %357 = vector.load %arg1[%c256_69, %c0_70] : memref<1088x256xf32, #tpu.memory_space<vmem>>, vector<128x128xf32>
    %cst_71 = arith.constant dense<0.000000e+00> : vector<8x128xf32>
    %358 = tpu.matmul %354, %357, %cst_71 {dimension_numbers = #tpu.dot_dimension_numbers<[1], [0], [0], [1], [0, 0, 1, 1], [], []>} : vector<8x128xf32>, vector<128x128xf32>, vector<8x128xf32> -> vector<8x128xf32>
    %c416_72 = arith.constant 416 : index
    %c0_73 = arith.constant 0 : index
    %359 = vector.load %arg1[%c416_72, %c0_73] : memref<1088x256xf32, #tpu.memory_space<vmem>>, vector<32x128xf32>
    %cst_74 = arith.constant dense<0.000000e+00> : vector<8x128xf32>
    %360 = tpu.matmul %335, %359, %cst_74 {dimension_numbers = #tpu.dot_dimension_numbers<[1], [0], [0], [1], [0, 0, 1, 1], [], []>} : vector<8x32xf32>, vector<32x128xf32>, vector<8x128xf32> -> vector<8x128xf32>
    %c544_75 = arith.constant 544 : index
    %c0_76 = arith.constant 0 : index
    %361 = vector.load %arg1[%c544_75, %c0_76] : memref<1088x256xf32, #tpu.memory_space<vmem>>, vector<32x256xf32>
    %cst_77 = arith.constant dense<0.000000e+00> : vector<8x256xf32>
    %362 = tpu.matmul %335, %361, %cst_77 {dimension_numbers = #tpu.dot_dimension_numbers<[1], [0], [0], [1], [0, 0, 1, 1], [], []>} : vector<8x32xf32>, vector<32x256xf32>, vector<8x256xf32> -> vector<8x256xf32>
    %363 = arith.addf %251, %362 : vector<8x256xf32>
    %364 = math.tanh %363 : vector<8x256xf32>
    %c832_78 = arith.constant 832 : index
    %c0_79 = arith.constant 0 : index
    %365 = vector.load %arg1[%c832_78, %c0_79] : memref<1088x256xf32, #tpu.memory_space<vmem>>, vector<256x8xf32>
    %cst_80 = arith.constant dense<0.000000e+00> : vector<8x8xf32>
    %366 = tpu.matmul %364, %365, %cst_80 {dimension_numbers = #tpu.dot_dimension_numbers<[1], [0], [0], [1], [0, 0, 1, 1], [], []>} : vector<8x256xf32>, vector<256x8xf32>, vector<8x8xf32> -> vector<8x8xf32>
    %cst_81 = arith.constant dense<0xFF800000> : vector<8xf32>
    %367 = vector.multi_reduction <maximumf>, %366, %cst_81 [1] : vector<8x8xf32> to vector<8xf32>
    %368 = vector.shape_cast %367 : vector<8xf32> to vector<8x1xf32>
    %369 = vector.broadcast %368 : vector<8x1xf32> to vector<8x8xf32>
    %370 = arith.subf %366, %369 : vector<8x8xf32>
    %371 = math.exp %370 : vector<8x8xf32>
    %cst_82 = arith.constant dense<0.000000e+00> : vector<8xf32>
    %372 = vector.multi_reduction <add>, %371, %cst_82 [1] : vector<8x8xf32> to vector<8xf32>
    %373 = vector.shape_cast %372 : vector<8xf32> to vector<8x1xf32>
    %374 = vector.broadcast %373 : vector<8x1xf32> to vector<8x8xf32>
    %375 = arith.divf %371, %374 : vector<8x8xf32>
    %376 = vector.extract_strided_slice %375 {offsets = [0, 0], sizes = [8, 1], strides = [1, 1]} : vector<8x8xf32> to vector<8x1xf32>
    %377 = vector.broadcast %376 : vector<8x1xf32> to vector<8x32xf32>
    %378 = arith.mulf %377, %45 : vector<8x32xf32>
    %379 = vector.extract_strided_slice %375 {offsets = [0, 1], sizes = [8, 1], strides = [1, 1]} : vector<8x8xf32> to vector<8x1xf32>
    %380 = vector.broadcast %379 : vector<8x1xf32> to vector<8x32xf32>
    %381 = arith.mulf %380, %74 : vector<8x32xf32>
    %382 = arith.addf %378, %381 : vector<8x32xf32>
    %383 = vector.extract_strided_slice %375 {offsets = [0, 2], sizes = [8, 1], strides = [1, 1]} : vector<8x8xf32> to vector<8x1xf32>
    %384 = vector.broadcast %383 : vector<8x1xf32> to vector<8x32xf32>
    %385 = arith.mulf %384, %103 : vector<8x32xf32>
    %386 = arith.addf %382, %385 : vector<8x32xf32>
    %387 = vector.extract_strided_slice %375 {offsets = [0, 3], sizes = [8, 1], strides = [1, 1]} : vector<8x8xf32> to vector<8x1xf32>
    %388 = vector.broadcast %387 : vector<8x1xf32> to vector<8x32xf32>
    %389 = arith.mulf %388, %132 : vector<8x32xf32>
    %390 = arith.addf %386, %389 : vector<8x32xf32>
    %391 = vector.extract_strided_slice %375 {offsets = [0, 4], sizes = [8, 1], strides = [1, 1]} : vector<8x8xf32> to vector<8x1xf32>
    %392 = vector.broadcast %391 : vector<8x1xf32> to vector<8x32xf32>
    %393 = arith.mulf %392, %161 : vector<8x32xf32>
    %394 = arith.addf %390, %393 : vector<8x32xf32>
    %395 = vector.extract_strided_slice %375 {offsets = [0, 5], sizes = [8, 1], strides = [1, 1]} : vector<8x8xf32> to vector<8x1xf32>
    %396 = vector.broadcast %395 : vector<8x1xf32> to vector<8x32xf32>
    %397 = arith.mulf %396, %190 : vector<8x32xf32>
    %398 = arith.addf %394, %397 : vector<8x32xf32>
    %399 = vector.extract_strided_slice %375 {offsets = [0, 6], sizes = [8, 1], strides = [1, 1]} : vector<8x8xf32> to vector<8x1xf32>
    %400 = vector.broadcast %399 : vector<8x1xf32> to vector<8x32xf32>
    %401 = arith.mulf %400, %219 : vector<8x32xf32>
    %402 = arith.addf %398, %401 : vector<8x32xf32>
    %403 = vector.extract_strided_slice %375 {offsets = [0, 7], sizes = [8, 1], strides = [1, 1]} : vector<8x8xf32> to vector<8x1xf32>
    %404 = vector.broadcast %403 : vector<8x1xf32> to vector<8x32xf32>
    %405 = arith.mulf %404, %248 : vector<8x32xf32>
    %406 = arith.addf %402, %405 : vector<8x32xf32>
    %c448_83 = arith.constant 448 : index
    %c0_84 = arith.constant 0 : index
    %407 = vector.load %arg1[%c448_83, %c0_84] : memref<1088x256xf32, #tpu.memory_space<vmem>>, vector<32x128xf32>
    %cst_85 = arith.constant dense<0.000000e+00> : vector<8x128xf32>
    %408 = tpu.matmul %406, %407, %cst_85 {dimension_numbers = #tpu.dot_dimension_numbers<[1], [0], [0], [1], [0, 0, 1, 1], [], []>} : vector<8x32xf32>, vector<32x128xf32>, vector<8x128xf32> -> vector<8x128xf32>
    %c512_86 = arith.constant 512 : index
    %c0_87 = arith.constant 0 : index
    %409 = vector.load %arg1[%c512_86, %c0_87] : memref<1088x256xf32, #tpu.memory_space<vmem>>, vector<32x128xf32>
    %cst_88 = arith.constant dense<0.000000e+00> : vector<8x128xf32>
    %410 = tpu.matmul %406, %409, %cst_88 {dimension_numbers = #tpu.dot_dimension_numbers<[1], [0], [0], [1], [0, 0, 1, 1], [], []>} : vector<8x32xf32>, vector<32x128xf32>, vector<8x128xf32> -> vector<8x128xf32>
    %411 = arith.addf %356, %360 : vector<8x128xf32>
    %412 = arith.addf %411, %408 : vector<8x128xf32>
    %413 = vector.extract_strided_slice %412 {offsets = [0, 0], sizes = [8, 32], strides = [1, 1]} : vector<8x128xf32> to vector<8x32xf32>
    %414 = arith.negf %413 : vector<8x32xf32>
    %415 = math.exp %414 : vector<8x32xf32>
    %cst_89 = arith.constant 1.000000e+00 : f32
    %416 = vector.broadcast %cst_89 : f32 to vector<8x32xf32>
    %417 = arith.addf %416, %415 : vector<8x32xf32>
    %418 = arith.divf %416, %417 : vector<8x32xf32>
    %419 = vector.extract_strided_slice %412 {offsets = [0, 32], sizes = [8, 32], strides = [1, 1]} : vector<8x128xf32> to vector<8x32xf32>
    %420 = arith.negf %419 : vector<8x32xf32>
    %421 = math.exp %420 : vector<8x32xf32>
    %cst_90 = arith.constant 1.000000e+00 : f32
    %422 = vector.broadcast %cst_90 : f32 to vector<8x32xf32>
    %423 = arith.addf %422, %421 : vector<8x32xf32>
    %424 = arith.divf %422, %423 : vector<8x32xf32>
    %425 = vector.extract_strided_slice %412 {offsets = [0, 64], sizes = [8, 32], strides = [1, 1]} : vector<8x128xf32> to vector<8x32xf32>
    %426 = math.tanh %425 : vector<8x32xf32>
    %427 = vector.extract_strided_slice %412 {offsets = [0, 96], sizes = [8, 32], strides = [1, 1]} : vector<8x128xf32> to vector<8x32xf32>
    %428 = arith.negf %427 : vector<8x32xf32>
    %429 = math.exp %428 : vector<8x32xf32>
    %cst_91 = arith.constant 1.000000e+00 : f32
    %430 = vector.broadcast %cst_91 : f32 to vector<8x32xf32>
    %431 = arith.addf %430, %429 : vector<8x32xf32>
    %432 = arith.divf %430, %431 : vector<8x32xf32>
    %433 = arith.mulf %424, %333 : vector<8x32xf32>
    %434 = arith.mulf %418, %426 : vector<8x32xf32>
    %435 = arith.addf %433, %434 : vector<8x32xf32>
    %436 = math.tanh %435 : vector<8x32xf32>
    %437 = arith.mulf %432, %436 : vector<8x32xf32>
    %438 = arith.addf %358, %410 : vector<8x128xf32>
    %c480_92 = arith.constant 480 : index
    %c0_93 = arith.constant 0 : index
    %439 = vector.load %arg1[%c480_92, %c0_93] : memref<1088x256xf32, #tpu.memory_space<vmem>>, vector<32x128xf32>
    %cst_94 = arith.constant dense<0.000000e+00> : vector<8x128xf32>
    %440 = tpu.matmul %437, %439, %cst_94 {dimension_numbers = #tpu.dot_dimension_numbers<[1], [0], [0], [1], [0, 0, 1, 1], [], []>} : vector<8x32xf32>, vector<32x128xf32>, vector<8x128xf32> -> vector<8x128xf32>
    %441 = arith.addf %438, %440 : vector<8x128xf32>
    %c1 = arith.constant 1 : index
    %c0_95 = arith.constant 0 : index
    %c0_96 = arith.constant 0 : index
    %442 = vector.load %arg2[%c1, %c0_95, %c0_96] : memref<7x8x128xf32, #tpu.memory_space<vmem>>, vector<1x8x128xf32>
    %443 = vector.shape_cast %442 : vector<1x8x128xf32> to vector<8x128xf32>
    %444 = vector.shape_cast %441 : vector<8x128xf32> to vector<1x8x128xf32>
    tpu.vector_store %arg2[%c1, %c0_95, %c0_96], %444 {strides = array<i32>} : memref<7x8x128xf32, #tpu.memory_space<vmem>>, vector<1x8x128xf32>,
    %cst_97 = arith.constant dense<0xFF800000> : vector<8xf32>
    %445 = vector.multi_reduction <maximumf>, %441, %cst_97 [1] : vector<8x128xf32> to vector<8xf32>
    %446 = vector.shape_cast %445 : vector<8xf32> to vector<8x1xf32>
    %447 = vector.broadcast %446 : vector<8x1xf32> to vector<8x128xf32>
    %448 = arith.cmpf oeq, %441, %447 : vector<8x128xf32>
    %c128_i32_98 = arith.constant 128 : i32
    %449 = vector.broadcast %c128_i32_98 : i32 to vector<8x128xi32>
    %450 = arith.select %448, %252, %449 : vector<8x128xi1>, vector<8x128xi32>
    %cst_99 = arith.constant dense<2147483647> : vector<8xi32>
    %451 = vector.multi_reduction <minsi>, %450, %cst_99 [1] : vector<8x128xi32> to vector<8xi32>
    %452 = vector.shape_cast %451 : vector<8xi32> to vector<8x1xi32>
    %453 = vector.broadcast %452 : vector<8x1xi32> to vector<8x128xi32>
    %454 = arith.cmpi eq, %252, %453 : vector<8x128xi32>
    %455 = arith.extui %454 : vector<8x128xi1> to vector<8x128xi32>
    %456 = arith.sitofp %455 : vector<8x128xi32> to vector<8x128xf32>
    %c128_100 = arith.constant 128 : index
    %c0_101 = arith.constant 0 : index
    %457 = vector.load %arg1[%c128_100, %c0_101] : memref<1088x256xf32, #tpu.memory_space<vmem>>, vector<128x128xf32>
    %cst_102 = arith.constant dense<0.000000e+00> : vector<8x128xf32>
    %458 = tpu.matmul %456, %457, %cst_102 {dimension_numbers = #tpu.dot_dimension_numbers<[1], [0], [0], [1], [0, 0, 1, 1], [], []>} : vector<8x128xf32>, vector<128x128xf32>, vector<8x128xf32> -> vector<8x128xf32>
    %c256_103 = arith.constant 256 : index
    %c0_104 = arith.constant 0 : index
    %459 = vector.load %arg1[%c256_103, %c0_104] : memref<1088x256xf32, #tpu.memory_space<vmem>>, vector<128x128xf32>
    %cst_105 = arith.constant dense<0.000000e+00> : vector<8x128xf32>
    %460 = tpu.matmul %456, %459, %cst_105 {dimension_numbers = #tpu.dot_dimension_numbers<[1], [0], [0], [1], [0, 0, 1, 1], [], []>} : vector<8x128xf32>, vector<128x128xf32>, vector<8x128xf32> -> vector<8x128xf32>
    %c416_106 = arith.constant 416 : index
    %c0_107 = arith.constant 0 : index
    %461 = vector.load %arg1[%c416_106, %c0_107] : memref<1088x256xf32, #tpu.memory_space<vmem>>, vector<32x128xf32>
    %cst_108 = arith.constant dense<0.000000e+00> : vector<8x128xf32>
    %462 = tpu.matmul %437, %461, %cst_108 {dimension_numbers = #tpu.dot_dimension_numbers<[1], [0], [0], [1], [0, 0, 1, 1], [], []>} : vector<8x32xf32>, vector<32x128xf32>, vector<8x128xf32> -> vector<8x128xf32>
    %c544_109 = arith.constant 544 : index
    %c0_110 = arith.constant 0 : index
    %463 = vector.load %arg1[%c544_109, %c0_110] : memref<1088x256xf32, #tpu.memory_space<vmem>>, vector<32x256xf32>
    %cst_111 = arith.constant dense<0.000000e+00> : vector<8x256xf32>
    %464 = tpu.matmul %437, %463, %cst_111 {dimension_numbers = #tpu.dot_dimension_numbers<[1], [0], [0], [1], [0, 0, 1, 1], [], []>} : vector<8x32xf32>, vector<32x256xf32>, vector<8x256xf32> -> vector<8x256xf32>
    %465 = arith.addf %251, %464 : vector<8x256xf32>
    %466 = math.tanh %465 : vector<8x256xf32>
    %c832_112 = arith.constant 832 : index
    %c0_113 = arith.constant 0 : index
    %467 = vector.load %arg1[%c832_112, %c0_113] : memref<1088x256xf32, #tpu.memory_space<vmem>>, vector<256x8xf32>
    %cst_114 = arith.constant dense<0.000000e+00> : vector<8x8xf32>
    %468 = tpu.matmul %466, %467, %cst_114 {dimension_numbers = #tpu.dot_dimension_numbers<[1], [0], [0], [1], [0, 0, 1, 1], [], []>} : vector<8x256xf32>, vector<256x8xf32>, vector<8x8xf32> -> vector<8x8xf32>
    %cst_115 = arith.constant dense<0xFF800000> : vector<8xf32>
    %469 = vector.multi_reduction <maximumf>, %468, %cst_115 [1] : vector<8x8xf32> to vector<8xf32>
    %470 = vector.shape_cast %469 : vector<8xf32> to vector<8x1xf32>
    %471 = vector.broadcast %470 : vector<8x1xf32> to vector<8x8xf32>
    %472 = arith.subf %468, %471 : vector<8x8xf32>
    %473 = math.exp %472 : vector<8x8xf32>
    %cst_116 = arith.constant dense<0.000000e+00> : vector<8xf32>
    %474 = vector.multi_reduction <add>, %473, %cst_116 [1] : vector<8x8xf32> to vector<8xf32>
    %475 = vector.shape_cast %474 : vector<8xf32> to vector<8x1xf32>
    %476 = vector.broadcast %475 : vector<8x1xf32> to vector<8x8xf32>
    %477 = arith.divf %473, %476 : vector<8x8xf32>
    %478 = vector.extract_strided_slice %477 {offsets = [0, 0], sizes = [8, 1], strides = [1, 1]} : vector<8x8xf32> to vector<8x1xf32>
    %479 = vector.broadcast %478 : vector<8x1xf32> to vector<8x32xf32>
    %480 = arith.mulf %479, %45 : vector<8x32xf32>
    %481 = vector.extract_strided_slice %477 {offsets = [0, 1], sizes = [8, 1], strides = [1, 1]} : vector<8x8xf32> to vector<8x1xf32>
    %482 = vector.broadcast %481 : vector<8x1xf32> to vector<8x32xf32>
    %483 = arith.mulf %482, %74 : vector<8x32xf32>
    %484 = arith.addf %480, %483 : vector<8x32xf32>
    %485 = vector.extract_strided_slice %477 {offsets = [0, 2], sizes = [8, 1], strides = [1, 1]} : vector<8x8xf32> to vector<8x1xf32>
    %486 = vector.broadcast %485 : vector<8x1xf32> to vector<8x32xf32>
    %487 = arith.mulf %486, %103 : vector<8x32xf32>
    %488 = arith.addf %484, %487 : vector<8x32xf32>
    %489 = vector.extract_strided_slice %477 {offsets = [0, 3], sizes = [8, 1], strides = [1, 1]} : vector<8x8xf32> to vector<8x1xf32>
    %490 = vector.broadcast %489 : vector<8x1xf32> to vector<8x32xf32>
    %491 = arith.mulf %490, %132 : vector<8x32xf32>
    %492 = arith.addf %488, %491 : vector<8x32xf32>
    %493 = vector.extract_strided_slice %477 {offsets = [0, 4], sizes = [8, 1], strides = [1, 1]} : vector<8x8xf32> to vector<8x1xf32>
    %494 = vector.broadcast %493 : vector<8x1xf32> to vector<8x32xf32>
    %495 = arith.mulf %494, %161 : vector<8x32xf32>
    %496 = arith.addf %492, %495 : vector<8x32xf32>
    %497 = vector.extract_strided_slice %477 {offsets = [0, 5], sizes = [8, 1], strides = [1, 1]} : vector<8x8xf32> to vector<8x1xf32>
    %498 = vector.broadcast %497 : vector<8x1xf32> to vector<8x32xf32>
    %499 = arith.mulf %498, %190 : vector<8x32xf32>
    %500 = arith.addf %496, %499 : vector<8x32xf32>
    %501 = vector.extract_strided_slice %477 {offsets = [0, 6], sizes = [8, 1], strides = [1, 1]} : vector<8x8xf32> to vector<8x1xf32>
    %502 = vector.broadcast %501 : vector<8x1xf32> to vector<8x32xf32>
    %503 = arith.mulf %502, %219 : vector<8x32xf32>
    %504 = arith.addf %500, %503 : vector<8x32xf32>
    %505 = vector.extract_strided_slice %477 {offsets = [0, 7], sizes = [8, 1], strides = [1, 1]} : vector<8x8xf32> to vector<8x1xf32>
    %506 = vector.broadcast %505 : vector<8x1xf32> to vector<8x32xf32>
    %507 = arith.mulf %506, %248 : vector<8x32xf32>
    %508 = arith.addf %504, %507 : vector<8x32xf32>
    %c448_117 = arith.constant 448 : index
    %c0_118 = arith.constant 0 : index
    %509 = vector.load %arg1[%c448_117, %c0_118] : memref<1088x256xf32, #tpu.memory_space<vmem>>, vector<32x128xf32>
    %cst_119 = arith.constant dense<0.000000e+00> : vector<8x128xf32>
    %510 = tpu.matmul %508, %509, %cst_119 {dimension_numbers = #tpu.dot_dimension_numbers<[1], [0], [0], [1], [0, 0, 1, 1], [], []>} : vector<8x32xf32>, vector<32x128xf32>, vector<8x128xf32> -> vector<8x128xf32>
    %c512_120 = arith.constant 512 : index
    %c0_121 = arith.constant 0 : index
    %511 = vector.load %arg1[%c512_120, %c0_121] : memref<1088x256xf32, #tpu.memory_space<vmem>>, vector<32x128xf32>
    %cst_122 = arith.constant dense<0.000000e+00> : vector<8x128xf32>
    %512 = tpu.matmul %508, %511, %cst_122 {dimension_numbers = #tpu.dot_dimension_numbers<[1], [0], [0], [1], [0, 0, 1, 1], [], []>} : vector<8x32xf32>, vector<32x128xf32>, vector<8x128xf32> -> vector<8x128xf32>
    %513 = arith.addf %458, %462 : vector<8x128xf32>
    %514 = arith.addf %513, %510 : vector<8x128xf32>
    %515 = vector.extract_strided_slice %514 {offsets = [0, 0], sizes = [8, 32], strides = [1, 1]} : vector<8x128xf32> to vector<8x32xf32>
    %516 = arith.negf %515 : vector<8x32xf32>
    %517 = math.exp %516 : vector<8x32xf32>
    %cst_123 = arith.constant 1.000000e+00 : f32
    %518 = vector.broadcast %cst_123 : f32 to vector<8x32xf32>
    %519 = arith.addf %518, %517 : vector<8x32xf32>
    %520 = arith.divf %518, %519 : vector<8x32xf32>
    %521 = vector.extract_strided_slice %514 {offsets = [0, 32], sizes = [8, 32], strides = [1, 1]} : vector<8x128xf32> to vector<8x32xf32>
    %522 = arith.negf %521 : vector<8x32xf32>
    %523 = math.exp %522 : vector<8x32xf32>
    %cst_124 = arith.constant 1.000000e+00 : f32
    %524 = vector.broadcast %cst_124 : f32 to vector<8x32xf32>
    %525 = arith.addf %524, %523 : vector<8x32xf32>
    %526 = arith.divf %524, %525 : vector<8x32xf32>
    %527 = vector.extract_strided_slice %514 {offsets = [0, 64], sizes = [8, 32], strides = [1, 1]} : vector<8x128xf32> to vector<8x32xf32>
    %528 = math.tanh %527 : vector<8x32xf32>
    %529 = vector.extract_strided_slice %514 {offsets = [0, 96], sizes = [8, 32], strides = [1, 1]} : vector<8x128xf32> to vector<8x32xf32>
    %530 = arith.negf %529 : vector<8x32xf32>
    %531 = math.exp %530 : vector<8x32xf32>
    %cst_125 = arith.constant 1.000000e+00 : f32
    %532 = vector.broadcast %cst_125 : f32 to vector<8x32xf32>
    %533 = arith.addf %532, %531 : vector<8x32xf32>
    %534 = arith.divf %532, %533 : vector<8x32xf32>
    %535 = arith.mulf %526, %435 : vector<8x32xf32>
    %536 = arith.mulf %520, %528 : vector<8x32xf32>
    %537 = arith.addf %535, %536 : vector<8x32xf32>
    %538 = math.tanh %537 : vector<8x32xf32>
    %539 = arith.mulf %534, %538 : vector<8x32xf32>
    %540 = arith.addf %460, %512 : vector<8x128xf32>
    %c480_126 = arith.constant 480 : index
    %c0_127 = arith.constant 0 : index
    %541 = vector.load %arg1[%c480_126, %c0_127] : memref<1088x256xf32, #tpu.memory_space<vmem>>, vector<32x128xf32>
    %cst_128 = arith.constant dense<0.000000e+00> : vector<8x128xf32>
    %542 = tpu.matmul %539, %541, %cst_128 {dimension_numbers = #tpu.dot_dimension_numbers<[1], [0], [0], [1], [0, 0, 1, 1], [], []>} : vector<8x32xf32>, vector<32x128xf32>, vector<8x128xf32> -> vector<8x128xf32>
    %543 = arith.addf %540, %542 : vector<8x128xf32>
    %c2 = arith.constant 2 : index
    %c0_129 = arith.constant 0 : index
    %c0_130 = arith.constant 0 : index
    %544 = vector.load %arg2[%c2, %c0_129, %c0_130] : memref<7x8x128xf32, #tpu.memory_space<vmem>>, vector<1x8x128xf32>
    %545 = vector.shape_cast %544 : vector<1x8x128xf32> to vector<8x128xf32>
    %546 = vector.shape_cast %543 : vector<8x128xf32> to vector<1x8x128xf32>
    tpu.vector_store %arg2[%c2, %c0_129, %c0_130], %546 {strides = array<i32>} : memref<7x8x128xf32, #tpu.memory_space<vmem>>, vector<1x8x128xf32>,
    %cst_131 = arith.constant dense<0xFF800000> : vector<8xf32>
    %547 = vector.multi_reduction <maximumf>, %543, %cst_131 [1] : vector<8x128xf32> to vector<8xf32>
    %548 = vector.shape_cast %547 : vector<8xf32> to vector<8x1xf32>
    %549 = vector.broadcast %548 : vector<8x1xf32> to vector<8x128xf32>
    %550 = arith.cmpf oeq, %543, %549 : vector<8x128xf32>
    %c128_i32_132 = arith.constant 128 : i32
    %551 = vector.broadcast %c128_i32_132 : i32 to vector<8x128xi32>
    %552 = arith.select %550, %252, %551 : vector<8x128xi1>, vector<8x128xi32>
    %cst_133 = arith.constant dense<2147483647> : vector<8xi32>
    %553 = vector.multi_reduction <minsi>, %552, %cst_133 [1] : vector<8x128xi32> to vector<8xi32>
    %554 = vector.shape_cast %553 : vector<8xi32> to vector<8x1xi32>
    %555 = vector.broadcast %554 : vector<8x1xi32> to vector<8x128xi32>
    %556 = arith.cmpi eq, %252, %555 : vector<8x128xi32>
    %557 = arith.extui %556 : vector<8x128xi1> to vector<8x128xi32>
    %558 = arith.sitofp %557 : vector<8x128xi32> to vector<8x128xf32>
    %c128_134 = arith.constant 128 : index
    %c0_135 = arith.constant 0 : index
    %559 = vector.load %arg1[%c128_134, %c0_135] : memref<1088x256xf32, #tpu.memory_space<vmem>>, vector<128x128xf32>
    %cst_136 = arith.constant dense<0.000000e+00> : vector<8x128xf32>
    %560 = tpu.matmul %558, %559, %cst_136 {dimension_numbers = #tpu.dot_dimension_numbers<[1], [0], [0], [1], [0, 0, 1, 1], [], []>} : vector<8x128xf32>, vector<128x128xf32>, vector<8x128xf32> -> vector<8x128xf32>
    %c256_137 = arith.constant 256 : index
    %c0_138 = arith.constant 0 : index
    %561 = vector.load %arg1[%c256_137, %c0_138] : memref<1088x256xf32, #tpu.memory_space<vmem>>, vector<128x128xf32>
    %cst_139 = arith.constant dense<0.000000e+00> : vector<8x128xf32>
    %562 = tpu.matmul %558, %561, %cst_139 {dimension_numbers = #tpu.dot_dimension_numbers<[1], [0], [0], [1], [0, 0, 1, 1], [], []>} : vector<8x128xf32>, vector<128x128xf32>, vector<8x128xf32> -> vector<8x128xf32>
    %c416_140 = arith.constant 416 : index
    %c0_141 = arith.constant 0 : index
    %563 = vector.load %arg1[%c416_140, %c0_141] : memref<1088x256xf32, #tpu.memory_space<vmem>>, vector<32x128xf32>
    %cst_142 = arith.constant dense<0.000000e+00> : vector<8x128xf32>
    %564 = tpu.matmul %539, %563, %cst_142 {dimension_numbers = #tpu.dot_dimension_numbers<[1], [0], [0], [1], [0, 0, 1, 1], [], []>} : vector<8x32xf32>, vector<32x128xf32>, vector<8x128xf32> -> vector<8x128xf32>
    %c544_143 = arith.constant 544 : index
    %c0_144 = arith.constant 0 : index
    %565 = vector.load %arg1[%c544_143, %c0_144] : memref<1088x256xf32, #tpu.memory_space<vmem>>, vector<32x256xf32>
    %cst_145 = arith.constant dense<0.000000e+00> : vector<8x256xf32>
    %566 = tpu.matmul %539, %565, %cst_145 {dimension_numbers = #tpu.dot_dimension_numbers<[1], [0], [0], [1], [0, 0, 1, 1], [], []>} : vector<8x32xf32>, vector<32x256xf32>, vector<8x256xf32> -> vector<8x256xf32>
    %567 = arith.addf %251, %566 : vector<8x256xf32>
    %568 = math.tanh %567 : vector<8x256xf32>
    %c832_146 = arith.constant 832 : index
    %c0_147 = arith.constant 0 : index
    %569 = vector.load %arg1[%c832_146, %c0_147] : memref<1088x256xf32, #tpu.memory_space<vmem>>, vector<256x8xf32>
    %cst_148 = arith.constant dense<0.000000e+00> : vector<8x8xf32>
    %570 = tpu.matmul %568, %569, %cst_148 {dimension_numbers = #tpu.dot_dimension_numbers<[1], [0], [0], [1], [0, 0, 1, 1], [], []>} : vector<8x256xf32>, vector<256x8xf32>, vector<8x8xf32> -> vector<8x8xf32>
    %cst_149 = arith.constant dense<0xFF800000> : vector<8xf32>
    %571 = vector.multi_reduction <maximumf>, %570, %cst_149 [1] : vector<8x8xf32> to vector<8xf32>
    %572 = vector.shape_cast %571 : vector<8xf32> to vector<8x1xf32>
    %573 = vector.broadcast %572 : vector<8x1xf32> to vector<8x8xf32>
    %574 = arith.subf %570, %573 : vector<8x8xf32>
    %575 = math.exp %574 : vector<8x8xf32>
    %cst_150 = arith.constant dense<0.000000e+00> : vector<8xf32>
    %576 = vector.multi_reduction <add>, %575, %cst_150 [1] : vector<8x8xf32> to vector<8xf32>
    %577 = vector.shape_cast %576 : vector<8xf32> to vector<8x1xf32>
    %578 = vector.broadcast %577 : vector<8x1xf32> to vector<8x8xf32>
    %579 = arith.divf %575, %578 : vector<8x8xf32>
    %580 = vector.extract_strided_slice %579 {offsets = [0, 0], sizes = [8, 1], strides = [1, 1]} : vector<8x8xf32> to vector<8x1xf32>
    %581 = vector.broadcast %580 : vector<8x1xf32> to vector<8x32xf32>
    %582 = arith.mulf %581, %45 : vector<8x32xf32>
    %583 = vector.extract_strided_slice %579 {offsets = [0, 1], sizes = [8, 1], strides = [1, 1]} : vector<8x8xf32> to vector<8x1xf32>
    %584 = vector.broadcast %583 : vector<8x1xf32> to vector<8x32xf32>
    %585 = arith.mulf %584, %74 : vector<8x32xf32>
    %586 = arith.addf %582, %585 : vector<8x32xf32>
    %587 = vector.extract_strided_slice %579 {offsets = [0, 2], sizes = [8, 1], strides = [1, 1]} : vector<8x8xf32> to vector<8x1xf32>
    %588 = vector.broadcast %587 : vector<8x1xf32> to vector<8x32xf32>
    %589 = arith.mulf %588, %103 : vector<8x32xf32>
    %590 = arith.addf %586, %589 : vector<8x32xf32>
    %591 = vector.extract_strided_slice %579 {offsets = [0, 3], sizes = [8, 1], strides = [1, 1]} : vector<8x8xf32> to vector<8x1xf32>
    %592 = vector.broadcast %591 : vector<8x1xf32> to vector<8x32xf32>
    %593 = arith.mulf %592, %132 : vector<8x32xf32>
    %594 = arith.addf %590, %593 : vector<8x32xf32>
    %595 = vector.extract_strided_slice %579 {offsets = [0, 4], sizes = [8, 1], strides = [1, 1]} : vector<8x8xf32> to vector<8x1xf32>
    %596 = vector.broadcast %595 : vector<8x1xf32> to vector<8x32xf32>
    %597 = arith.mulf %596, %161 : vector<8x32xf32>
    %598 = arith.addf %594, %597 : vector<8x32xf32>
    %599 = vector.extract_strided_slice %579 {offsets = [0, 5], sizes = [8, 1], strides = [1, 1]} : vector<8x8xf32> to vector<8x1xf32>
    %600 = vector.broadcast %599 : vector<8x1xf32> to vector<8x32xf32>
    %601 = arith.mulf %600, %190 : vector<8x32xf32>
    %602 = arith.addf %598, %601 : vector<8x32xf32>
    %603 = vector.extract_strided_slice %579 {offsets = [0, 6], sizes = [8, 1], strides = [1, 1]} : vector<8x8xf32> to vector<8x1xf32>
    %604 = vector.broadcast %603 : vector<8x1xf32> to vector<8x32xf32>
    %605 = arith.mulf %604, %219 : vector<8x32xf32>
    %606 = arith.addf %602, %605 : vector<8x32xf32>
    %607 = vector.extract_strided_slice %579 {offsets = [0, 7], sizes = [8, 1], strides = [1, 1]} : vector<8x8xf32> to vector<8x1xf32>
    %608 = vector.broadcast %607 : vector<8x1xf32> to vector<8x32xf32>
    %609 = arith.mulf %608, %248 : vector<8x32xf32>
    %610 = arith.addf %606, %609 : vector<8x32xf32>
    %c448_151 = arith.constant 448 : index
    %c0_152 = arith.constant 0 : index
    %611 = vector.load %arg1[%c448_151, %c0_152] : memref<1088x256xf32, #tpu.memory_space<vmem>>, vector<32x128xf32>
    %cst_153 = arith.constant dense<0.000000e+00> : vector<8x128xf32>
    %612 = tpu.matmul %610, %611, %cst_153 {dimension_numbers = #tpu.dot_dimension_numbers<[1], [0], [0], [1], [0, 0, 1, 1], [], []>} : vector<8x32xf32>, vector<32x128xf32>, vector<8x128xf32> -> vector<8x128xf32>
    %c512_154 = arith.constant 512 : index
    %c0_155 = arith.constant 0 : index
    %613 = vector.load %arg1[%c512_154, %c0_155] : memref<1088x256xf32, #tpu.memory_space<vmem>>, vector<32x128xf32>
    %cst_156 = arith.constant dense<0.000000e+00> : vector<8x128xf32>
    %614 = tpu.matmul %610, %613, %cst_156 {dimension_numbers = #tpu.dot_dimension_numbers<[1], [0], [0], [1], [0, 0, 1, 1], [], []>} : vector<8x32xf32>, vector<32x128xf32>, vector<8x128xf32> -> vector<8x128xf32>
    %615 = arith.addf %560, %564 : vector<8x128xf32>
    %616 = arith.addf %615, %612 : vector<8x128xf32>
    %617 = vector.extract_strided_slice %616 {offsets = [0, 0], sizes = [8, 32], strides = [1, 1]} : vector<8x128xf32> to vector<8x32xf32>
    %618 = arith.negf %617 : vector<8x32xf32>
    %619 = math.exp %618 : vector<8x32xf32>
    %cst_157 = arith.constant 1.000000e+00 : f32
    %620 = vector.broadcast %cst_157 : f32 to vector<8x32xf32>
    %621 = arith.addf %620, %619 : vector<8x32xf32>
    %622 = arith.divf %620, %621 : vector<8x32xf32>
    %623 = vector.extract_strided_slice %616 {offsets = [0, 32], sizes = [8, 32], strides = [1, 1]} : vector<8x128xf32> to vector<8x32xf32>
    %624 = arith.negf %623 : vector<8x32xf32>
    %625 = math.exp %624 : vector<8x32xf32>
    %cst_158 = arith.constant 1.000000e+00 : f32
    %626 = vector.broadcast %cst_158 : f32 to vector<8x32xf32>
    %627 = arith.addf %626, %625 : vector<8x32xf32>
    %628 = arith.divf %626, %627 : vector<8x32xf32>
    %629 = vector.extract_strided_slice %616 {offsets = [0, 64], sizes = [8, 32], strides = [1, 1]} : vector<8x128xf32> to vector<8x32xf32>
    %630 = math.tanh %629 : vector<8x32xf32>
    %631 = vector.extract_strided_slice %616 {offsets = [0, 96], sizes = [8, 32], strides = [1, 1]} : vector<8x128xf32> to vector<8x32xf32>
    %632 = arith.negf %631 : vector<8x32xf32>
    %633 = math.exp %632 : vector<8x32xf32>
    %cst_159 = arith.constant 1.000000e+00 : f32
    %634 = vector.broadcast %cst_159 : f32 to vector<8x32xf32>
    %635 = arith.addf %634, %633 : vector<8x32xf32>
    %636 = arith.divf %634, %635 : vector<8x32xf32>
    %637 = arith.mulf %628, %537 : vector<8x32xf32>
    %638 = arith.mulf %622, %630 : vector<8x32xf32>
    %639 = arith.addf %637, %638 : vector<8x32xf32>
    %640 = math.tanh %639 : vector<8x32xf32>
    %641 = arith.mulf %636, %640 : vector<8x32xf32>
    %642 = arith.addf %562, %614 : vector<8x128xf32>
    %c480_160 = arith.constant 480 : index
    %c0_161 = arith.constant 0 : index
    %643 = vector.load %arg1[%c480_160, %c0_161] : memref<1088x256xf32, #tpu.memory_space<vmem>>, vector<32x128xf32>
    %cst_162 = arith.constant dense<0.000000e+00> : vector<8x128xf32>
    %644 = tpu.matmul %641, %643, %cst_162 {dimension_numbers = #tpu.dot_dimension_numbers<[1], [0], [0], [1], [0, 0, 1, 1], [], []>} : vector<8x32xf32>, vector<32x128xf32>, vector<8x128xf32> -> vector<8x128xf32>
    %645 = arith.addf %642, %644 : vector<8x128xf32>
    %c3 = arith.constant 3 : index
    %c0_163 = arith.constant 0 : index
    %c0_164 = arith.constant 0 : index
    %646 = vector.load %arg2[%c3, %c0_163, %c0_164] : memref<7x8x128xf32, #tpu.memory_space<vmem>>, vector<1x8x128xf32>
    %647 = vector.shape_cast %646 : vector<1x8x128xf32> to vector<8x128xf32>
    %648 = vector.shape_cast %645 : vector<8x128xf32> to vector<1x8x128xf32>
    tpu.vector_store %arg2[%c3, %c0_163, %c0_164], %648 {strides = array<i32>} : memref<7x8x128xf32, #tpu.memory_space<vmem>>, vector<1x8x128xf32>,
    %cst_165 = arith.constant dense<0xFF800000> : vector<8xf32>
    %649 = vector.multi_reduction <maximumf>, %645, %cst_165 [1] : vector<8x128xf32> to vector<8xf32>
    %650 = vector.shape_cast %649 : vector<8xf32> to vector<8x1xf32>
    %651 = vector.broadcast %650 : vector<8x1xf32> to vector<8x128xf32>
    %652 = arith.cmpf oeq, %645, %651 : vector<8x128xf32>
    %c128_i32_166 = arith.constant 128 : i32
    %653 = vector.broadcast %c128_i32_166 : i32 to vector<8x128xi32>
    %654 = arith.select %652, %252, %653 : vector<8x128xi1>, vector<8x128xi32>
    %cst_167 = arith.constant dense<2147483647> : vector<8xi32>
    %655 = vector.multi_reduction <minsi>, %654, %cst_167 [1] : vector<8x128xi32> to vector<8xi32>
    %656 = vector.shape_cast %655 : vector<8xi32> to vector<8x1xi32>
    %657 = vector.broadcast %656 : vector<8x1xi32> to vector<8x128xi32>
    %658 = arith.cmpi eq, %252, %657 : vector<8x128xi32>
    %659 = arith.extui %658 : vector<8x128xi1> to vector<8x128xi32>
    %660 = arith.sitofp %659 : vector<8x128xi32> to vector<8x128xf32>
    %c128_168 = arith.constant 128 : index
    %c0_169 = arith.constant 0 : index
    %661 = vector.load %arg1[%c128_168, %c0_169] : memref<1088x256xf32, #tpu.memory_space<vmem>>, vector<128x128xf32>
    %cst_170 = arith.constant dense<0.000000e+00> : vector<8x128xf32>
    %662 = tpu.matmul %660, %661, %cst_170 {dimension_numbers = #tpu.dot_dimension_numbers<[1], [0], [0], [1], [0, 0, 1, 1], [], []>} : vector<8x128xf32>, vector<128x128xf32>, vector<8x128xf32> -> vector<8x128xf32>
    %c256_171 = arith.constant 256 : index
    %c0_172 = arith.constant 0 : index
    %663 = vector.load %arg1[%c256_171, %c0_172] : memref<1088x256xf32, #tpu.memory_space<vmem>>, vector<128x128xf32>
    %cst_173 = arith.constant dense<0.000000e+00> : vector<8x128xf32>
    %664 = tpu.matmul %660, %663, %cst_173 {dimension_numbers = #tpu.dot_dimension_numbers<[1], [0], [0], [1], [0, 0, 1, 1], [], []>} : vector<8x128xf32>, vector<128x128xf32>, vector<8x128xf32> -> vector<8x128xf32>
    %c416_174 = arith.constant 416 : index
    %c0_175 = arith.constant 0 : index
    %665 = vector.load %arg1[%c416_174, %c0_175] : memref<1088x256xf32, #tpu.memory_space<vmem>>, vector<32x128xf32>
    %cst_176 = arith.constant dense<0.000000e+00> : vector<8x128xf32>
    %666 = tpu.matmul %641, %665, %cst_176 {dimension_numbers = #tpu.dot_dimension_numbers<[1], [0], [0], [1], [0, 0, 1, 1], [], []>} : vector<8x32xf32>, vector<32x128xf32>, vector<8x128xf32> -> vector<8x128xf32>
    %c544_177 = arith.constant 544 : index
    %c0_178 = arith.constant 0 : index
    %667 = vector.load %arg1[%c544_177, %c0_178] : memref<1088x256xf32, #tpu.memory_space<vmem>>, vector<32x256xf32>
    %cst_179 = arith.constant dense<0.000000e+00> : vector<8x256xf32>
    %668 = tpu.matmul %641, %667, %cst_179 {dimension_numbers = #tpu.dot_dimension_numbers<[1], [0], [0], [1], [0, 0, 1, 1], [], []>} : vector<8x32xf32>, vector<32x256xf32>, vector<8x256xf32> -> vector<8x256xf32>
    %669 = arith.addf %251, %668 : vector<8x256xf32>
    %670 = math.tanh %669 : vector<8x256xf32>
    %c832_180 = arith.constant 832 : index
    %c0_181 = arith.constant 0 : index
    %671 = vector.load %arg1[%c832_180, %c0_181] : memref<1088x256xf32, #tpu.memory_space<vmem>>, vector<256x8xf32>
    %cst_182 = arith.constant dense<0.000000e+00> : vector<8x8xf32>
    %672 = tpu.matmul %670, %671, %cst_182 {dimension_numbers = #tpu.dot_dimension_numbers<[1], [0], [0], [1], [0, 0, 1, 1], [], []>} : vector<8x256xf32>, vector<256x8xf32>, vector<8x8xf32> -> vector<8x8xf32>
    %cst_183 = arith.constant dense<0xFF800000> : vector<8xf32>
    %673 = vector.multi_reduction <maximumf>, %672, %cst_183 [1] : vector<8x8xf32> to vector<8xf32>
    %674 = vector.shape_cast %673 : vector<8xf32> to vector<8x1xf32>
    %675 = vector.broadcast %674 : vector<8x1xf32> to vector<8x8xf32>
    %676 = arith.subf %672, %675 : vector<8x8xf32>
    %677 = math.exp %676 : vector<8x8xf32>
    %cst_184 = arith.constant dense<0.000000e+00> : vector<8xf32>
    %678 = vector.multi_reduction <add>, %677, %cst_184 [1] : vector<8x8xf32> to vector<8xf32>
    %679 = vector.shape_cast %678 : vector<8xf32> to vector<8x1xf32>
    %680 = vector.broadcast %679 : vector<8x1xf32> to vector<8x8xf32>
    %681 = arith.divf %677, %680 : vector<8x8xf32>
    %682 = vector.extract_strided_slice %681 {offsets = [0, 0], sizes = [8, 1], strides = [1, 1]} : vector<8x8xf32> to vector<8x1xf32>
    %683 = vector.broadcast %682 : vector<8x1xf32> to vector<8x32xf32>
    %684 = arith.mulf %683, %45 : vector<8x32xf32>
    %685 = vector.extract_strided_slice %681 {offsets = [0, 1], sizes = [8, 1], strides = [1, 1]} : vector<8x8xf32> to vector<8x1xf32>
    %686 = vector.broadcast %685 : vector<8x1xf32> to vector<8x32xf32>
    %687 = arith.mulf %686, %74 : vector<8x32xf32>
    %688 = arith.addf %684, %687 : vector<8x32xf32>
    %689 = vector.extract_strided_slice %681 {offsets = [0, 2], sizes = [8, 1], strides = [1, 1]} : vector<8x8xf32> to vector<8x1xf32>
    %690 = vector.broadcast %689 : vector<8x1xf32> to vector<8x32xf32>
    %691 = arith.mulf %690, %103 : vector<8x32xf32>
    %692 = arith.addf %688, %691 : vector<8x32xf32>
    %693 = vector.extract_strided_slice %681 {offsets = [0, 3], sizes = [8, 1], strides = [1, 1]} : vector<8x8xf32> to vector<8x1xf32>
    %694 = vector.broadcast %693 : vector<8x1xf32> to vector<8x32xf32>
    %695 = arith.mulf %694, %132 : vector<8x32xf32>
    %696 = arith.addf %692, %695 : vector<8x32xf32>
    %697 = vector.extract_strided_slice %681 {offsets = [0, 4], sizes = [8, 1], strides = [1, 1]} : vector<8x8xf32> to vector<8x1xf32>
    %698 = vector.broadcast %697 : vector<8x1xf32> to vector<8x32xf32>
    %699 = arith.mulf %698, %161 : vector<8x32xf32>
    %700 = arith.addf %696, %699 : vector<8x32xf32>
    %701 = vector.extract_strided_slice %681 {offsets = [0, 5], sizes = [8, 1], strides = [1, 1]} : vector<8x8xf32> to vector<8x1xf32>
    %702 = vector.broadcast %701 : vector<8x1xf32> to vector<8x32xf32>
    %703 = arith.mulf %702, %190 : vector<8x32xf32>
    %704 = arith.addf %700, %703 : vector<8x32xf32>
    %705 = vector.extract_strided_slice %681 {offsets = [0, 6], sizes = [8, 1], strides = [1, 1]} : vector<8x8xf32> to vector<8x1xf32>
    %706 = vector.broadcast %705 : vector<8x1xf32> to vector<8x32xf32>
    %707 = arith.mulf %706, %219 : vector<8x32xf32>
    %708 = arith.addf %704, %707 : vector<8x32xf32>
    %709 = vector.extract_strided_slice %681 {offsets = [0, 7], sizes = [8, 1], strides = [1, 1]} : vector<8x8xf32> to vector<8x1xf32>
    %710 = vector.broadcast %709 : vector<8x1xf32> to vector<8x32xf32>
    %711 = arith.mulf %710, %248 : vector<8x32xf32>
    %712 = arith.addf %708, %711 : vector<8x32xf32>
    %c448_185 = arith.constant 448 : index
    %c0_186 = arith.constant 0 : index
    %713 = vector.load %arg1[%c448_185, %c0_186] : memref<1088x256xf32, #tpu.memory_space<vmem>>, vector<32x128xf32>
    %cst_187 = arith.constant dense<0.000000e+00> : vector<8x128xf32>
    %714 = tpu.matmul %712, %713, %cst_187 {dimension_numbers = #tpu.dot_dimension_numbers<[1], [0], [0], [1], [0, 0, 1, 1], [], []>} : vector<8x32xf32>, vector<32x128xf32>, vector<8x128xf32> -> vector<8x128xf32>
    %c512_188 = arith.constant 512 : index
    %c0_189 = arith.constant 0 : index
    %715 = vector.load %arg1[%c512_188, %c0_189] : memref<1088x256xf32, #tpu.memory_space<vmem>>, vector<32x128xf32>
    %cst_190 = arith.constant dense<0.000000e+00> : vector<8x128xf32>
    %716 = tpu.matmul %712, %715, %cst_190 {dimension_numbers = #tpu.dot_dimension_numbers<[1], [0], [0], [1], [0, 0, 1, 1], [], []>} : vector<8x32xf32>, vector<32x128xf32>, vector<8x128xf32> -> vector<8x128xf32>
    %717 = arith.addf %662, %666 : vector<8x128xf32>
    %718 = arith.addf %717, %714 : vector<8x128xf32>
    %719 = vector.extract_strided_slice %718 {offsets = [0, 0], sizes = [8, 32], strides = [1, 1]} : vector<8x128xf32> to vector<8x32xf32>
    %720 = arith.negf %719 : vector<8x32xf32>
    %721 = math.exp %720 : vector<8x32xf32>
    %cst_191 = arith.constant 1.000000e+00 : f32
    %722 = vector.broadcast %cst_191 : f32 to vector<8x32xf32>
    %723 = arith.addf %722, %721 : vector<8x32xf32>
    %724 = arith.divf %722, %723 : vector<8x32xf32>
    %725 = vector.extract_strided_slice %718 {offsets = [0, 32], sizes = [8, 32], strides = [1, 1]} : vector<8x128xf32> to vector<8x32xf32>
    %726 = arith.negf %725 : vector<8x32xf32>
    %727 = math.exp %726 : vector<8x32xf32>
    %cst_192 = arith.constant 1.000000e+00 : f32
    %728 = vector.broadcast %cst_192 : f32 to vector<8x32xf32>
    %729 = arith.addf %728, %727 : vector<8x32xf32>
    %730 = arith.divf %728, %729 : vector<8x32xf32>
    %731 = vector.extract_strided_slice %718 {offsets = [0, 64], sizes = [8, 32], strides = [1, 1]} : vector<8x128xf32> to vector<8x32xf32>
    %732 = math.tanh %731 : vector<8x32xf32>
    %733 = vector.extract_strided_slice %718 {offsets = [0, 96], sizes = [8, 32], strides = [1, 1]} : vector<8x128xf32> to vector<8x32xf32>
    %734 = arith.negf %733 : vector<8x32xf32>
    %735 = math.exp %734 : vector<8x32xf32>
    %cst_193 = arith.constant 1.000000e+00 : f32
    %736 = vector.broadcast %cst_193 : f32 to vector<8x32xf32>
    %737 = arith.addf %736, %735 : vector<8x32xf32>
    %738 = arith.divf %736, %737 : vector<8x32xf32>
    %739 = arith.mulf %730, %639 : vector<8x32xf32>
    %740 = arith.mulf %724, %732 : vector<8x32xf32>
    %741 = arith.addf %739, %740 : vector<8x32xf32>
    %742 = math.tanh %741 : vector<8x32xf32>
    %743 = arith.mulf %738, %742 : vector<8x32xf32>
    %744 = arith.addf %664, %716 : vector<8x128xf32>
    %c480_194 = arith.constant 480 : index
    %c0_195 = arith.constant 0 : index
    %745 = vector.load %arg1[%c480_194, %c0_195] : memref<1088x256xf32, #tpu.memory_space<vmem>>, vector<32x128xf32>
    %cst_196 = arith.constant dense<0.000000e+00> : vector<8x128xf32>
    %746 = tpu.matmul %743, %745, %cst_196 {dimension_numbers = #tpu.dot_dimension_numbers<[1], [0], [0], [1], [0, 0, 1, 1], [], []>} : vector<8x32xf32>, vector<32x128xf32>, vector<8x128xf32> -> vector<8x128xf32>
    %747 = arith.addf %744, %746 : vector<8x128xf32>
    %c4 = arith.constant 4 : index
    %c0_197 = arith.constant 0 : index
    %c0_198 = arith.constant 0 : index
    %748 = vector.load %arg2[%c4, %c0_197, %c0_198] : memref<7x8x128xf32, #tpu.memory_space<vmem>>, vector<1x8x128xf32>
    %749 = vector.shape_cast %748 : vector<1x8x128xf32> to vector<8x128xf32>
    %750 = vector.shape_cast %747 : vector<8x128xf32> to vector<1x8x128xf32>
    tpu.vector_store %arg2[%c4, %c0_197, %c0_198], %750 {strides = array<i32>} : memref<7x8x128xf32, #tpu.memory_space<vmem>>, vector<1x8x128xf32>,
    %cst_199 = arith.constant dense<0xFF800000> : vector<8xf32>
    %751 = vector.multi_reduction <maximumf>, %747, %cst_199 [1] : vector<8x128xf32> to vector<8xf32>
    %752 = vector.shape_cast %751 : vector<8xf32> to vector<8x1xf32>
    %753 = vector.broadcast %752 : vector<8x1xf32> to vector<8x128xf32>
    %754 = arith.cmpf oeq, %747, %753 : vector<8x128xf32>
    %c128_i32_200 = arith.constant 128 : i32
    %755 = vector.broadcast %c128_i32_200 : i32 to vector<8x128xi32>
    %756 = arith.select %754, %252, %755 : vector<8x128xi1>, vector<8x128xi32>
    %cst_201 = arith.constant dense<2147483647> : vector<8xi32>
    %757 = vector.multi_reduction <minsi>, %756, %cst_201 [1] : vector<8x128xi32> to vector<8xi32>
    %758 = vector.shape_cast %757 : vector<8xi32> to vector<8x1xi32>
    %759 = vector.broadcast %758 : vector<8x1xi32> to vector<8x128xi32>
    %760 = arith.cmpi eq, %252, %759 : vector<8x128xi32>
    %761 = arith.extui %760 : vector<8x128xi1> to vector<8x128xi32>
    %762 = arith.sitofp %761 : vector<8x128xi32> to vector<8x128xf32>
    %c128_202 = arith.constant 128 : index
    %c0_203 = arith.constant 0 : index
    %763 = vector.load %arg1[%c128_202, %c0_203] : memref<1088x256xf32, #tpu.memory_space<vmem>>, vector<128x128xf32>
    %cst_204 = arith.constant dense<0.000000e+00> : vector<8x128xf32>
    %764 = tpu.matmul %762, %763, %cst_204 {dimension_numbers = #tpu.dot_dimension_numbers<[1], [0], [0], [1], [0, 0, 1, 1], [], []>} : vector<8x128xf32>, vector<128x128xf32>, vector<8x128xf32> -> vector<8x128xf32>
    %c256_205 = arith.constant 256 : index
    %c0_206 = arith.constant 0 : index
    %765 = vector.load %arg1[%c256_205, %c0_206] : memref<1088x256xf32, #tpu.memory_space<vmem>>, vector<128x128xf32>
    %cst_207 = arith.constant dense<0.000000e+00> : vector<8x128xf32>
    %766 = tpu.matmul %762, %765, %cst_207 {dimension_numbers = #tpu.dot_dimension_numbers<[1], [0], [0], [1], [0, 0, 1, 1], [], []>} : vector<8x128xf32>, vector<128x128xf32>, vector<8x128xf32> -> vector<8x128xf32>
    %c416_208 = arith.constant 416 : index
    %c0_209 = arith.constant 0 : index
    %767 = vector.load %arg1[%c416_208, %c0_209] : memref<1088x256xf32, #tpu.memory_space<vmem>>, vector<32x128xf32>
    %cst_210 = arith.constant dense<0.000000e+00> : vector<8x128xf32>
    %768 = tpu.matmul %743, %767, %cst_210 {dimension_numbers = #tpu.dot_dimension_numbers<[1], [0], [0], [1], [0, 0, 1, 1], [], []>} : vector<8x32xf32>, vector<32x128xf32>, vector<8x128xf32> -> vector<8x128xf32>
    %c544_211 = arith.constant 544 : index
    %c0_212 = arith.constant 0 : index
    %769 = vector.load %arg1[%c544_211, %c0_212] : memref<1088x256xf32, #tpu.memory_space<vmem>>, vector<32x256xf32>
    %cst_213 = arith.constant dense<0.000000e+00> : vector<8x256xf32>
    %770 = tpu.matmul %743, %769, %cst_213 {dimension_numbers = #tpu.dot_dimension_numbers<[1], [0], [0], [1], [0, 0, 1, 1], [], []>} : vector<8x32xf32>, vector<32x256xf32>, vector<8x256xf32> -> vector<8x256xf32>
    %771 = arith.addf %251, %770 : vector<8x256xf32>
    %772 = math.tanh %771 : vector<8x256xf32>
    %c832_214 = arith.constant 832 : index
    %c0_215 = arith.constant 0 : index
    %773 = vector.load %arg1[%c832_214, %c0_215] : memref<1088x256xf32, #tpu.memory_space<vmem>>, vector<256x8xf32>
    %cst_216 = arith.constant dense<0.000000e+00> : vector<8x8xf32>
    %774 = tpu.matmul %772, %773, %cst_216 {dimension_numbers = #tpu.dot_dimension_numbers<[1], [0], [0], [1], [0, 0, 1, 1], [], []>} : vector<8x256xf32>, vector<256x8xf32>, vector<8x8xf32> -> vector<8x8xf32>
    %cst_217 = arith.constant dense<0xFF800000> : vector<8xf32>
    %775 = vector.multi_reduction <maximumf>, %774, %cst_217 [1] : vector<8x8xf32> to vector<8xf32>
    %776 = vector.shape_cast %775 : vector<8xf32> to vector<8x1xf32>
    %777 = vector.broadcast %776 : vector<8x1xf32> to vector<8x8xf32>
    %778 = arith.subf %774, %777 : vector<8x8xf32>
    %779 = math.exp %778 : vector<8x8xf32>
    %cst_218 = arith.constant dense<0.000000e+00> : vector<8xf32>
    %780 = vector.multi_reduction <add>, %779, %cst_218 [1] : vector<8x8xf32> to vector<8xf32>
    %781 = vector.shape_cast %780 : vector<8xf32> to vector<8x1xf32>
    %782 = vector.broadcast %781 : vector<8x1xf32> to vector<8x8xf32>
    %783 = arith.divf %779, %782 : vector<8x8xf32>
    %784 = vector.extract_strided_slice %783 {offsets = [0, 0], sizes = [8, 1], strides = [1, 1]} : vector<8x8xf32> to vector<8x1xf32>
    %785 = vector.broadcast %784 : vector<8x1xf32> to vector<8x32xf32>
    %786 = arith.mulf %785, %45 : vector<8x32xf32>
    %787 = vector.extract_strided_slice %783 {offsets = [0, 1], sizes = [8, 1], strides = [1, 1]} : vector<8x8xf32> to vector<8x1xf32>
    %788 = vector.broadcast %787 : vector<8x1xf32> to vector<8x32xf32>
    %789 = arith.mulf %788, %74 : vector<8x32xf32>
    %790 = arith.addf %786, %789 : vector<8x32xf32>
    %791 = vector.extract_strided_slice %783 {offsets = [0, 2], sizes = [8, 1], strides = [1, 1]} : vector<8x8xf32> to vector<8x1xf32>
    %792 = vector.broadcast %791 : vector<8x1xf32> to vector<8x32xf32>
    %793 = arith.mulf %792, %103 : vector<8x32xf32>
    %794 = arith.addf %790, %793 : vector<8x32xf32>
    %795 = vector.extract_strided_slice %783 {offsets = [0, 3], sizes = [8, 1], strides = [1, 1]} : vector<8x8xf32> to vector<8x1xf32>
    %796 = vector.broadcast %795 : vector<8x1xf32> to vector<8x32xf32>
    %797 = arith.mulf %796, %132 : vector<8x32xf32>
    %798 = arith.addf %794, %797 : vector<8x32xf32>
    %799 = vector.extract_strided_slice %783 {offsets = [0, 4], sizes = [8, 1], strides = [1, 1]} : vector<8x8xf32> to vector<8x1xf32>
    %800 = vector.broadcast %799 : vector<8x1xf32> to vector<8x32xf32>
    %801 = arith.mulf %800, %161 : vector<8x32xf32>
    %802 = arith.addf %798, %801 : vector<8x32xf32>
    %803 = vector.extract_strided_slice %783 {offsets = [0, 5], sizes = [8, 1], strides = [1, 1]} : vector<8x8xf32> to vector<8x1xf32>
    %804 = vector.broadcast %803 : vector<8x1xf32> to vector<8x32xf32>
    %805 = arith.mulf %804, %190 : vector<8x32xf32>
    %806 = arith.addf %802, %805 : vector<8x32xf32>
    %807 = vector.extract_strided_slice %783 {offsets = [0, 6], sizes = [8, 1], strides = [1, 1]} : vector<8x8xf32> to vector<8x1xf32>
    %808 = vector.broadcast %807 : vector<8x1xf32> to vector<8x32xf32>
    %809 = arith.mulf %808, %219 : vector<8x32xf32>
    %810 = arith.addf %806, %809 : vector<8x32xf32>
    %811 = vector.extract_strided_slice %783 {offsets = [0, 7], sizes = [8, 1], strides = [1, 1]} : vector<8x8xf32> to vector<8x1xf32>
    %812 = vector.broadcast %811 : vector<8x1xf32> to vector<8x32xf32>
    %813 = arith.mulf %812, %248 : vector<8x32xf32>
    %814 = arith.addf %810, %813 : vector<8x32xf32>
    %c448_219 = arith.constant 448 : index
    %c0_220 = arith.constant 0 : index
    %815 = vector.load %arg1[%c448_219, %c0_220] : memref<1088x256xf32, #tpu.memory_space<vmem>>, vector<32x128xf32>
    %cst_221 = arith.constant dense<0.000000e+00> : vector<8x128xf32>
    %816 = tpu.matmul %814, %815, %cst_221 {dimension_numbers = #tpu.dot_dimension_numbers<[1], [0], [0], [1], [0, 0, 1, 1], [], []>} : vector<8x32xf32>, vector<32x128xf32>, vector<8x128xf32> -> vector<8x128xf32>
    %c512_222 = arith.constant 512 : index
    %c0_223 = arith.constant 0 : index
    %817 = vector.load %arg1[%c512_222, %c0_223] : memref<1088x256xf32, #tpu.memory_space<vmem>>, vector<32x128xf32>
    %cst_224 = arith.constant dense<0.000000e+00> : vector<8x128xf32>
    %818 = tpu.matmul %814, %817, %cst_224 {dimension_numbers = #tpu.dot_dimension_numbers<[1], [0], [0], [1], [0, 0, 1, 1], [], []>} : vector<8x32xf32>, vector<32x128xf32>, vector<8x128xf32> -> vector<8x128xf32>
    %819 = arith.addf %764, %768 : vector<8x128xf32>
    %820 = arith.addf %819, %816 : vector<8x128xf32>
    %821 = vector.extract_strided_slice %820 {offsets = [0, 0], sizes = [8, 32], strides = [1, 1]} : vector<8x128xf32> to vector<8x32xf32>
    %822 = arith.negf %821 : vector<8x32xf32>
    %823 = math.exp %822 : vector<8x32xf32>
    %cst_225 = arith.constant 1.000000e+00 : f32
    %824 = vector.broadcast %cst_225 : f32 to vector<8x32xf32>
    %825 = arith.addf %824, %823 : vector<8x32xf32>
    %826 = arith.divf %824, %825 : vector<8x32xf32>
    %827 = vector.extract_strided_slice %820 {offsets = [0, 32], sizes = [8, 32], strides = [1, 1]} : vector<8x128xf32> to vector<8x32xf32>
    %828 = arith.negf %827 : vector<8x32xf32>
    %829 = math.exp %828 : vector<8x32xf32>
    %cst_226 = arith.constant 1.000000e+00 : f32
    %830 = vector.broadcast %cst_226 : f32 to vector<8x32xf32>
    %831 = arith.addf %830, %829 : vector<8x32xf32>
    %832 = arith.divf %830, %831 : vector<8x32xf32>
    %833 = vector.extract_strided_slice %820 {offsets = [0, 64], sizes = [8, 32], strides = [1, 1]} : vector<8x128xf32> to vector<8x32xf32>
    %834 = math.tanh %833 : vector<8x32xf32>
    %835 = vector.extract_strided_slice %820 {offsets = [0, 96], sizes = [8, 32], strides = [1, 1]} : vector<8x128xf32> to vector<8x32xf32>
    %836 = arith.negf %835 : vector<8x32xf32>
    %837 = math.exp %836 : vector<8x32xf32>
    %cst_227 = arith.constant 1.000000e+00 : f32
    %838 = vector.broadcast %cst_227 : f32 to vector<8x32xf32>
    %839 = arith.addf %838, %837 : vector<8x32xf32>
    %840 = arith.divf %838, %839 : vector<8x32xf32>
    %841 = arith.mulf %832, %741 : vector<8x32xf32>
    %842 = arith.mulf %826, %834 : vector<8x32xf32>
    %843 = arith.addf %841, %842 : vector<8x32xf32>
    %844 = math.tanh %843 : vector<8x32xf32>
    %845 = arith.mulf %840, %844 : vector<8x32xf32>
    %846 = arith.addf %766, %818 : vector<8x128xf32>
    %c480_228 = arith.constant 480 : index
    %c0_229 = arith.constant 0 : index
    %847 = vector.load %arg1[%c480_228, %c0_229] : memref<1088x256xf32, #tpu.memory_space<vmem>>, vector<32x128xf32>
    %cst_230 = arith.constant dense<0.000000e+00> : vector<8x128xf32>
    %848 = tpu.matmul %845, %847, %cst_230 {dimension_numbers = #tpu.dot_dimension_numbers<[1], [0], [0], [1], [0, 0, 1, 1], [], []>} : vector<8x32xf32>, vector<32x128xf32>, vector<8x128xf32> -> vector<8x128xf32>
    %849 = arith.addf %846, %848 : vector<8x128xf32>
    %c5 = arith.constant 5 : index
    %c0_231 = arith.constant 0 : index
    %c0_232 = arith.constant 0 : index
    %850 = vector.load %arg2[%c5, %c0_231, %c0_232] : memref<7x8x128xf32, #tpu.memory_space<vmem>>, vector<1x8x128xf32>
    %851 = vector.shape_cast %850 : vector<1x8x128xf32> to vector<8x128xf32>
    %852 = vector.shape_cast %849 : vector<8x128xf32> to vector<1x8x128xf32>
    tpu.vector_store %arg2[%c5, %c0_231, %c0_232], %852 {strides = array<i32>} : memref<7x8x128xf32, #tpu.memory_space<vmem>>, vector<1x8x128xf32>,
    %cst_233 = arith.constant dense<0xFF800000> : vector<8xf32>
    %853 = vector.multi_reduction <maximumf>, %849, %cst_233 [1] : vector<8x128xf32> to vector<8xf32>
    %854 = vector.shape_cast %853 : vector<8xf32> to vector<8x1xf32>
    %855 = vector.broadcast %854 : vector<8x1xf32> to vector<8x128xf32>
    %856 = arith.cmpf oeq, %849, %855 : vector<8x128xf32>
    %c128_i32_234 = arith.constant 128 : i32
    %857 = vector.broadcast %c128_i32_234 : i32 to vector<8x128xi32>
    %858 = arith.select %856, %252, %857 : vector<8x128xi1>, vector<8x128xi32>
    %cst_235 = arith.constant dense<2147483647> : vector<8xi32>
    %859 = vector.multi_reduction <minsi>, %858, %cst_235 [1] : vector<8x128xi32> to vector<8xi32>
    %860 = vector.shape_cast %859 : vector<8xi32> to vector<8x1xi32>
    %861 = vector.broadcast %860 : vector<8x1xi32> to vector<8x128xi32>
    %862 = arith.cmpi eq, %252, %861 : vector<8x128xi32>
    %863 = arith.extui %862 : vector<8x128xi1> to vector<8x128xi32>
    %864 = arith.sitofp %863 : vector<8x128xi32> to vector<8x128xf32>
    %c128_236 = arith.constant 128 : index
    %c0_237 = arith.constant 0 : index
    %865 = vector.load %arg1[%c128_236, %c0_237] : memref<1088x256xf32, #tpu.memory_space<vmem>>, vector<128x128xf32>
    %cst_238 = arith.constant dense<0.000000e+00> : vector<8x128xf32>
    %866 = tpu.matmul %864, %865, %cst_238 {dimension_numbers = #tpu.dot_dimension_numbers<[1], [0], [0], [1], [0, 0, 1, 1], [], []>} : vector<8x128xf32>, vector<128x128xf32>, vector<8x128xf32> -> vector<8x128xf32>
    %c256_239 = arith.constant 256 : index
    %c0_240 = arith.constant 0 : index
    %867 = vector.load %arg1[%c256_239, %c0_240] : memref<1088x256xf32, #tpu.memory_space<vmem>>, vector<128x128xf32>
    %cst_241 = arith.constant dense<0.000000e+00> : vector<8x128xf32>
    %868 = tpu.matmul %864, %867, %cst_241 {dimension_numbers = #tpu.dot_dimension_numbers<[1], [0], [0], [1], [0, 0, 1, 1], [], []>} : vector<8x128xf32>, vector<128x128xf32>, vector<8x128xf32> -> vector<8x128xf32>
    %c416_242 = arith.constant 416 : index
    %c0_243 = arith.constant 0 : index
    %869 = vector.load %arg1[%c416_242, %c0_243] : memref<1088x256xf32, #tpu.memory_space<vmem>>, vector<32x128xf32>
    %cst_244 = arith.constant dense<0.000000e+00> : vector<8x128xf32>
    %870 = tpu.matmul %845, %869, %cst_244 {dimension_numbers = #tpu.dot_dimension_numbers<[1], [0], [0], [1], [0, 0, 1, 1], [], []>} : vector<8x32xf32>, vector<32x128xf32>, vector<8x128xf32> -> vector<8x128xf32>
    %c544_245 = arith.constant 544 : index
    %c0_246 = arith.constant 0 : index
    %871 = vector.load %arg1[%c544_245, %c0_246] : memref<1088x256xf32, #tpu.memory_space<vmem>>, vector<32x256xf32>
    %cst_247 = arith.constant dense<0.000000e+00> : vector<8x256xf32>
    %872 = tpu.matmul %845, %871, %cst_247 {dimension_numbers = #tpu.dot_dimension_numbers<[1], [0], [0], [1], [0, 0, 1, 1], [], []>} : vector<8x32xf32>, vector<32x256xf32>, vector<8x256xf32> -> vector<8x256xf32>
    %873 = arith.addf %251, %872 : vector<8x256xf32>
    %874 = math.tanh %873 : vector<8x256xf32>
    %c832_248 = arith.constant 832 : index
    %c0_249 = arith.constant 0 : index
    %875 = vector.load %arg1[%c832_248, %c0_249] : memref<1088x256xf32, #tpu.memory_space<vmem>>, vector<256x8xf32>
    %cst_250 = arith.constant dense<0.000000e+00> : vector<8x8xf32>
    %876 = tpu.matmul %874, %875, %cst_250 {dimension_numbers = #tpu.dot_dimension_numbers<[1], [0], [0], [1], [0, 0, 1, 1], [], []>} : vector<8x256xf32>, vector<256x8xf32>, vector<8x8xf32> -> vector<8x8xf32>
    %cst_251 = arith.constant dense<0xFF800000> : vector<8xf32>
    %877 = vector.multi_reduction <maximumf>, %876, %cst_251 [1] : vector<8x8xf32> to vector<8xf32>
    %878 = vector.shape_cast %877 : vector<8xf32> to vector<8x1xf32>
    %879 = vector.broadcast %878 : vector<8x1xf32> to vector<8x8xf32>
    %880 = arith.subf %876, %879 : vector<8x8xf32>
    %881 = math.exp %880 : vector<8x8xf32>
    %cst_252 = arith.constant dense<0.000000e+00> : vector<8xf32>
    %882 = vector.multi_reduction <add>, %881, %cst_252 [1] : vector<8x8xf32> to vector<8xf32>
    %883 = vector.shape_cast %882 : vector<8xf32> to vector<8x1xf32>
    %884 = vector.broadcast %883 : vector<8x1xf32> to vector<8x8xf32>
    %885 = arith.divf %881, %884 : vector<8x8xf32>
    %886 = vector.extract_strided_slice %885 {offsets = [0, 0], sizes = [8, 1], strides = [1, 1]} : vector<8x8xf32> to vector<8x1xf32>
    %887 = vector.broadcast %886 : vector<8x1xf32> to vector<8x32xf32>
    %888 = arith.mulf %887, %45 : vector<8x32xf32>
    %889 = vector.extract_strided_slice %885 {offsets = [0, 1], sizes = [8, 1], strides = [1, 1]} : vector<8x8xf32> to vector<8x1xf32>
    %890 = vector.broadcast %889 : vector<8x1xf32> to vector<8x32xf32>
    %891 = arith.mulf %890, %74 : vector<8x32xf32>
    %892 = arith.addf %888, %891 : vector<8x32xf32>
    %893 = vector.extract_strided_slice %885 {offsets = [0, 2], sizes = [8, 1], strides = [1, 1]} : vector<8x8xf32> to vector<8x1xf32>
    %894 = vector.broadcast %893 : vector<8x1xf32> to vector<8x32xf32>
    %895 = arith.mulf %894, %103 : vector<8x32xf32>
    %896 = arith.addf %892, %895 : vector<8x32xf32>
    %897 = vector.extract_strided_slice %885 {offsets = [0, 3], sizes = [8, 1], strides = [1, 1]} : vector<8x8xf32> to vector<8x1xf32>
    %898 = vector.broadcast %897 : vector<8x1xf32> to vector<8x32xf32>
    %899 = arith.mulf %898, %132 : vector<8x32xf32>
    %900 = arith.addf %896, %899 : vector<8x32xf32>
    %901 = vector.extract_strided_slice %885 {offsets = [0, 4], sizes = [8, 1], strides = [1, 1]} : vector<8x8xf32> to vector<8x1xf32>
    %902 = vector.broadcast %901 : vector<8x1xf32> to vector<8x32xf32>
    %903 = arith.mulf %902, %161 : vector<8x32xf32>
    %904 = arith.addf %900, %903 : vector<8x32xf32>
    %905 = vector.extract_strided_slice %885 {offsets = [0, 5], sizes = [8, 1], strides = [1, 1]} : vector<8x8xf32> to vector<8x1xf32>
    %906 = vector.broadcast %905 : vector<8x1xf32> to vector<8x32xf32>
    %907 = arith.mulf %906, %190 : vector<8x32xf32>
    %908 = arith.addf %904, %907 : vector<8x32xf32>
    %909 = vector.extract_strided_slice %885 {offsets = [0, 6], sizes = [8, 1], strides = [1, 1]} : vector<8x8xf32> to vector<8x1xf32>
    %910 = vector.broadcast %909 : vector<8x1xf32> to vector<8x32xf32>
    %911 = arith.mulf %910, %219 : vector<8x32xf32>
    %912 = arith.addf %908, %911 : vector<8x32xf32>
    %913 = vector.extract_strided_slice %885 {offsets = [0, 7], sizes = [8, 1], strides = [1, 1]} : vector<8x8xf32> to vector<8x1xf32>
    %914 = vector.broadcast %913 : vector<8x1xf32> to vector<8x32xf32>
    %915 = arith.mulf %914, %248 : vector<8x32xf32>
    %916 = arith.addf %912, %915 : vector<8x32xf32>
    %c448_253 = arith.constant 448 : index
    %c0_254 = arith.constant 0 : index
    %917 = vector.load %arg1[%c448_253, %c0_254] : memref<1088x256xf32, #tpu.memory_space<vmem>>, vector<32x128xf32>
    %cst_255 = arith.constant dense<0.000000e+00> : vector<8x128xf32>
    %918 = tpu.matmul %916, %917, %cst_255 {dimension_numbers = #tpu.dot_dimension_numbers<[1], [0], [0], [1], [0, 0, 1, 1], [], []>} : vector<8x32xf32>, vector<32x128xf32>, vector<8x128xf32> -> vector<8x128xf32>
    %c512_256 = arith.constant 512 : index
    %c0_257 = arith.constant 0 : index
    %919 = vector.load %arg1[%c512_256, %c0_257] : memref<1088x256xf32, #tpu.memory_space<vmem>>, vector<32x128xf32>
    %cst_258 = arith.constant dense<0.000000e+00> : vector<8x128xf32>
    %920 = tpu.matmul %916, %919, %cst_258 {dimension_numbers = #tpu.dot_dimension_numbers<[1], [0], [0], [1], [0, 0, 1, 1], [], []>} : vector<8x32xf32>, vector<32x128xf32>, vector<8x128xf32> -> vector<8x128xf32>
    %921 = arith.addf %866, %870 : vector<8x128xf32>
    %922 = arith.addf %921, %918 : vector<8x128xf32>
    %923 = vector.extract_strided_slice %922 {offsets = [0, 0], sizes = [8, 32], strides = [1, 1]} : vector<8x128xf32> to vector<8x32xf32>
    %924 = arith.negf %923 : vector<8x32xf32>
    %925 = math.exp %924 : vector<8x32xf32>
    %cst_259 = arith.constant 1.000000e+00 : f32
    %926 = vector.broadcast %cst_259 : f32 to vector<8x32xf32>
    %927 = arith.addf %926, %925 : vector<8x32xf32>
    %928 = arith.divf %926, %927 : vector<8x32xf32>
    %929 = vector.extract_strided_slice %922 {offsets = [0, 32], sizes = [8, 32], strides = [1, 1]} : vector<8x128xf32> to vector<8x32xf32>
    %930 = arith.negf %929 : vector<8x32xf32>
    %931 = math.exp %930 : vector<8x32xf32>
    %cst_260 = arith.constant 1.000000e+00 : f32
    %932 = vector.broadcast %cst_260 : f32 to vector<8x32xf32>
    %933 = arith.addf %932, %931 : vector<8x32xf32>
    %934 = arith.divf %932, %933 : vector<8x32xf32>
    %935 = vector.extract_strided_slice %922 {offsets = [0, 64], sizes = [8, 32], strides = [1, 1]} : vector<8x128xf32> to vector<8x32xf32>
    %936 = math.tanh %935 : vector<8x32xf32>
    %937 = vector.extract_strided_slice %922 {offsets = [0, 96], sizes = [8, 32], strides = [1, 1]} : vector<8x128xf32> to vector<8x32xf32>
    %938 = arith.negf %937 : vector<8x32xf32>
    %939 = math.exp %938 : vector<8x32xf32>
    %cst_261 = arith.constant 1.000000e+00 : f32
    %940 = vector.broadcast %cst_261 : f32 to vector<8x32xf32>
    %941 = arith.addf %940, %939 : vector<8x32xf32>
    %942 = arith.divf %940, %941 : vector<8x32xf32>
    %943 = arith.mulf %934, %843 : vector<8x32xf32>
    %944 = arith.mulf %928, %936 : vector<8x32xf32>
    %945 = arith.addf %943, %944 : vector<8x32xf32>
    %946 = math.tanh %945 : vector<8x32xf32>
    %947 = arith.mulf %942, %946 : vector<8x32xf32>
    %948 = arith.addf %868, %920 : vector<8x128xf32>
    %c480_262 = arith.constant 480 : index
    %c0_263 = arith.constant 0 : index
    %949 = vector.load %arg1[%c480_262, %c0_263] : memref<1088x256xf32, #tpu.memory_space<vmem>>, vector<32x128xf32>
    %cst_264 = arith.constant dense<0.000000e+00> : vector<8x128xf32>
    %950 = tpu.matmul %947, %949, %cst_264 {dimension_numbers = #tpu.dot_dimension_numbers<[1], [0], [0], [1], [0, 0, 1, 1], [], []>} : vector<8x32xf32>, vector<32x128xf32>, vector<8x128xf32> -> vector<8x128xf32>
    %951 = arith.addf %948, %950 : vector<8x128xf32>
    %c6 = arith.constant 6 : index
    %c0_265 = arith.constant 0 : index
    %c0_266 = arith.constant 0 : index
    %952 = vector.load %arg2[%c6, %c0_265, %c0_266] : memref<7x8x128xf32, #tpu.memory_space<vmem>>, vector<1x8x128xf32>
    %953 = vector.shape_cast %952 : vector<1x8x128xf32> to vector<8x128xf32>
    %954 = vector.shape_cast %951 : vector<8x128xf32> to vector<1x8x128xf32>
    tpu.vector_store %arg2[%c6, %c0_265, %c0_266], %954 {strides = array<i32>} : memref<7x8x128xf32, #tpu.memory_space<vmem>>, vector<1x8x128xf32>,
    return
  }
}

</mosaic_0001>

<bundles_post_ra>
// kernel: seq2seq_forward.1
= control target key start
LH: loop header
LB: loop body
LE: loop exit
PB: predicated region body
PF: predicated region fallthrough
CT: control target
= control target key end

     0   :  { %7 = vsyncpa [#allocation3], 0  ;;  %s4286_s12 = smov [#allocation2]   ;;  %s4287_s14 = smov 256   ;;  %s5757_s0 = inlined_call_operand.vmem [shape: s32[9,8], index: 0, kind: input, shape index: {}]   ;;  %s5758_s1 = inlined_call_operand.hbm [shape: f32[1088,256], index: 1, kind: input, shape index: {}]   ;;  %s5759_s2 = inlined_call_operand.vmem [shape: f32[7,8,128], index: 2, kind: output, shape index: {}]  }
   0x1   :  { %s14_s11 = sshll.u32 %s5758_s1, 4  ;;  %s16_s13 = sshll.u32 %s4286_s12, 4  ;;  %s15_s11 = int_to_ptr.hbm [resolvable:$true] %s14_s11  ;;  %s17_s13 = int_to_ptr.vmem [resolvable:$true] %s16_s13 }
   0x2   :  { %s4288_s15 = smov 16  }
   0x3   :  { %22 = dma.hbm_to_vmem [thread:$0]  %s15_s11, 34816, %s17_s13, [#allocation3], %s4287_s14, %s4287_s14, %s4288_s15  }
   0x4   :  { %4284 = dma.done.wait [#allocation3], 34816  }
   0x5   :  { %4285 = vsyncadd [#allocation3], 4294932480  ;;  %v29_v0 = vlaneseq  ;;  %v4329_v2 = vld [vmem:[%s5757_s0] sm:$0xff]  ;;  %v136_v3 = vld [vmem:[#allocation2 + $0xf0] sm:$0xff]  ;;  %v4289_v24 = vmov 0.0   ;;  %v5760_v27 = vmov 1.0  }
   0x6   :  { %v135_v4 = vld [vmem:[#allocation2 + $0xe0] sm:$0xff]  ;;  %v31_v5 = vperm.slane %v4329_v2, 0  ;;  %137 = vmatpush.msra.mxu0 %v136_v3  ;;  %v134_v6 = vld [vmem:[#allocation2 + $0xd0] sm:$0xff]  ;;  %s4291_s17 = smov 64   ;;  %s4292_s18 = smov 32   ;;  %v38_v53 = vperm.slane %v4329_v2, 1 }
   0x7   :  { %v4321_v1 = vshrl.u32 %v29_v0, 7  ;;  %v133_v7 = vld [vmem:[#allocation2 + $0xc0] sm:$0xff]  ;;  %v4332_v8 = vld [vmem:[#allocation2 + $0x330] sm:$0xff]  ;;  %v4369_v25 = vand.u32 127, %v29_v0  ;;  %vm182_vm5 = vcmask 261120   ;;  %s4293_s19 = smov 96  }
   0x8   :  { %138 = vmatpush.msra.mxu0 %v135_v4  ;;  %v4334_v9 = vld [vmem:[#allocation2 + $0x320] sm:$0xff]  ;;  %v132_v10 = vld [vmem:[#allocation2 + $0xb0] sm:$0xff]  ;;  %198 = vmatpush.msra.mxu1 %v4332_v8 }
   0x9   :  { %4015 = vset.pattern.permute.xlu0 %v4321_v1  ;;  %4016 = vset.pattern.permute.xlu2 %v4321_v1  ;;  %v4338_v11 = vld [vmem:[#allocation2 + $0x310] sm:$0xff]  ;;  %v131_v12 = vld [vmem:[#allocation2 + $0xa0] sm:$0xff] }
   0xa   :  { %4017 = vset.pattern.permute.xlu1 %v4321_v1  ;;  %139 = vmatpush.msra.mxu0 %v134_v6  ;;  %v130_v13 = vld [vmem:[#allocation2 + $0x90] sm:$0xff]  ;;  %v129_v14 = vld [vmem:[#allocation2 + $0x80] sm:$0xff] }
   0xb   :  { %261 = vmatpush.msra.mxu2 %v4332_v8  ;;  %324 = vmatpush.msra.mxu3 %v4332_v8  ;;  %v128_v15 = vld [vmem:[#allocation2 + $0x70] sm:$0xff]  ;;  %v127_v16 = vld [vmem:[#allocation2 + $0x60] sm:$0xff] }
   0xc   :  { %140 = vmatpush.msra.mxu0 %v133_v7  ;;  %199 = vmatpush.msra.mxu1 %v4334_v9  ;;  %v126_v17 = vld [vmem:[#allocation2 + $0x50] sm:$0xff]  ;;  %v125_v18 = vld [vmem:[#allocation2 + $0x40] sm:$0xff] }
   0xd   :  { %262 = vmatpush.msra.mxu2 %v4334_v9  ;;  %325 = vmatpush.msra.mxu3 %v4334_v9  ;;  %v124_v19 = vld [vmem:[#allocation2 + $0x30] sm:$0xff]  ;;  %v123_v20 = vld [vmem:[#allocation2 + $0x20] sm:$0xff] }
   0xe   :  { %141 = vmatpush.msra.mxu0 %v132_v10  ;;  %200 = vmatpush.msra.mxu1 %v4338_v11  ;;  %v122_v21 = vld [vmem:[#allocation2 + $0x10] sm:$0xff]  ;;  %v121_v22 = vld [vmem:[#allocation2] sm:$0xff] }
   0xf   :  { %263 = vmatpush.msra.mxu2 %v4338_v11  ;;  %326 = vmatpush.msra.mxu3 %v4338_v11  ;;  %v4347_v23 = vld [vmem:[#allocation2 + $0x300] sm:$0xff] }
  0x10   :  { %142 = vmatpush.msra.mxu0 %v131_v12  ;;  %201 = vmatpush.msra.mxu1 %v4347_v23 }
  0x11   :  { %36 = vperm.xlu0 %4015, %v31_v5   ;;  %202 = vmatmul.f32.vlgmr.msra.gmra.mxu1 %v4289_v24 }
  0x12   :  { %143 = vmatpush.msra.mxu0 %v130_v13  ;;  %264 = vmatpush.msra.mxu2 %v4347_v23 }
  0x13   :  { %327 = vmatpush.msra.mxu3 %v4347_v23  ;;  %387 = vmatpush.msrb.mxu1 %v4332_v8 }
  0x14   :  { %144 = vmatpush.msra.mxu0 %v129_v14  ;;  %450 = vmatpush.msrb.mxu2 %v4332_v8 }
  0x15   :  { %513 = vmatpush.msrb.mxu3 %v4332_v8  ;;  %388 = vmatpush.msrb.mxu1 %v4334_v9 }
  0x16   :  { %145 = vmatpush.msra.mxu0 %v128_v15  ;;  %451 = vmatpush.msrb.mxu2 %v4334_v9 }
  0x17   :  { %514 = vmatpush.msrb.mxu3 %v4334_v9  ;;  %389 = vmatpush.msrb.mxu1 %v4338_v11 }
  0x18   :  { %146 = vmatpush.msra.mxu0 %v127_v16  ;;  %452 = vmatpush.msrb.mxu2 %v4338_v11 }
  0x19   :  { %515 = vmatpush.msrb.mxu3 %v4338_v11  ;;  %390 = vmatpush.msrb.mxu1 %v4347_v23 }
  0x1a   :  { %147 = vmatpush.msra.mxu0 %v126_v17  ;;  %453 = vmatpush.msrb.mxu2 %v4347_v23  ;;  %v45_v17 = vperm.slane %v4329_v2, 2 }
  0x1b   :  { %516 = vmatpush.msrb.mxu3 %v4347_v23  ;;  %576 = vmatpush.msra.mxu1 %v4332_v8 }
  0x1c   :  { %148 = vmatpush.msra.mxu0 %v125_v18 }
  0x1d   :  { %577 = vmatpush.msra.mxu1 %v4334_v9 }
  0x1e   :  { %149 = vmatpush.msra.mxu0 %v124_v19 }
  0x1f   :  { %578 = vmatpush.msra.mxu1 %v4338_v11 }
  0x20   :  { %150 = vmatpush.msra.mxu0 %v123_v20 }
  0x21   :  { %579 = vmatpush.msra.mxu1 %v4347_v23 }
  0x22   :  { %151 = vmatpush.msra.mxu0 %v122_v21 }
  0x24   :  { %152 = vmatpush.msra.mxu0 %v121_v22 }
  0x83   :  { %v37_v26 = vpop.permute.xlu0 %36 }
  0x84   :  { %vm94_vm0 = vcmp.eq.s32.totalorder %v37_v26, %v4369_v25 }
  0x85   :  { %3901 = vmatmul.msk.f32.vlgmr.msra.gmra.mxu0 %vm94_vm0, %v5760_v27 }
  0x8e   :  { %v203_v28 = vpop.f32.mrf.mxu1 }
 0x102   :  { %v154_v29 = vpop.f32.mrf.mxu0 }
 0x103   :  { %v206_v30 = vadd.f32 %v203_v28, %v154_v29  ;;  %v52_v28 = vperm.slane %v4329_v2, 3 }
 0x105   :  { %4084 = vtanh.f32 %v206_v30  ;;  %v3909_v32 = vmul.f32 -1.442695, %v206_v30 }
 0x107   :  { %4086 = vpow2.f32 %v3909_v32 }
 0x10b   :  { %v4085_v31 = vpop.eup %4084 }
 0x10c   :  { %229 = vrot.lane.b32.xlu0 %v4085_v31, %s4291_s17 }
 0x10d   :  { %v4087_v33 = vpop.eup %4086 }
 0x10e   :  { %v210_v34 = vadd.f32 1.0, %v4087_v33 }
 0x110   :  { %4088 = vrcp.f32 %v210_v34  ;;  %v222_v40 = vand.u32 2147483648, %v210_v34  ;;  %vm216_vm2 = vweird.f32 %v210_v34  ;;  %v220_v41 = vand.u32 2147483647, %v210_v34 }
 0x112   :  { %v223_v43 = vor.u32 1.1754944e-38, %v222_v40  ;;  %vm221_vm4 = vcmp.eq.f32.partialorder %v220_v41, 8.507059e+37 }
 0x116   :  { %v4089_v35 = vpop.eup %4088 }
 0x117   :  { %v212_v36 = vmul.f32 %v4089_v35, %v210_v34  ;;  %vm217_vm1 = vweird.f32 %v4089_v35 }
 0x118   :  { %vm218_vm3 = vmor %vm216_vm2, %vm217_vm1 }
 0x119   :  { %v213_v37 = vsub.f32 1.0, %v212_v36 }
 0x11b   :  { %v214_v38 = vmul.f32 %v4089_v35, %v213_v37 }
 0x11d   :  { %v215_v39 = vadd.f32 %v4089_v35, %v214_v38 }
 0x11f   :  { %v219_v42 = vsel %vm218_vm3, %v4089_v35, %v215_v39 }
 0x120   :  { %v224_v45 = vsel %vm221_vm4, %v223_v43, %v219_v42 }
 0x121   :  { %v227_v47 = vmul.f32 0.0, %v224_v45 }
 0x17e   :  { %v230_v44 = vpop.permute.xlu0 %229 }
 0x17f   :  { %v232_v46 = vmul.f32 %v230_v44, %v224_v45 }
 0x181   :  { %234 = vrot.lane.b32.xlu1 %v232_v46, %s4292_s18 }
 0x1f3   :  { %v235_v48 = vpop.permute.xlu1 %234 }
 0x1f4   :  { %v237_v49 = vadd.f32 %v235_v48, %v227_v47 }
 0x1f6   :  { %4090 = vtanh.f32 %v237_v49 }
 0x1fc   :  { %v4091_v50 = vpop.eup %4090 }
 0x1fd   :  { %240 = vrot.lane.b32.xlu1 %v4091_v50, %s4291_s17 }
 0x26f   :  { %v241_v51 = vpop.permute.xlu1 %240 }
 0x270   :  { %v4376_v52 = vmul.f32 %v241_v51, %v224_v45 }
 0x272   :  { %5876 = vst [vmem:[#allocation5_spill] sm:$0xff] %v4376_v52  ;;  %245 = vrot.lane.b32.xlu2 %v4376_v52, %s4292_s18 }
 0x27a   :  { %43 = vperm.xlu2 %4016, %v38_v53  }
 0x2cc   :  { %v4381_v54 = vpop.permute.xlu2 %245 }
 0x2cd   :  { %3910 = vmatmul.msk.f32.vlgmr.msra.gmra.mxu2 %vm182_vm5, %v4381_v54 }
 0x2ce   :  { %639 = vmatpush.msra.mxu2 %v4332_v8 }
 0x2d0   :  { %640 = vmatpush.msra.mxu2 %v4334_v9 }
 0x2d2   :  { %641 = vmatpush.msra.mxu2 %v4338_v11 }
 0x2d4   :  { %v44_v55 = vpop.permute.xlu2 %43  ;;  %642 = vmatpush.msra.mxu2 %v4347_v23 }
 0x2d5   :  { %vm95_vm6 = vcmp.eq.s32.totalorder %v44_v55, %v4369_v25 }
 0x2d6   :  { %3902 = vmatmul.msk.f32.gmra.mxu0 %vm95_vm6, %v5760_v27 }
 0x350   :  { %v266_v56 = vpop.f32.mrf.mxu2 }
 0x353   :  { %v157_v57 = vpop.f32.mrf.mxu0 }
 0x354   :  { %v269_v58 = vadd.f32 %v266_v56, %v157_v57 }
 0x356   :  { %4092 = vtanh.f32 %v269_v58  ;;  %v3911_v60 = vmul.f32 -1.442695, %v269_v58 }
 0x358   :  { %4094 = vpow2.f32 %v3911_v60 }
 0x35c   :  { %v4093_v59 = vpop.eup %4092 }
 0x35d   :  { %292 = vrot.lane.b32.xlu0 %v4093_v59, %s4291_s17 }
 0x35e   :  { %v4095_v61 = vpop.eup %4094 }
 0x35f   :  { %v273_v62 = vadd.f32 1.0, %v4095_v61 }
 0x361   :  { %4096 = vrcp.f32 %v273_v62  ;;  %v285_v6 = vand.u32 2147483648, %v273_v62  ;;  %vm279_vm8 = vweird.f32 %v273_v62  ;;  %v283_v7 = vand.u32 2147483647, %v273_v62 }
 0x363   :  { %v286_v9 = vor.u32 1.1754944e-38, %v285_v6  ;;  %vm284_vm10 = vcmp.eq.f32.partialorder %v283_v7, 8.507059e+37 }
 0x367   :  { %v4097_v63 = vpop.eup %4096 }
 0x368   :  { %v275_v0 = vmul.f32 %v4097_v63, %v273_v62  ;;  %vm280_vm7 = vweird.f32 %v4097_v63 }
 0x369   :  { %vm281_vm9 = vmor %vm279_vm8, %vm280_vm7 }
 0x36a   :  { %v276_v3 = vsub.f32 1.0, %v275_v0 }
 0x36c   :  { %v277_v4 = vmul.f32 %v4097_v63, %v276_v3 }
 0x36e   :  { %v278_v5 = vadd.f32 %v4097_v63, %v277_v4 }
 0x370   :  { %v282_v8 = vsel %vm281_vm9, %v4097_v63, %v278_v5 }
 0x371   :  { %v287_v11 = vsel %vm284_vm10, %v286_v9, %v282_v8 }
 0x372   :  { %v290_v13 = vmul.f32 %v287_v11, %v237_v49 }
 0x3cf   :  { %v293_v10 = vpop.permute.xlu0 %292 }
 0x3d0   :  { %v295_v12 = vmul.f32 %v293_v10, %v287_v11 }
 0x3d2   :  { %297 = vrot.lane.b32.xlu1 %v295_v12, %s4292_s18 }
 0x3da   :  { %50 = vperm.xlu1 %4017, %v45_v17  }
 0x444   :  { %v298_v14 = vpop.permute.xlu1 %297 }
 0x445   :  { %v300_v15 = vadd.f32 %v298_v14, %v290_v13 }
 0x447   :  { %4098 = vtanh.f32 %v300_v15 }
 0x44c   :  { %v51_v20 = vpop.permute.xlu1 %50 }
 0x44d   :  { %v4099_v16 = vpop.eup %4098  ;;  %vm96_vm11 = vcmp.eq.s32.totalorder %v51_v20, %v4369_v25 }
 0x44e   :  { %303 = vrot.lane.b32.xlu2 %v4099_v16, %s4291_s17  ;;  %3903 = vmatmul.msk.f32.gmra.mxu0 %vm96_vm11, %v5760_v27 }
 0x4a8   :  { %v304_v18 = vpop.permute.xlu2 %303 }
 0x4a9   :  { %v4395_v19 = vmul.f32 %v304_v18, %v287_v11  ;;  %v59_v11 = vperm.slane %v4329_v2, 4 }
 0x4ab   :  { %5877 = vst [vmem:[#allocation6_spill] sm:$0xff] %v4395_v19  ;;  %308 = vrot.lane.b32.xlu0 %v4395_v19, %s4292_s18 }
 0x4cb   :  { %v160_v22 = vpop.f32.mrf.mxu0 }
 0x51d   :  { %v309_v21 = vpop.permute.xlu0 %308 }
 0x51e   :  { %3912 = vmatmul.msk.f32.vlgmr.msra.gmra.mxu3 %vm182_vm5, %v309_v21 }
 0x5a1   :  { %v329_v23 = vpop.f32.mrf.mxu3 }
 0x5a2   :  { %v332_v24 = vadd.f32 %v329_v23, %v160_v22 }
 0x5a4   :  { %4100 = vtanh.f32 %v332_v24  ;;  %v3913_v29 = vmul.f32 -1.442695, %v332_v24 }
 0x5a6   :  { %4102 = vpow2.f32 %v3913_v29 }
 0x5aa   :  { %v4101_v26 = vpop.eup %4100 }
 0x5ab   :  { %355 = vrot.lane.b32.xlu2 %v4101_v26, %s4291_s17 }
 0x5ac   :  { %v4103_v30 = vpop.eup %4102 }
 0x5ad   :  { %v336_v31 = vadd.f32 1.0, %v4103_v30 }
 0x5af   :  { %4104 = vrcp.f32 %v336_v31  ;;  %v348_v37 = vand.u32 2147483648, %v336_v31  ;;  %vm342_vm13 = vweird.f32 %v336_v31  ;;  %v346_v38 = vand.u32 2147483647, %v336_v31 }
 0x5b1   :  { %v349_v40 = vor.u32 1.1754944e-38, %v348_v37  ;;  %vm347_vm15 = vcmp.eq.f32.partialorder %v346_v38, 8.507059e+37 }
 0x5b3   :  { %57 = vperm.xlu2 %4016, %v52_v28  }
 0x5b5   :  { %v4105_v32 = vpop.eup %4104 }
 0x5b6   :  { %v338_v33 = vmul.f32 %v4105_v32, %v336_v31  ;;  %vm343_vm12 = vweird.f32 %v4105_v32 }
 0x5b7   :  { %vm344_vm14 = vmor %vm342_vm13, %vm343_vm12 }
 0x5b8   :  { %v339_v34 = vsub.f32 1.0, %v338_v33 }
 0x5ba   :  { %v340_v35 = vmul.f32 %v4105_v32, %v339_v34 }
 0x5bc   :  { %v341_v36 = vadd.f32 %v4105_v32, %v340_v35 }
 0x5be   :  { %v345_v39 = vsel %vm344_vm14, %v4105_v32, %v341_v36 }
 0x5bf   :  { %v350_v42 = vsel %vm347_vm15, %v349_v40, %v345_v39 }
 0x5c0   :  { %v353_v45 = vmul.f32 %v350_v42, %v300_v15 }
 0x605   :  { %v356_v41 = vpop.permute.xlu2 %355 }
 0x606   :  { %v358_v43 = vmul.f32 %v356_v41, %v350_v42 }
 0x608   :  { %360 = vrot.lane.b32.xlu0 %v358_v43, %s4292_s18 }
 0x60d   :  { %v58_v44 = vpop.permute.xlu2 %57 }
 0x60e   :  { %vm97_vm0 = vcmp.eq.s32.totalorder %v58_v44, %v4369_v25 }
 0x60f   :  { %3904 = vmatmul.msk.f32.gmra.mxu0 %vm97_vm0, %v5760_v27 }
 0x67a   :  { %v361_v46 = vpop.permute.xlu0 %360 }
 0x67b   :  { %v363_v47 = vadd.f32 %v361_v46, %v353_v45 }
 0x67d   :  { %4106 = vtanh.f32 %v363_v47 }
 0x683   :  { %v4107_v48 = vpop.eup %4106 }
 0x684   :  { %366 = vrot.lane.b32.xlu1 %v4107_v48, %s4291_s17 }
 0x68c   :  { %v163_v53 = vpop.f32.mrf.mxu0 }
 0x6f6   :  { %v367_v49 = vpop.permute.xlu1 %366 }
 0x6f7   :  { %v4408_v50 = vmul.f32 %v367_v49, %v350_v42  ;;  %v66_v42 = vperm.slane %v4329_v2, 5 }
 0x6f9   :  { %5878 = vst [vmem:[#allocation7_spill] sm:$0xff] %v4408_v50  ;;  %371 = vrot.lane.b32.xlu0 %v4408_v50, %s4292_s18 }
 0x76b   :  { %v372_v51 = vpop.permute.xlu0 %371 }
 0x76c   :  { %3914 = vmatmul.msk.f32.vlgmr.msrb.gmra.mxu1 %vm182_vm5, %v372_v51 }
 0x7e9   :  { %v392_v55 = vpop.f32.mrf.mxu1 }
 0x7ea   :  { %v395_v56 = vadd.f32 %v392_v55, %v163_v53 }
 0x7ec   :  { %4108 = vtanh.f32 %v395_v56  ;;  %v3915_v58 = vmul.f32 -1.442695, %v395_v56 }
 0x7ee   :  { %4110 = vpow2.f32 %v3915_v58  ;;  %v73_v58 = vperm.slane %v4329_v2, 6 }
 0x7f2   :  { %v4109_v57 = vpop.eup %4108 }
 0x7f3   :  { %418 = vrot.lane.b32.xlu1 %v4109_v57, %s4291_s17 }
 0x7f4   :  { %v4111_v59 = vpop.eup %4110 }
 0x7f5   :  { %v399_v60 = vadd.f32 1.0, %v4111_v59 }
 0x7f7   :  { %4112 = vrcp.f32 %v399_v60  ;;  %v411_v4 = vand.u32 2147483648, %v399_v60  ;;  %vm405_vm2 = vweird.f32 %v399_v60  ;;  %v409_v5 = vand.u32 2147483647, %v399_v60 }
 0x7f9   :  { %v412_v7 = vor.u32 1.1754944e-38, %v411_v4  ;;  %vm410_vm4 = vcmp.eq.f32.partialorder %v409_v5, 8.507059e+37 }
 0x7fd   :  { %v4113_v61 = vpop.eup %4112 }
 0x7fe   :  { %v401_v62 = vmul.f32 %v4113_v61, %v399_v60  ;;  %vm406_vm1 = vweird.f32 %v4113_v61 }
 0x7ff   :  { %vm407_vm3 = vmor %vm405_vm2, %vm406_vm1 }
 0x800   :  { %v402_v63 = vsub.f32 1.0, %v401_v62 }
 0x802   :  { %v403_v0 = vmul.f32 %v4113_v61, %v402_v63 }
 0x804   :  { %v404_v3 = vadd.f32 %v4113_v61, %v403_v0 }
 0x806   :  { %v408_v6 = vsel %vm407_vm3, %v4113_v61, %v404_v3 }
 0x807   :  { %v413_v9 = vsel %vm410_vm4, %v412_v7, %v408_v6 }
 0x808   :  { %v416_v12 = vmul.f32 %v413_v9, %v363_v47 }
 0x865   :  { %v419_v8 = vpop.permute.xlu1 %418 }
 0x866   :  { %v421_v10 = vmul.f32 %v419_v8, %v413_v9 }
 0x868   :  { %423 = vrot.lane.b32.xlu2 %v421_v10, %s4292_s18 }
 0x870   :  { %64 = vperm.xlu2 %4016, %v59_v11  }
 0x8c2   :  { %v424_v13 = vpop.permute.xlu2 %423 }
 0x8c3   :  { %v426_v14 = vadd.f32 %v424_v13, %v416_v12 }
 0x8c5   :  { %4114 = vtanh.f32 %v426_v14 }
 0x8ca   :  { %v65_v15 = vpop.permute.xlu2 %64 }
 0x8cb   :  { %v4115_v16 = vpop.eup %4114  ;;  %vm98_vm6 = vcmp.eq.s32.totalorder %v65_v15, %v4369_v25 }
 0x8cc   :  { %3905 = vmatmul.msk.f32.gmra.mxu0 %vm98_vm6, %v5760_v27  ;;  %429 = vrot.lane.b32.xlu0 %v4115_v16, %s4291_s17 }
 0x93e   :  { %v430_v17 = vpop.permute.xlu0 %429 }
 0x93f   :  { %v4419_v18 = vmul.f32 %v430_v17, %v413_v9 }
 0x941   :  { %5879 = vst [vmem:[#allocation8_spill] sm:$0xff] %v4419_v18  ;;  %434 = vrot.lane.b32.xlu1 %v4419_v18, %s4292_s18 }
 0x949   :  { %v166_v21 = vpop.f32.mrf.mxu0 }
 0x9b3   :  { %v435_v20 = vpop.permute.xlu1 %434 }
 0x9b4   :  { %3916 = vmatmul.msk.f32.vlgmr.msrb.gmra.mxu2 %vm182_vm5, %v435_v20 }
 0xa37   :  { %v455_v22 = vpop.f32.mrf.mxu2 }
 0xa38   :  { %v458_v23 = vadd.f32 %v455_v22, %v166_v21 }
 0xa3a   :  { %4116 = vtanh.f32 %v458_v23  ;;  %v3917_v26 = vmul.f32 -1.442695, %v458_v23 }
 0xa3c   :  { %4118 = vpow2.f32 %v3917_v26 }
 0xa40   :  { %v4117_v24 = vpop.eup %4116 }
 0xa41   :  { %481 = vrot.lane.b32.xlu0 %v4117_v24, %s4291_s17 }
 0xa42   :  { %v4119_v28 = vpop.eup %4118 }
 0xa43   :  { %v462_v29 = vadd.f32 1.0, %v4119_v28 }
 0xa45   :  { %4120 = vrcp.f32 %v462_v29  ;;  %v474_v35 = vand.u32 2147483648, %v462_v29  ;;  %vm468_vm8 = vweird.f32 %v462_v29  ;;  %v472_v36 = vand.u32 2147483647, %v462_v29 }
 0xa47   :  { %v475_v38 = vor.u32 1.1754944e-38, %v474_v35  ;;  %vm473_vm10 = vcmp.eq.f32.partialorder %v472_v36, 8.507059e+37 }
 0xa4b   :  { %v4121_v30 = vpop.eup %4120 }
 0xa4c   :  { %v464_v31 = vmul.f32 %v4121_v30, %v462_v29  ;;  %vm469_vm7 = vweird.f32 %v4121_v30 }
 0xa4d   :  { %vm470_vm9 = vmor %vm468_vm8, %vm469_vm7 }
 0xa4e   :  { %v465_v32 = vsub.f32 1.0, %v464_v31 }
 0xa50   :  { %v466_v33 = vmul.f32 %v4121_v30, %v465_v32 }
 0xa52   :  { %v467_v34 = vadd.f32 %v4121_v30, %v466_v33 }
 0xa54   :  { %v471_v37 = vsel %vm470_vm9, %v4121_v30, %v467_v34 }
 0xa55   :  { %v476_v40 = vsel %vm473_vm10, %v475_v38, %v471_v37 }
 0xa56   :  { %v479_v43 = vmul.f32 %v476_v40, %v426_v14 }
 0xab3   :  { %v482_v39 = vpop.permute.xlu0 %481 }
 0xab4   :  { %v484_v41 = vmul.f32 %v482_v39, %v476_v40 }
 0xab6   :  { %486 = vrot.lane.b32.xlu1 %v484_v41, %s4292_s18 }
 0xabe   :  { %71 = vperm.xlu1 %4017, %v66_v42  }
 0xb28   :  { %v487_v44 = vpop.permute.xlu1 %486 }
 0xb29   :  { %v489_v45 = vadd.f32 %v487_v44, %v479_v43  ;;  %v80_v43 = vperm.slane %v4329_v2, 7 }
 0xb2b   :  { %4122 = vtanh.f32 %v489_v45 }
 0xb30   :  { %v72_v46 = vpop.permute.xlu1 %71 }
 0xb31   :  { %v4123_v47 = vpop.eup %4122  ;;  %vm99_vm11 = vcmp.eq.s32.totalorder %v72_v46, %v4369_v25 }
 0xb32   :  { %3906 = vmatmul.msk.f32.gmra.mxu0 %vm99_vm11, %v5760_v27  ;;  %492 = vrot.lane.b32.xlu2 %v4123_v47, %s4291_s17  ;;  %vm700_vm11 = vcmask 523264  }
 0xb8c   :  { %v493_v48 = vpop.permute.xlu2 %492 }
 0xb8d   :  { %v4430_v49 = vmul.f32 %v493_v48, %v476_v40 }
 0xb8f   :  { %5880 = vst [vmem:[#allocation9_spill] sm:$0xff] %v4430_v49  ;;  %497 = vrot.lane.b32.xlu0 %v4430_v49, %s4292_s18 }
 0xbaf   :  { %v169_v53 = vpop.f32.mrf.mxu0 }
 0xc01   :  { %v4434_v51 = vpop.permute.xlu0 %497 }
 0xc02   :  { %3918 = vmatmul.msk.f32.vlgmr.msrb.gmra.mxu3 %vm182_vm5, %v4434_v51 }
 0xc85   :  { %v518_v55 = vpop.f32.mrf.mxu3 }
 0xc86   :  { %v521_v56 = vadd.f32 %v518_v55, %v169_v53 }
 0xc88   :  { %4124 = vtanh.f32 %v521_v56  ;;  %v3919_v59 = vmul.f32 -1.442695, %v521_v56 }
 0xc8a   :  { %4126 = vpow2.f32 %v3919_v59 }
 0xc8e   :  { %v4125_v57 = vpop.eup %4124 }
 0xc8f   :  { %544 = vrot.lane.b32.xlu2 %v4125_v57, %s4291_s17 }
 0xc90   :  { %v4127_v60 = vpop.eup %4126 }
 0xc91   :  { %v525_v61 = vadd.f32 1.0, %v4127_v60 }
 0xc93   :  { %4128 = vrcp.f32 %v525_v61  ;;  %v537_v5 = vand.u32 2147483648, %v525_v61  ;;  %vm531_vm13 = vweird.f32 %v525_v61  ;;  %v535_v6 = vand.u32 2147483647, %v525_v61 }
 0xc95   :  { %v538_v8 = vor.u32 1.1754944e-38, %v537_v5  ;;  %vm536_vm15 = vcmp.eq.f32.partialorder %v535_v6, 8.507059e+37  ;;  %v735_v5 = vld [vmem:[#allocation2 + $0x560] sm:$0xff]  ;;  %v736_v6 = vld [vmem:[#allocation2 + $0x568] sm:$0xff] }
 0xc97   :  { %78 = vperm.xlu2 %4016, %v73_v58  }
 0xc99   :  { %v4129_v62 = vpop.eup %4128 }
 0xc9a   :  { %v527_v63 = vmul.f32 %v4129_v62, %v525_v61  ;;  %vm532_vm12 = vweird.f32 %v4129_v62 }
 0xc9b   :  { %vm533_vm14 = vmor %vm531_vm13, %vm532_vm12  ;;  %vm702_vm12 = vcmask 785408   ;;  %vm1036_vm13 = vcmask 64512  }
 0xc9c   :  { %v528_v0 = vsub.f32 1.0, %v527_v63 }
 0xc9e   :  { %v529_v3 = vmul.f32 %v4129_v62, %v528_v0 }
 0xca0   :  { %v530_v4 = vadd.f32 %v4129_v62, %v529_v3  ;;  %v737_v3 = vld [vmem:[#allocation2 + $0x570] sm:$0xff] }
 0xca1   :  { %771 = vmatpush.msra.mxu3 %v737_v3  ;;  %v764_v3 = vld [vmem:[#allocation2 + $0x648] sm:$0xff] }
 0xca2   :  { %v534_v7 = vsel %vm533_vm14, %v4129_v62, %v530_v4  ;;  %v738_v4 = vld [vmem:[#allocation2 + $0x578] sm:$0xff] }
 0xca3   :  { %v539_v10 = vsel %vm536_vm15, %v538_v8, %v534_v7  ;;  %811 = vmatpush.msrb.mxu2 %v738_v4  ;;  %v733_v8 = vld [vmem:[#allocation2 + $0x550] sm:$0xff]  ;;  %772 = vmatpush.msra.mxu3 %v735_v5  ;;  %v762_v5 = vld [vmem:[#allocation2 + $0x638] sm:$0xff] }
 0xca4   :  { %v542_v13 = vmul.f32 %v539_v10, %v489_v45  ;;  %v761_v4 = vld [vmem:[#allocation2 + $0x630] sm:$0xff] }
 0xca5   :  { %812 = vmatpush.msrb.mxu2 %v736_v6  ;;  %773 = vmatpush.msra.mxu3 %v733_v8  ;;  %v759_v6 = vld [vmem:[#allocation2 + $0x620] sm:$0xff]  ;;  %v757_v8 = vld [vmem:[#allocation2 + $0x610] sm:$0xff] }
 0xce9   :  { %v545_v9 = vpop.permute.xlu2 %544 }
 0xcea   :  { %v547_v11 = vmul.f32 %v545_v9, %v539_v10  ;;  %v734_v9 = vld [vmem:[#allocation2 + $0x558] sm:$0xff] }
 0xceb   :  { %813 = vmatpush.msrb.mxu2 %v734_v9  ;;  %v758_v9 = vld [vmem:[#allocation2 + $0x618] sm:$0xff] }
 0xcec   :  { %549 = vrot.lane.b32.xlu0 %v547_v11, %s4292_s18  ;;  %v732_v11 = vld [vmem:[#allocation2 + $0x548] sm:$0xff] }
 0xced   :  { %814 = vmatpush.msrb.mxu2 %v732_v11  ;;  %v756_v11 = vld [vmem:[#allocation2 + $0x608] sm:$0xff] }
 0xcf1   :  { %v79_v12 = vpop.permute.xlu2 %78 }
 0xcf2   :  { %vm100_vm0 = vcmp.eq.s32.totalorder %v79_v12, %v4369_v25 }
 0xcf3   :  { %3907 = vmatmul.msk.f32.gmra.mxu0 %vm100_vm0, %v5760_v27 }
 0xd5e   :  { %v550_v14 = vpop.permute.xlu0 %549 }
 0xd5f   :  { %v552_v15 = vadd.f32 %v550_v14, %v542_v13  ;;  %v729_v13 = vld [vmem:[#allocation2 + $0x530] sm:$0xff]  ;;  %v730_v14 = vld [vmem:[#allocation2 + $0x538] sm:$0xff] }
 0xd60   :  { %815 = vmatpush.msrb.mxu2 %v730_v14  ;;  %v751_v14 = vld [vmem:[#allocation2 + $0x5e0] sm:$0xff] }
 0xd61   :  { %4130 = vtanh.f32 %v552_v15 }
 0xd67   :  { %v4131_v16 = vpop.eup %4130 }
 0xd68   :  { %555 = vrot.lane.b32.xlu1 %v4131_v16, %s4291_s17  ;;  %v728_v16 = vld [vmem:[#allocation2 + $0x528] sm:$0xff] }
 0xd69   :  { %816 = vmatpush.msrb.mxu2 %v728_v16 }
 0xd70   :  { %v172_v22 = vpop.f32.mrf.mxu0 }
 0xdda   :  { %v556_v17 = vpop.permute.xlu1 %555 }
 0xddb   :  { %v4444_v20 = vmul.f32 %v556_v17, %v539_v10  ;;  %v731_v10 = vld [vmem:[#allocation2 + $0x540] sm:$0xff] }
 0xddc   :  { %774 = vmatpush.msra.mxu3 %v731_v10  ;;  %v755_v10 = vld [vmem:[#allocation2 + $0x600] sm:$0xff] }
 0xddd   :  { %5881 = vst [vmem:[#allocation10_spill] sm:$0xff] %v4444_v20  ;;  %560 = vrot.lane.b32.xlu0 %v4444_v20, %s4292_s18  ;;  %v4018_v60 = vpack.i.bf16 %v4444_v20, %v4395_v19 }
 0xdde   :  { %775 = vmatpush.msra.mxu3 %v729_v13  ;;  %v754_v13 = vld [vmem:[#allocation2 + $0x5f8] sm:$0xff] }
 0xe4f   :  { %v561_v21 = vpop.permute.xlu0 %560 }
 0xe50   :  { %3920 = vmatmul.msk.f32.vlgmr.msra.gmra.mxu1 %vm182_vm5, %v561_v21  ;;  %v725_v21 = vld [vmem:[#allocation2 + $0x510] sm:$0xff] }
 0xecd   :  { %v581_v23 = vpop.f32.mrf.mxu1 }
 0xece   :  { %v584_v24 = vadd.f32 %v581_v23, %v172_v22  ;;  %v726_v22 = vld [vmem:[#allocation2 + $0x518] sm:$0xff]  ;;  %v723_v23 = vld [vmem:[#allocation2 + $0x500] sm:$0xff] }
 0xecf   :  { %817 = vmatpush.msrb.mxu2 %v726_v22 }
 0xed0   :  { %4132 = vtanh.f32 %v584_v24  ;;  %v3921_v28 = vmul.f32 -1.442695, %v584_v24  ;;  %v724_v24 = vld [vmem:[#allocation2 + $0x508] sm:$0xff] }
 0xed1   :  { %818 = vmatpush.msrb.mxu2 %v724_v24  ;;  %v747_v24 = vld [vmem:[#allocation2 + $0x5c0] sm:$0xff] }
 0xed2   :  { %4134 = vpow2.f32 %v3921_v28  ;;  %v721_v28 = vld [vmem:[#allocation2 + $0x4f0] sm:$0xff] }
 0xed6   :  { %v4133_v26 = vpop.eup %4132 }
 0xed7   :  { %607 = vrot.lane.b32.xlu1 %v4133_v26, %s4291_s17 }
 0xed8   :  { %v4135_v29 = vpop.eup %4134 }
 0xed9   :  { %v588_v30 = vadd.f32 1.0, %v4135_v29  ;;  %v722_v29 = vld [vmem:[#allocation2 + $0x4f8] sm:$0xff] }
 0xeda   :  { %819 = vmatpush.msrb.mxu2 %v722_v29  ;;  %v745_v29 = vld [vmem:[#allocation2 + $0x5b0] sm:$0xff] }
 0xedb   :  { %4136 = vrcp.f32 %v588_v30  ;;  %v600_v36 = vand.u32 2147483648, %v588_v30  ;;  %vm594_vm2 = vweird.f32 %v588_v30  ;;  %v598_v37 = vand.u32 2147483647, %v588_v30 }
 0xedd   :  { %v601_v39 = vor.u32 1.1754944e-38, %v600_v36  ;;  %vm599_vm4 = vcmp.eq.f32.partialorder %v598_v37, 8.507059e+37 }
 0xee1   :  { %v4137_v31 = vpop.eup %4136 }
 0xee2   :  { %v590_v32 = vmul.f32 %v4137_v31, %v588_v30  ;;  %vm595_vm1 = vweird.f32 %v4137_v31 }
 0xee3   :  { %vm596_vm3 = vmor %vm594_vm2, %vm595_vm1 }
 0xee4   :  { %v591_v33 = vsub.f32 1.0, %v590_v32  ;;  %v719_v32 = vld [vmem:[#allocation2 + $0x4e0] sm:$0xff] }
 0xee6   :  { %v592_v34 = vmul.f32 %v4137_v31, %v591_v33  ;;  %v720_v33 = vld [vmem:[#allocation2 + $0x4e8] sm:$0xff] }
 0xee7   :  { %820 = vmatpush.msrb.mxu2 %v720_v33 }
 0xee8   :  { %v593_v35 = vadd.f32 %v4137_v31, %v592_v34 }
 0xeea   :  { %v597_v38 = vsel %vm596_vm3, %v4137_v31, %v593_v35 }
 0xeeb   :  { %v602_v41 = vsel %vm599_vm4, %v601_v39, %v597_v38 }
 0xeec   :  { %v605_v44 = vmul.f32 %v602_v41, %v552_v15  ;;  %v727_v15 = vld [vmem:[#allocation2 + $0x520] sm:$0xff] }
 0xeed   :  { %776 = vmatpush.msra.mxu3 %v727_v15  ;;  %v752_v15 = vld [vmem:[#allocation2 + $0x5e8] sm:$0xff] }
 0xeef   :  { %777 = vmatpush.msra.mxu3 %v725_v21  ;;  %v750_v21 = vld [vmem:[#allocation2 + $0x5d8] sm:$0xff] }
 0xef1   :  { %778 = vmatpush.msra.mxu3 %v723_v23 }
 0xef3   :  { %779 = vmatpush.msra.mxu3 %v721_v28 }
 0xef5   :  { %780 = vmatpush.msra.mxu3 %v719_v32 }
 0xf49   :  { %v608_v40 = vpop.permute.xlu1 %607 }
 0xf4a   :  { %v610_v42 = vmul.f32 %v608_v40, %v602_v41  ;;  %v717_v40 = vld [vmem:[#allocation2 + $0x4d0] sm:$0xff] }
 0xf4b   :  { %781 = vmatpush.msra.mxu3 %v717_v40  ;;  %v741_v40 = vld [vmem:[#allocation2 + $0x590] sm:$0xff] }
 0xf4c   :  { %612 = vrot.lane.b32.xlu2 %v610_v42, %s4292_s18  ;;  %v715_v42 = vld [vmem:[#allocation2 + $0x4c0] sm:$0xff] }
 0xf4d   :  { %782 = vmatpush.msra.mxu3 %v715_v42  ;;  %v739_v42 = vld [vmem:[#allocation2 + $0x580] sm:$0xff] }
 0xf54   :  { %85 = vperm.xlu2 %4016, %v80_v43   ;;  %v716_v43 = vld [vmem:[#allocation2 + $0x4c8] sm:$0xff] }
 0xfa6   :  { %v613_v45 = vpop.permute.xlu2 %612 }
 0xfa7   :  { %v4452_v46 = vadd.f32 %v613_v45, %v605_v44  ;;  %v713_v44 = vld [vmem:[#allocation2 + $0x4b0] sm:$0xff]  ;;  %v714_v45 = vld [vmem:[#allocation2 + $0x4b8] sm:$0xff] }
 0xfa8   :  { %783 = vmatpush.msra.mxu3 %v713_v44 }
 0xfa9   :  { %4138 = vtanh.f32 %v4452_v46 }
 0xfae   :  { %v86_v47 = vpop.permute.xlu2 %85 }
 0xfaf   :  { %v4139_v48 = vpop.eup %4138  ;;  %vm101_vm6 = vcmp.eq.s32.totalorder %v86_v47, %v4369_v25  ;;  %v711_v47 = vld [vmem:[#allocation2 + $0x4a0] sm:$0xff] }
 0xfb0   :  { %3908 = vmatmul.msk.f32.gmra.mxu0 %vm101_vm6, %v5760_v27  ;;  %618 = vrot.lane.b32.xlu0 %v4139_v48, %s4291_s17  ;;  %v712_v48 = vld [vmem:[#allocation2 + $0x4a8] sm:$0xff] }
 0xfb1   :  { %784 = vmatpush.msra.mxu3 %v711_v47 }
0x1022   :  { %v619_v53 = vpop.permute.xlu0 %618 }
0x1023   :  { %v4458_v55 = vmul.f32 %v619_v53, %v602_v41  ;;  %v718_v41 = vld [vmem:[#allocation2 + $0x4d8] sm:$0xff]  ;;  %v709_v53 = vld [vmem:[#allocation2 + $0x490] sm:$0xff] }
0x1024   :  { %821 = vmatpush.msrb.mxu2 %v718_v41  ;;  %785 = vmatpush.msra.mxu3 %v709_v53  ;;  %v742_v41 = vld [vmem:[#allocation2 + $0x598] sm:$0xff] }
0x1025   :  { %5882 = vst [vmem:[#allocation11_spill] sm:$0xff] %v4458_v55  ;;  %623 = vrot.lane.b32.xlu1 %v4458_v55, %s4292_s18  ;;  %v4023_v39 = vpack.i.bf16 %v4458_v55, %v4408_v50 }
0x1026   :  { %822 = vmatpush.msrb.mxu2 %v716_v43  ;;  %v740_v43 = vld [vmem:[#allocation2 + $0x588] sm:$0xff] }
0x1028   :  { %823 = vmatpush.msrb.mxu2 %v714_v45 }
0x102a   :  { %824 = vmatpush.msrb.mxu2 %v712_v48 }
0x102d   :  { %v175_v56 = vpop.f32.mrf.mxu0 }
0x1097   :  { %v624_v2 = vpop.permute.xlu1 %623 }
0x1098   :  { %3922 = vmatmul.msk.f32.vlgmr.msra.gmra.mxu2 %vm182_vm5, %v624_v2  ;;  %v710_v2 = vld [vmem:[#allocation2 + $0x498] sm:$0xff] }
0x1099   :  { %825 = vmatpush.msrb.mxu2 %v710_v2 }
0x111b   :  { %v644_v57 = vpop.f32.mrf.mxu2 }
0x111c   :  { %v647_v58 = vadd.f32 %v644_v57, %v175_v56  ;;  %v707_v56 = vld [vmem:[#allocation2 + $0x480] sm:$0xff]  ;;  %v708_v57 = vld [vmem:[#allocation2 + $0x488] sm:$0xff] }
0x111d   :  { %786 = vmatpush.msra.mxu3 %v707_v56  ;;  %826 = vmatpush.msrb.mxu2 %v708_v57  ;;  %v4494_v56 = vld [vmem:[#allocation2 + $0x370] sm:$0xff] }
0x111e   :  { %4140 = vtanh.f32 %v647_v58  ;;  %v3923_v61 = vmul.f32 -1.442695, %v647_v58  ;;  %v769_v58 = vld [vmem:[#allocation2 + $0x670] sm:$0xff] }
0x111f   :  { %791 = vmatpush.msrb.mxu1 %v769_v58  ;;  %v4496_v57 = vld [vmem:[#allocation2 + $0x470] sm:$0xff]  ;;  %v4498_v58 = vld [vmem:[#allocation2 + $0x360] sm:$0xff] }
0x1120   :  { %4142 = vpow2.f32 %v3923_v61  ;;  %v768_v61 = vld [vmem:[#allocation2 + $0x668] sm:$0xff]  ;;  %932 = vmatpush.msra.mxu2 %v4496_v57 }
0x1124   :  { %v4141_v59 = vpop.eup %4140 }
0x1125   :  { %670 = vrot.lane.b32.xlu0 %v4141_v59, %s4291_s17  ;;  %v770_v59 = vld [vmem:[#allocation2 + $0x678] sm:$0xff] }
0x1126   :  { %v4143_v62 = vpop.eup %4142  ;;  %831 = vmatpush.msrb.mxu3 %v770_v59  ;;  %v4506_v59 = vld [vmem:[#allocation2 + $0x450] sm:$0xff] }
0x1127   :  { %v651_v63 = vadd.f32 1.0, %v4143_v62  ;;  %v765_v62 = vld [vmem:[#allocation2 + $0x650] sm:$0xff] }
0x1128   :  { %832 = vmatpush.msrb.mxu3 %v768_v61  ;;  %v4512_v61 = vld [vmem:[#allocation2 + $0x440] sm:$0xff] }
0x1129   :  { %4144 = vrcp.f32 %v651_v63  ;;  %v663_v30 = vand.u32 2147483648, %v651_v63  ;;  %vm657_vm8 = vweird.f32 %v651_v63  ;;  %v661_v31 = vand.u32 2147483647, %v651_v63 }
0x112b   :  { %v664_v35 = vor.u32 1.1754944e-38, %v663_v30  ;;  %vm662_vm10 = vcmp.eq.f32.partialorder %v661_v31, 8.507059e+37  ;;  %v746_v30 = vld [vmem:[#allocation2 + $0x5b8] sm:$0xff]  ;;  %v743_v31 = vld [vmem:[#allocation2 + $0x5a0] sm:$0xff] }
0x112d   :  { %4019 = vrot.lane.b32.xlu0 %v4018_v60, %s4291_s17  ;;  %v767_v60 = vld [vmem:[#allocation2 + $0x660] sm:$0xff] }
0x112e   :  { %792 = vmatpush.msrb.mxu1 %v767_v60  ;;  %v4510_v60 = vld [vmem:[#allocation2 + $0x340] sm:$0xff] }
0x112f   :  { %v4145_v0 = vpop.eup %4144 }
0x1130   :  { %v653_v7 = vmul.f32 %v4145_v0, %v651_v63  ;;  %vm658_vm7 = vweird.f32 %v4145_v0  ;;  %v766_v63 = vld [vmem:[#allocation2 + $0x658] sm:$0xff]  ;;  %793 = vmatpush.msrb.mxu1 %v765_v62 }
0x1131   :  { %vm659_vm9 = vmor %vm657_vm8, %vm658_vm7  ;;  %833 = vmatpush.msrb.mxu3 %v766_v63  ;;  %v4518_v62 = vld [vmem:[#allocation2 + $0x478] sm:$0xff]  ;;  %v4520_v63 = vld [vmem:[#allocation2 + $0x468] sm:$0xff] }
0x1132   :  { %v654_v12 = vsub.f32 1.0, %v653_v7  ;;  %v760_v7 = vld [vmem:[#allocation2 + $0x628] sm:$0xff] }
0x1133   :  { %834 = vmatpush.msrb.mxu3 %v764_v3  ;;  %v4526_v3 = vld [vmem:[#allocation2 + $0x448] sm:$0xff] }
0x1134   :  { %v655_v17 = vmul.f32 %v4145_v0, %v654_v12  ;;  %v753_v12 = vld [vmem:[#allocation2 + $0x5f0] sm:$0xff] }
0x1135   :  { %835 = vmatpush.msrb.mxu3 %v762_v5  ;;  %v4533_v5 = vld [vmem:[#allocation2 + $0x770] sm:$0xff] }
0x1136   :  { %v656_v26 = vadd.f32 %v4145_v0, %v655_v17  ;;  %v749_v17 = vld [vmem:[#allocation2 + $0x5d0] sm:$0xff]  ;;  %996 = vmatpush.msrb.mxu0 %v4533_v5 }
0x1137   :  { %836 = vmatpush.msrb.mxu3 %v760_v7  ;;  %v4538_v7 = vld [vmem:[#allocation2 + $0x750] sm:$0xff] }
0x1138   :  { %v660_v34 = vsel %vm659_vm9, %v4145_v0, %v656_v26  ;;  %v763_v0 = vld [vmem:[#allocation2 + $0x640] sm:$0xff]  ;;  %v748_v26 = vld [vmem:[#allocation2 + $0x5c8] sm:$0xff] }
0x1139   :  { %v4467_v37 = vsel %vm662_vm10, %v664_v35, %v660_v34  ;;  %794 = vmatpush.msrb.mxu1 %v763_v0  ;;  %837 = vmatpush.msrb.mxu3 %v758_v9  ;;  %v4523_v0 = vld [vmem:[#allocation2 + $0x458] sm:$0xff]  ;;  %v4544_v9 = vld [vmem:[#allocation2 + $0x860] sm:$0xff] }
0x113a   :  { %v668_v16 = vmul.f32 %v4467_v37, %v4452_v46  ;;  %v744_v46 = vld [vmem:[#allocation2 + $0x5a8] sm:$0xff] }
0x113b   :  { %795 = vmatpush.msrb.mxu1 %v761_v4  ;;  %838 = vmatpush.msrb.mxu3 %v756_v11  ;;  %v4548_v11 = vld [vmem:[#allocation2 + $0x850] sm:$0xff] }
0x113d   :  { %796 = vmatpush.msrb.mxu1 %v759_v6  ;;  %839 = vmatpush.msrb.mxu3 %v754_v13  ;;  %v4535_v6 = vld [vmem:[#allocation2 + $0x760] sm:$0xff] }
0x113e   :  { %997 = vmatpush.msrb.mxu0 %v4535_v6  ;;  %v4554_v13 = vld [vmem:[#allocation2 + $0x840] sm:$0xff] }
0x113f   :  { %797 = vmatpush.msrb.mxu1 %v757_v8  ;;  %840 = vmatpush.msrb.mxu3 %v752_v15  ;;  %v4540_v8 = vld [vmem:[#allocation2 + $0x870] sm:$0xff] }
0x1140   :  { %998 = vmatpush.msrb.mxu0 %v4538_v7  ;;  %v4560_v15 = vld [vmem:[#allocation2 + $0x830] sm:$0xff] }
0x1141   :  { %798 = vmatpush.msrb.mxu1 %v755_v10  ;;  %841 = vmatpush.msrb.mxu3 %v750_v21  ;;  %v4546_v10 = vld [vmem:[#allocation2 + $0x740] sm:$0xff] }
0x1142   :  { %999 = vmatpush.msrb.mxu0 %v4546_v10  ;;  %v4570_v21 = vld [vmem:[#allocation2 + $0x700] sm:$0xff] }
0x1143   :  { %799 = vmatpush.msrb.mxu1 %v753_v12  ;;  %842 = vmatpush.msrb.mxu3 %v748_v26  ;;  %v4552_v12 = vld [vmem:[#allocation2 + $0x730] sm:$0xff]  ;;  %v4580_v26 = vld [vmem:[#allocation2 + $0x6e0] sm:$0xff] }
0x1144   :  { %1000 = vmatpush.msrb.mxu0 %v4552_v12  ;;  %5884 = vst [vmem:[#allocation13_spill] sm:$0xff] %v4580_v26 }
0x1145   :  { %800 = vmatpush.msrb.mxu1 %v751_v14  ;;  %843 = vmatpush.msrb.mxu3 %v746_v30  ;;  %v4558_v14 = vld [vmem:[#allocation2 + $0x720] sm:$0xff]  ;;  %v4588_v30 = vld [vmem:[#allocation2 + $0x7f0] sm:$0xff] }
0x1146   :  { %1001 = vmatpush.msrb.mxu0 %v4558_v14 }
0x1147   :  { %801 = vmatpush.msrb.mxu1 %v749_v17  ;;  %844 = vmatpush.msrb.mxu3 %v744_v46  ;;  %v4566_v17 = vld [vmem:[#allocation2 + $0x820] sm:$0xff] }
0x1148   :  { %v4594_v46 = vld [vmem:[#allocation2 + $0x7e0] sm:$0xff] }
0x1149   :  { %802 = vmatpush.msrb.mxu1 %v747_v24  ;;  %845 = vmatpush.msrb.mxu3 %v742_v41  ;;  %v4576_v24 = vld [vmem:[#allocation2 + $0x6f0] sm:$0xff]  ;;  %5887 = vst [vmem:[#allocation16_spill] sm:$0xff] %v4594_v46 }
0x114a   :  { %v4620_v41 = vld [vmem:[#allocation2 + $0x790] sm:$0xff] }
0x114b   :  { %803 = vmatpush.msrb.mxu1 %v745_v29  ;;  %846 = vmatpush.msrb.mxu3 %v740_v43  ;;  %v4586_v29 = vld [vmem:[#allocation2 + $0x800] sm:$0xff]  ;;  %5896 = vst [vmem:[#allocation25_spill] sm:$0xff] %v4620_v41 }
0x114d   :  { %804 = vmatpush.msrb.mxu1 %v743_v31  ;;  %v4592_v31 = vld [vmem:[#allocation2 + $0x6c0] sm:$0xff] }
0x114e   :  { %5886 = vst [vmem:[#allocation15_spill] sm:$0xff] %v4592_v31 }
0x114f   :  { %805 = vmatpush.msrb.mxu1 %v741_v40  ;;  %v4618_v40 = vld [vmem:[#allocation2 + $0x680] sm:$0xff] }
0x1150   :  { %5895 = vst [vmem:[#allocation24_spill] sm:$0xff] %v4618_v40 }
0x1151   :  { %806 = vmatpush.msrb.mxu1 %v739_v42  ;;  %v4626_v42 = vld [vmem:[#allocation2 + $0x780] sm:$0xff] }
0x1152   :  { %5897 = vst [vmem:[#allocation26_spill] sm:$0xff] %v4626_v42 }
0x1153   :  { %904 = vmatpush.msra.mxu1 %v4494_v56 }
0x1155   :  { %905 = vmatpush.msra.mxu1 %v4498_v58 }
0x1197   :  { %v671_v36 = vpop.permute.xlu0 %670 }
0x1198   :  { %v673_v38 = vmul.f32 %v671_v36, %v4467_v37 }
0x119a   :  { %675 = vrot.lane.b32.xlu1 %v673_v38, %s4292_s18 }
0x119f   :  { %v4020_v28 = vpop.permute.xlu0 %4019 }
0x11a0   :  { %v4021_v32 = vunpack.i.l.bf16 %v4020_v28  ;;  %v4022_v44 = vunpack.i.h.bf16 %v4020_v28  ;;  %v4584_v28 = vld [vmem:[#allocation2 + $0x6d0] sm:$0xff] }
0x11a1   :  { %5885 = vst [vmem:[#allocation14_spill] sm:$0xff] %v4584_v28 }
0x11a2   :  { %4024 = vrot.lane.b32.xlu1 %v4023_v39, %s4293_s19  ;;  %v699_v36 = vsel %vm182_vm5, %v4381_v54, %v4021_v32  ;;  %v704_v47 = vsel %vm182_vm5, %v4434_v51, %v4022_v44  ;;  %v4502_v51 = vld [vmem:[#allocation2 + $0x460] sm:$0xff]  ;;  %v4599_v32 = vld [vmem:[#allocation2 + $0x7d0] sm:$0xff] }
0x11a3   :  { %933 = vmatpush.msra.mxu2 %v4502_v51  ;;  %5888 = vst [vmem:[#allocation17_spill] sm:$0xff] %v4599_v32 }
0x11a5   :  { %934 = vmatpush.msra.mxu2 %v4506_v59 }
0x11a7   :  { %935 = vmatpush.msra.mxu2 %v4512_v61 }
0x120c   :  { %v676_v22 = vpop.permute.xlu1 %675 }
0x120d   :  { %v4475_v23 = vadd.f32 %v676_v22, %v668_v16  ;;  %v4564_v16 = vld [vmem:[#allocation2 + $0x710] sm:$0xff] }
0x120e   :  { %v4572_v22 = vld [vmem:[#allocation2 + $0x810] sm:$0xff]  ;;  %1002 = vmatpush.msrb.mxu0 %v4564_v16 }
0x120f   :  { %4146 = vtanh.f32 %v4475_v23 }
0x1210   :  { %1003 = vmatpush.msrb.mxu0 %v4570_v21 }
0x1212   :  { %1004 = vmatpush.msrb.mxu0 %v4576_v24 }
0x1214   :  { %v4025_v33 = vpop.permute.xlu1 %4024  ;;  %1005 = vmatpush.msrb.mxu0 %v4580_v26  ;;  %v4713_v26 = vld [vmem:[#allocation2 + $0x410] sm:$0xff] }
0x1215   :  { %v4147_v34 = vpop.eup %4146  ;;  %v4026_v35 = vunpack.i.l.bf16 %v4025_v33  ;;  %v4027_v45 = vunpack.i.h.bf16 %v4025_v33  ;;  %v4602_v33 = vld [vmem:[#allocation2 + $0x6b0] sm:$0xff] }
0x1216   :  { %681 = vrot.lane.b32.xlu2 %v4147_v34, %s4291_s17  ;;  %1006 = vmatpush.msrb.mxu0 %v4584_v28  ;;  %5889 = vst [vmem:[#allocation18_spill] sm:$0xff] %v4602_v33  ;;  %v4604_v34 = vld [vmem:[#allocation2 + $0x7c0] sm:$0xff] }
0x1217   :  { %v701_v38 = vsel %vm700_vm11, %v699_v36, %v4026_v35  ;;  %v705_v53 = vsel %vm700_vm11, %v704_v47, %v4027_v45  ;;  %5890 = vst [vmem:[#allocation19_spill] sm:$0xff] %v4604_v34  ;;  %v4608_v35 = vld [vmem:[#allocation2 + $0x6a0] sm:$0xff]  ;;  %v4610_v36 = vld [vmem:[#allocation2 + $0x7b0] sm:$0xff] }
0x1218   :  { %v703_v39 = vsel %vm702_vm12, %v701_v38, %v4419_v18  ;;  %1007 = vmatpush.msrb.mxu0 %v4592_v31  ;;  %5891 = vst [vmem:[#allocation20_spill] sm:$0xff] %v4608_v35  ;;  %v4614_v38 = vld [vmem:[#allocation2 + $0x690] sm:$0xff] }
0x1219   :  { %787 = vmatmul.f32.vlgmr.msra.gmra.mxu3 %v703_v39  ;;  %827 = vmatmul.f32.vlgmr.msrb.gmra.mxu2 %v703_v39  ;;  %5892 = vst [vmem:[#allocation21_spill] sm:$0xff] %v4610_v36  ;;  %v4616_v39 = vld [vmem:[#allocation2 + $0x7a0] sm:$0xff]  ;;  %v4705_v31 = vld [vmem:[#allocation2 + $0x430] sm:$0xff] }
0x121a   :  { %1016 = vmatpush.msrb.mxu2 %v4540_v8  ;;  %1008 = vmatpush.msrb.mxu0 %v4602_v33  ;;  %5893 = vst [vmem:[#allocation22_spill] sm:$0xff] %v4614_v38 }
0x121b   :  { %5894 = vst [vmem:[#allocation23_spill] sm:$0xff] %v4616_v39 }
0x121c   :  { %1017 = vmatpush.msrb.mxu2 %v4544_v9  ;;  %1009 = vmatpush.msrb.mxu0 %v4608_v35  ;;  %v1110_v35 = vld [vmem:[#allocation2 + $0x390] sm:$0xff] }
0x121e   :  { %1018 = vmatpush.msrb.mxu2 %v4548_v11  ;;  %1010 = vmatpush.msrb.mxu0 %v4614_v38  ;;  %v1112_v38 = vld [vmem:[#allocation2 + $0x3b0] sm:$0xff] }
0x1220   :  { %1019 = vmatpush.msrb.mxu2 %v4554_v13  ;;  %1011 = vmatpush.msrb.mxu0 %v4618_v40 }
0x1222   :  { %1020 = vmatpush.msrb.mxu2 %v4560_v15 }
0x1224   :  { %1021 = vmatpush.msrb.mxu2 %v4566_v17 }
0x1226   :  { %1022 = vmatpush.msrb.mxu2 %v4572_v22 }
0x1228   :  { %1023 = vmatpush.msrb.mxu2 %v4586_v29 }
0x122a   :  { %1024 = vmatpush.msrb.mxu2 %v4588_v30 }
0x122c   :  { %1025 = vmatpush.msrb.mxu2 %v4594_v46  ;;  %v4709_v46 = vld [vmem:[#allocation2 + $0x420] sm:$0xff] }
0x122e   :  { %1026 = vmatpush.msrb.mxu2 %v4599_v32 }
0x1230   :  { %1027 = vmatpush.msrb.mxu2 %v4604_v34 }
0x1232   :  { %1028 = vmatpush.msrb.mxu2 %v4610_v36  ;;  %v1109_v36 = vld [vmem:[#allocation2 + $0x380] sm:$0xff] }
0x1234   :  { %1029 = vmatpush.msrb.mxu2 %v4616_v39  ;;  %v1111_v39 = vld [vmem:[#allocation2 + $0x3a0] sm:$0xff] }
0x1236   :  { %1030 = vmatpush.msrb.mxu2 %v4620_v41  ;;  %v851_v41 = vld [vmem:[#allocation2 + $0x100] sm:$0xff] }
0x1238   :  { %1031 = vmatpush.msrb.mxu2 %v4626_v42  ;;  %v852_v42 = vld [vmem:[#allocation2 + $0x110] sm:$0xff] }
0x1270   :  { %v682_v54 = vpop.permute.xlu2 %681 }
0x1271   :  { %v4487_v48 = vmul.f32 %v682_v54, %v4467_v37  ;;  %v4504_v37 = vld [vmem:[#allocation2 + $0x350] sm:$0xff] }
0x1272   :  { %906 = vmatpush.msra.mxu1 %v4504_v37 }
0x1273   :  { %5883 = vst [vmem:[#allocation12_spill] sm:$0xff] %v4487_v48  ;;  %888 = vrot.lane.b32.xlu2 %v4487_v48, %s4292_s18  ;;  %v706_v2 = vsel %vm702_vm12, %v705_v53, %v4487_v48 }
0x1274   :  { %807 = vmatmul.f32.vlgmr.msrb.gmra.mxu1 %v706_v2  ;;  %847 = vmatmul.f32.vlgmr.msrb.gmra.mxu3 %v706_v2 }
0x1275   :  { %907 = vmatpush.msra.mxu1 %v4510_v60 }
0x1277   :  { %952 = vmatpush.msrb.mxu1 %v4518_v62 }
0x1279   :  { %953 = vmatpush.msrb.mxu1 %v4520_v63 }
0x127b   :  { %954 = vmatpush.msrb.mxu1 %v4523_v0 }
0x127d   :  { %955 = vmatpush.msrb.mxu1 %v4526_v3 }
0x129c   :  { %v788_v44 = vpop.f32.mrf.mxu3  ;;  %v828_v45 = vpop.f32.mrf.mxu2 }
0x12cd   :  { %v889_v4 = vpop.permute.xlu2 %888 }
0x12ce   :  { %3924 = vmatmul.msk.f32.vlgmr.msra.gmra.mxu1 %vm182_vm5, %v889_v4  ;;  %3925 = vmatmul.msk.f32.vlgmr.msra.gmra.mxu2 %vm182_vm5, %v889_v4 }
0x12cf   :  { %1340 = vmatpush.msra.mxu2 %v4494_v56  ;;  %1130 = vmatpush.msra.mxu1 %v1112_v38 }
0x12d1   :  { %1341 = vmatpush.msra.mxu2 %v4498_v58  ;;  %1131 = vmatpush.msra.mxu1 %v1111_v39 }
0x12d3   :  { %1342 = vmatpush.msra.mxu2 %v4504_v37  ;;  %1132 = vmatpush.msra.mxu1 %v1110_v35 }
0x12d5   :  { %1343 = vmatpush.msra.mxu2 %v4510_v60  ;;  %1133 = vmatpush.msra.mxu1 %v1109_v36 }
0x12d6   :  { %3926 = vmatmul.msk.f32.vlgmr.msrb.gmra.mxu1 %vm182_vm5, %v889_v4 }
0x12d7   :  { %1154 = vmatpush.msrb.mxu1 %v4705_v31 }
0x12d9   :  { %1155 = vmatpush.msrb.mxu1 %v4709_v46 }
0x12db   :  { %1156 = vmatpush.msrb.mxu1 %v4713_v26 }
0x12f1   :  { %v808_v43 = vpop.f32.mrf.mxu1 }
0x12f2   :  { %v4635_v53 = vadd.f32 %v808_v43, %v788_v44 }
0x12f4   :  { %5898 = vst [vmem:[#allocation27_spill] sm:$0xff] %v4635_v53 }
0x12f7   :  { %v848_v47 = vpop.f32.mrf.mxu3 }
0x12f8   :  { %v4637_v4 = vadd.f32 %v848_v47, %v828_v45 }
0x12fa   :  { %5899 = vst [vmem:[#allocation28_spill] sm:$0xff] %v4637_v4 }
0x134b   :  { %v4633_v54 = vpop.f32.mrf.mxu1 }
0x1351   :  { %v937_v2 = vpop.f32.mrf.mxu2 }
0x1352   :  { %v960_v27 = vadd.f32 %v937_v2, %v4635_v53  ;;  %v4700_v53 = vld [vmem:[#allocation2 + $0x120] sm:$0xff] }
0x1353   :  { %v957_v56 = vpop.f32.mrf.mxu1 }
0x1354   :  { %4148 = vtanh.f32 %v960_v27  ;;  %v961_v58 = vadd.f32 %v957_v56, %v4637_v4  ;;  %v5772_v4 = vmov 1  }
0x1356   :  { %4150 = vtanh.f32 %v961_v58 }
0x135a   :  { %v4149_v37 = vpop.eup %4148 }
0x135b   :  { %1012 = vmatmul.f32.vlgmr.msrb.gmra.mxu0 %v4149_v37 }
0x135c   :  { %v4151_v60 = vpop.eup %4150 }
0x135d   :  { %1032 = vmatmul.f32.vlgmr.msrb.gmra.mxu2 %v4151_v60 }
0x135e   :  { %1388 = vmatpush.msrb.mxu2 %v4518_v62 }
0x1360   :  { %1389 = vmatpush.msrb.mxu2 %v4520_v63  ;;  %v5762_v63 = vmov 6  }
0x1361   :  { %4034 = vset.pattern.permute.xlu0 %v5762_v63 }
0x1362   :  { %1390 = vmatpush.msrb.mxu2 %v4523_v0  ;;  %v5764_v0 = vmov 7  }
0x1363   :  { %4035 = vset.pattern.permute.xlu1 %v5764_v0 }
0x1364   :  { %1391 = vmatpush.msrb.mxu2 %v4526_v3  ;;  %v5766_v3 = vmov 0  }
0x1365   :  { %4028 = vset.pattern.permute.xlu2 %v5766_v3  ;;  %v5770_v3 = vmov 2  }
0x13d8   :  { %v1013_v43 = vpop.f32.mrf.mxu0 }
0x13e0   :  { %v1033_v44 = vpop.f32.mrf.mxu2 }
0x13e1   :  { %v1034_v45 = vadd.f32 %v1033_v44, %v1013_v43 }
0x13e3   :  { %v1037_v27 = vsel %vm1036_vm13, %v1034_v45, -inf }
0x13e4   :  { %1038 = vmax.xlane.f32.xlu0 %v1037_v27 }
0x1457   :  { %v1039_v47 = vpop.xlane.xlu0 %1038 }
0x1458   :  { %v1040_v2 = vsub.f32 %v1034_v45, %v1039_v47 }
0x145a   :  { %v1041_v56 = vmul.f32 1.442695, %v1040_v2 }
0x145c   :  { %4152 = vpow2.f32 %v1041_v56 }
0x1462   :  { %v4153_v58 = vpop.eup %4152 }
0x1463   :  { %v1043_v62 = vsel %vm1036_vm13, %v4153_v58, 0.0 }
0x1464   :  { %1044 = vadd.xlane.f32.xlu1 %v1043_v62 }
0x14d7   :  { %v1045_v37 = vpop.xlane.xlu1 %1044 }
0x14d8   :  { %4154 = vrcp.f32 %v1045_v37  ;;  %v1057_v45 = vand.u32 2147483648, %v1045_v37  ;;  %v1055_v47 = vand.u32 2147483647, %v1045_v37  ;;  %vm1051_vm15 = vweird.f32 %v1045_v37 }
0x14da   :  { %v1058_v56 = vor.u32 1.1754944e-38, %v1057_v45  ;;  %vm1056_vm1 = vcmp.eq.f32.partialorder %v1055_v47, 8.507059e+37  ;;  %v4664_v45 = vld [vmem:[#allocation2 + $0x1e0] sm:$0xff]  ;;  %v4667_v47 = vld [vmem:[#allocation2 + $0x1d0] sm:$0xff] }
0x14de   :  { %v4155_v60 = vpop.eup %4154 }
0x14df   :  { %v1047_v43 = vmul.f32 %v4155_v60, %v1045_v37  ;;  %vm1052_vm14 = vweird.f32 %v4155_v60  ;;  %v5778_v37 = vmov 3  }
0x14e0   :  { %vm1053_vm0 = vmor %vm1051_vm15, %vm1052_vm14 }
0x14e1   :  { %v1048_v44 = vsub.f32 1.0, %v1047_v43  ;;  %v5900_v43 = vmov 0  }
0x14e3   :  { %v1049_v27 = vmul.f32 %v4155_v60, %v1048_v44  ;;  %v4662_v44 = vld [vmem:[#allocation2 + $0x1f0] sm:$0xff] }
0x14e4   :  { %1162 = vmatpush.msra.mxu3 %v4662_v44 }
0x14e5   :  { %v1050_v2 = vadd.f32 %v4155_v60, %v1049_v27 }
0x14e6   :  { %1163 = vmatpush.msra.mxu3 %v4664_v45 }
0x14e7   :  { %v1054_v62 = vsel %vm1053_vm0, %v4155_v60, %v1050_v2  ;;  %v4083_v60 = vld [vmem:[%s5757_s0 + $0x8] ss:$0 sm:$0xff]  ;;  %v4676_v2 = vld [vmem:[#allocation2 + $0x1a0] sm:$0xff] }
0x14e8   :  { %v1059_v63 = vsel %vm1056_vm1, %v1058_v56, %v1054_v62  ;;  %1164 = vmatpush.msra.mxu3 %v4667_v47  ;;  %v4679_v62 = vld [vmem:[#allocation2 + $0x190] sm:$0xff] }
0x14e9   :  { %v1060_v0 = vmul.f32 %v4153_v58, %v1059_v63  ;;  %v5776_v58 = vmov 4   ;;  %v5774_v63 = vmov 5  }
0x14eb   :  { %1104 = vperm.xlu1 %4035, %v1060_v0   ;;  %1098 = vperm.xlu0 %4034, %v1060_v0  }
0x14ec   :  { %1063 = vperm.xlu2 %4028, %v1060_v0  }
0x14f3   :  { %4039 = vset.pattern.permute.xlu1 %v5770_v3  ;;  %4038 = vset.pattern.permute.xlu0 %v5772_v4 }
0x14f4   :  { %4029 = vset.pattern.permute.xlu2 %v5772_v4  ;;  %v4689_v4 = vld [vmem:[#allocation2 + $0x160] sm:$0xff] }
0x14f5   :  { %1068 = vperm.xlu2 %4029, %v1060_v0  }
0x14fd   :  { %4030 = vset.pattern.permute.xlu2 %v5770_v3  ;;  %v4686_v3 = vld [vmem:[#allocation2 + $0x170] sm:$0xff] }
0x14fe   :  { %1074 = vperm.xlu2 %4030, %v1060_v0  }
0x1506   :  { %4031 = vset.pattern.permute.xlu2 %v5778_v37  ;;  %v4694_v37 = vld [vmem:[#allocation2 + $0x140] sm:$0xff] }
0x1507   :  { %1080 = vperm.xlu2 %4031, %v1060_v0  }
0x150f   :  { %4032 = vset.pattern.permute.xlu2 %v5776_v58  ;;  %v4692_v58 = vld [vmem:[#allocation2 + $0x150] sm:$0xff] }
0x1510   :  { %1086 = vperm.xlu2 %4032, %v1060_v0  }
0x1518   :  { %4033 = vset.pattern.permute.xlu2 %v5774_v63 }
0x1519   :  { %1092 = vperm.xlu2 %4033, %v1060_v0   ;;  %v4674_v0 = vld [vmem:[#allocation2 + $0x1b0] sm:$0xff] }
0x1521   :  { %4036 = vset.pattern.permute.xlu2 %v4321_v1  ;;  %v4671_v1 = vld [vmem:[#allocation2 + $0x1c0] sm:$0xff] }
0x1522   :  { %1165 = vmatpush.msra.mxu3 %v4671_v1 }
0x1524   :  { %1166 = vmatpush.msra.mxu3 %v4674_v0 }
0x1526   :  { %1167 = vmatpush.msra.mxu3 %v4676_v2 }
0x1528   :  { %1168 = vmatpush.msra.mxu3 %v4679_v62 }
0x1529   :  { %92 = vperm.xlu2 %4036, %v4083_v60   ;;  %v4683_v60 = vld [vmem:[#allocation2 + $0x180] sm:$0xff] }
0x152a   :  { %1169 = vmatpush.msra.mxu3 %v4683_v60 }
0x152c   :  { %1170 = vmatpush.msra.mxu3 %v4686_v3 }
0x152e   :  { %1171 = vmatpush.msra.mxu3 %v4689_v4 }
0x1530   :  { %1172 = vmatpush.msra.mxu3 %v4692_v58 }
0x1531   :  { %4037 = vset.pattern.permute.xlu2 %v5900_v43  ;;  %v4698_v43 = vld [vmem:[#allocation2 + $0x130] sm:$0xff] }
0x1532   :  { %1173 = vmatpush.msra.mxu3 %v4694_v37 }
0x1534   :  { %1174 = vmatpush.msra.mxu3 %v4698_v43 }
0x1536   :  { %1175 = vmatpush.msra.mxu3 %v4700_v53 }
0x1538   :  { %1176 = vmatpush.msra.mxu3 %v852_v42 }
0x153a   :  { %1177 = vmatpush.msra.mxu3 %v851_v41 }
0x153c   :  { %1565 = vmatpush.msrb.mxu3 %v1112_v38 }
0x153e   :  { %1566 = vmatpush.msrb.mxu3 %v1111_v39 }
0x1540   :  { %1567 = vmatpush.msrb.mxu3 %v1110_v35 }
0x1542   :  { %1568 = vmatpush.msrb.mxu3 %v1109_v36 }
0x1546   :  { %v1064_v27 = vpop.permute.xlu2 %1063 }
0x1547   :  { %v1066_v32 = vmul.f32 %v1064_v27, %v4376_v52 }
0x154f   :  { %v1069_v56 = vpop.permute.xlu2 %1068 }
0x1550   :  { %v1071_v33 = vmul.f32 %v1069_v56, %v4395_v19  ;;  %v4717_v19 = vld [vmem:[#allocation2 + $0x400] sm:$0xff] }
0x1551   :  { %1157 = vmatpush.msrb.mxu1 %v4717_v19 }
0x1552   :  { %v1072_v38 = vadd.f32 %v1071_v33, %v1066_v32 }
0x1558   :  { %v1075_v63 = vpop.permute.xlu2 %1074 }
0x1559   :  { %v1077_v28 = vmul.f32 %v1075_v63, %v4408_v50 }
0x155b   :  { %v1078_v56 = vadd.f32 %v1077_v28, %v1072_v38 }
0x155d   :  { %v1099_v27 = vpop.permute.xlu0 %1098  ;;  %v1105_v33 = vpop.permute.xlu1 %1104 }
0x155e   :  { %v1107_v28 = vmul.f32 %v1105_v33, %v4487_v48 }
0x1561   :  { %v1081_v40 = vpop.permute.xlu2 %1080 }
0x1562   :  { %v1083_v39 = vmul.f32 %v1081_v40, %v4419_v18  ;;  %v1101_v40 = vmul.f32 %v1099_v27, %v4458_v55 }
0x1564   :  { %v1084_v63 = vadd.f32 %v1083_v39, %v1078_v56  ;;  %v5901_v39 = vmov 1.0  }
0x156a   :  { %v1087_v34 = vpop.permute.xlu2 %1086 }
0x156b   :  { %v1089_v35 = vmul.f32 %v1087_v34, %v4430_v49 }
0x156d   :  { %v1090_v36 = vadd.f32 %v1089_v35, %v1084_v63 }
0x1573   :  { %v1093_v50 = vpop.permute.xlu2 %1092 }
0x1574   :  { %v1095_v32 = vmul.f32 %v1093_v50, %v4444_v20  ;;  %v882_v50 = vld [vmem:[#allocation2 + $0x2f0] sm:$0xff] }
0x1576   :  { %v1096_v18 = vadd.f32 %v1095_v32, %v1090_v36 }
0x1578   :  { %v1102_v38 = vadd.f32 %v1101_v40, %v1096_v18 }
0x157a   :  { %v1108_v34 = vadd.f32 %v1107_v28, %v1102_v38 }
0x157c   :  { %1114 = vrot.lane.b32.xlu2 %v1108_v34, %s4292_s18 }
0x1583   :  { %v93_v49 = vpop.permute.xlu2 %92 }
0x1584   :  { %vm102_vm2 = vcmp.eq.s32.totalorder %v93_v49, %v4369_v25 }
0x1585   :  { %3929 = vmatmul.msk.f32.vlgmr.msra.gmra.mxu3 %vm102_vm2, %v5901_v39 }
0x1586   :  { %1597 = vmatpush.msra.mxu3 %v4662_v44  ;;  %v881_v44 = vld [vmem:[#allocation2 + $0x2e0] sm:$0xff] }
0x1588   :  { %1598 = vmatpush.msra.mxu3 %v4664_v45  ;;  %v880_v45 = vld [vmem:[#allocation2 + $0x2d0] sm:$0xff] }
0x158a   :  { %1599 = vmatpush.msra.mxu3 %v4667_v47  ;;  %v871_v47 = vld [vmem:[#allocation2 + $0x240] sm:$0xff] }
0x158c   :  { %1600 = vmatpush.msra.mxu3 %v4671_v1  ;;  %v870_v1 = vld [vmem:[#allocation2 + $0x230] sm:$0xff] }
0x158e   :  { %1601 = vmatpush.msra.mxu3 %v4674_v0  ;;  %v869_v0 = vld [vmem:[#allocation2 + $0x220] sm:$0xff] }
0x1590   :  { %1602 = vmatpush.msra.mxu3 %v4676_v2  ;;  %v868_v2 = vld [vmem:[#allocation2 + $0x210] sm:$0xff] }
0x1592   :  { %1603 = vmatpush.msra.mxu3 %v4679_v62  ;;  %v867_v62 = vld [vmem:[#allocation2 + $0x200] sm:$0xff] }
0x1594   :  { %1604 = vmatpush.msra.mxu3 %v4683_v60 }
0x1596   :  { %1605 = vmatpush.msra.mxu3 %v4686_v3  ;;  %v879_v3 = vld [vmem:[#allocation2 + $0x2c0] sm:$0xff] }
0x1598   :  { %1606 = vmatpush.msra.mxu3 %v4689_v4  ;;  %v878_v4 = vld [vmem:[#allocation2 + $0x2b0] sm:$0xff] }
0x159a   :  { %1607 = vmatpush.msra.mxu3 %v4692_v58  ;;  %v876_v58 = vld [vmem:[#allocation2 + $0x290] sm:$0xff] }
0x159c   :  { %1608 = vmatpush.msra.mxu3 %v4694_v37  ;;  %v877_v37 = vld [vmem:[#allocation2 + $0x2a0] sm:$0xff] }
0x159e   :  { %1609 = vmatpush.msra.mxu3 %v4698_v43  ;;  %v872_v43 = vld [vmem:[#allocation2 + $0x250] sm:$0xff] }
0x15a0   :  { %1610 = vmatpush.msra.mxu3 %v4700_v53  ;;  %v873_v53 = vld [vmem:[#allocation2 + $0x260] sm:$0xff] }
0x15a2   :  { %1611 = vmatpush.msra.mxu3 %v852_v42  ;;  %v875_v42 = vld [vmem:[#allocation2 + $0x280] sm:$0xff] }
0x15a4   :  { %1612 = vmatpush.msra.mxu3 %v851_v41  ;;  %v874_v41 = vld [vmem:[#allocation2 + $0x270] sm:$0xff] }
0x15d6   :  { %v1115_v18 = vpop.permute.xlu2 %1114 }
0x15d7   :  { %3927 = vmatmul.msk.f32.vlgmr.msra.gmra.mxu1 %vm182_vm5, %v1115_v18 }
0x15d8   :  { %1220 = vmatpush.msra.mxu1 %v882_v50 }
0x15da   :  { %1221 = vmatpush.msra.mxu1 %v881_v44 }
0x15dc   :  { %1222 = vmatpush.msra.mxu1 %v880_v45 }
0x15de   :  { %1223 = vmatpush.msra.mxu1 %v879_v3 }
0x15df   :  { %3928 = vmatmul.msk.f32.vlgmr.msrb.gmra.mxu1 %vm182_vm5, %v1115_v18 }
0x15e0   :  { %1224 = vmatpush.msra.mxu1 %v878_v4 }
0x15e2   :  { %1225 = vmatpush.msra.mxu1 %v877_v37 }
0x15e4   :  { %1226 = vmatpush.msra.mxu1 %v876_v58 }
0x15e6   :  { %1227 = vmatpush.msra.mxu1 %v875_v42 }
0x15e8   :  { %1228 = vmatpush.msra.mxu1 %v874_v41 }
0x15ea   :  { %1229 = vmatpush.msra.mxu1 %v873_v53 }
0x15ec   :  { %1230 = vmatpush.msra.mxu1 %v872_v43 }
0x15ee   :  { %1231 = vmatpush.msra.mxu1 %v871_v47 }
0x15f0   :  { %1232 = vmatpush.msra.mxu1 %v870_v1 }
0x15f2   :  { %1233 = vmatpush.msra.mxu1 %v869_v0 }
0x15f4   :  { %1234 = vmatpush.msra.mxu1 %v868_v2 }
0x15f6   :  { %1235 = vmatpush.msra.mxu1 %v867_v62 }
0x15f7   :  { %3931 = vmatmul.msk.f32.vlgmr.msra.gmra.mxu1 %vm102_vm2, %v5901_v39 }
0x15f8   :  { %1589 = vmatpush.msrb.mxu1 %v4705_v31 }
0x15fa   :  { %1590 = vmatpush.msrb.mxu1 %v4709_v46 }
0x15fc   :  { %1591 = vmatpush.msrb.mxu1 %v4713_v26 }
0x15fe   :  { %1592 = vmatpush.msrb.mxu1 %v4717_v19 }
0x1600   :  { %1655 = vmatpush.msra.mxu1 %v882_v50 }
0x1602   :  { %1656 = vmatpush.msra.mxu1 %v881_v44 }
0x1604   :  { %1657 = vmatpush.msra.mxu1 %v880_v45 }
0x1606   :  { %1658 = vmatpush.msra.mxu1 %v879_v3 }
0x1608   :  { %1659 = vmatpush.msra.mxu1 %v878_v4  ;;  %v1179_v49 = vpop.f32.mrf.mxu3 }
0x1609   :  { %v1180_v26 = vadd.f32 %v1179_v49, %v4633_v54 }
0x160a   :  { %1660 = vmatpush.msra.mxu1 %v877_v37  ;;  %v1243_v37 = vld [vmem:[#allocation2 + $0x3f0] sm:$0xff] }
0x160b   :  { %1261 = vmatpush.msra.mxu0 %v1243_v37 }
0x160c   :  { %1661 = vmatpush.msra.mxu1 %v876_v58  ;;  %v1242_v58 = vld [vmem:[#allocation2 + $0x3e0] sm:$0xff] }
0x160d   :  { %1262 = vmatpush.msra.mxu0 %v1242_v58 }
0x160e   :  { %1662 = vmatpush.msra.mxu1 %v875_v42  ;;  %v1241_v42 = vld [vmem:[#allocation2 + $0x3d0] sm:$0xff] }
0x160f   :  { %1263 = vmatpush.msra.mxu0 %v1241_v42 }
0x1610   :  { %1663 = vmatpush.msra.mxu1 %v874_v41  ;;  %v1240_v41 = vld [vmem:[#allocation2 + $0x3c0] sm:$0xff] }
0x1611   :  { %1264 = vmatpush.msra.mxu0 %v1240_v41 }
0x1612   :  { %1664 = vmatpush.msra.mxu1 %v873_v53 }
0x1613   :  { %1368 = vmatpush.msrb.mxu0 %v4496_v57  ;;  %v5902_v57 = vld [vmem:[#allocation13_spill] sm:$0xff] }
0x1614   :  { %1665 = vmatpush.msra.mxu1 %v872_v43 }
0x1615   :  { %1369 = vmatpush.msrb.mxu0 %v4502_v51  ;;  %v5903_v51 = vld [vmem:[#allocation16_spill] sm:$0xff] }
0x1616   :  { %1666 = vmatpush.msra.mxu1 %v871_v47 }
0x1617   :  { %1370 = vmatpush.msrb.mxu0 %v4506_v59  ;;  %v5904_v59 = vld [vmem:[#allocation14_spill] sm:$0xff] }
0x1618   :  { %1667 = vmatpush.msra.mxu1 %v870_v1 }
0x1619   :  { %1371 = vmatpush.msrb.mxu0 %v4512_v61  ;;  %v5905_v61 = vld [vmem:[#allocation17_spill] sm:$0xff] }
0x161a   :  { %1668 = vmatpush.msra.mxu1 %v869_v0  ;;  %v5917_v0 = vld [vmem:[#allocation28_spill] sm:$0xff] }
0x161c   :  { %1669 = vmatpush.msra.mxu1 %v868_v2 }
0x161e   :  { %1670 = vmatpush.msra.mxu1 %v867_v62 }
0x1654   :  { %v1135_v19 = vpop.f32.mrf.mxu1 }
0x1655   :  { %v1182_v31 = vadd.f32 %v1180_v26, %v1135_v19 }
0x1657   :  { %4156 = vtanh.f32 %v1182_v31  ;;  %v3930_v60 = vmul.f32 -1.442695, %v1182_v31 }
0x1659   :  { %4158 = vpow2.f32 %v3930_v60 }
0x165d   :  { %v4157_v46 = vpop.eup %4156 }
0x165e   :  { %1205 = vrot.lane.b32.xlu2 %v4157_v46, %s4291_s17 }
0x165f   :  { %v4159_v56 = vpop.eup %4158 }
0x1660   :  { %v1186_v35 = vadd.f32 1.0, %v4159_v56 }
0x1662   :  { %4160 = vrcp.f32 %v1186_v35  ;;  %v1198_v40 = vand.u32 2147483648, %v1186_v35  ;;  %vm1192_vm4 = vweird.f32 %v1186_v35  ;;  %v1196_v54 = vand.u32 2147483647, %v1186_v35 }
0x1664   :  { %v1199_v38 = vor.u32 1.1754944e-38, %v1198_v40  ;;  %vm1197_vm7 = vcmp.eq.f32.partialorder %v1196_v54, 8.507059e+37 }
0x1668   :  { %v4161_v63 = vpop.eup %4160 }
0x1669   :  { %v1188_v27 = vmul.f32 %v4161_v63, %v1186_v35  ;;  %vm1193_vm3 = vweird.f32 %v4161_v63 }
0x166a   :  { %vm1194_vm6 = vmor %vm1192_vm4, %vm1193_vm3 }
0x166b   :  { %v1189_v36 = vsub.f32 1.0, %v1188_v27 }
0x166d   :  { %v1190_v32 = vmul.f32 %v4161_v63, %v1189_v36 }
0x166f   :  { %v1191_v33 = vadd.f32 %v4161_v63, %v1190_v32 }
0x1671   :  { %v1195_v28 = vsel %vm1194_vm6, %v4161_v63, %v1191_v33 }
0x1672   :  { %v1200_v50 = vsel %vm1197_vm7, %v1199_v38, %v1195_v28 }
0x1673   :  { %v1203_v44 = vmul.f32 %v1200_v50, %v4475_v23 }
0x16b8   :  { %v1206_v34 = vpop.permute.xlu2 %1205 }
0x16b9   :  { %v1208_v18 = vmul.f32 %v1206_v34, %v1200_v50 }
0x16bb   :  { %1210 = vrot.lane.b32.xlu1 %v1208_v18, %s4292_s18 }
0x172d   :  { %v1211_v45 = vpop.permute.xlu1 %1210 }
0x172e   :  { %v4756_v3 = vadd.f32 %v1211_v45, %v1203_v44 }
0x1730   :  { %4162 = vtanh.f32 %v4756_v3 }
0x1736   :  { %v4163_v4 = vpop.eup %4162 }
0x1737   :  { %1216 = vrot.lane.b32.xlu2 %v4163_v4, %s4291_s17  ;;  %v5918_v4 = vmov 3  }
0x1791   :  { %v1217_v23 = vpop.permute.xlu2 %1216 }
0x1792   :  { %v1219_v53 = vmul.f32 %v1217_v23, %v1200_v50  ;;  %v5923_v23 = vmov 7  }
0x1794   :  { %1245 = vrot.lane.b32.xlu1 %v1219_v53, %s4292_s18 }
0x1806   :  { %v1246_v43 = vpop.permute.xlu1 %1245 }
0x1807   :  { %3932 = vmatmul.msk.f32.vlgmr.msra.gmra.mxu0 %vm182_vm5, %v1246_v43  ;;  %3934 = vmatmul.msk.f32.vlgmr.msra.gmra.mxu2 %vm182_vm5, %v1246_v43 }
0x1808   :  { %1432 = vmatpush.msra.mxu0 %v4533_v5  ;;  %1452 = vmatpush.msra.mxu2 %v4540_v8  ;;  %v5906_v5 = vld [vmem:[#allocation15_spill] sm:$0xff]  ;;  %v5909_v8 = vld [vmem:[#allocation21_spill] sm:$0xff] }
0x180a   :  { %1433 = vmatpush.msra.mxu0 %v4535_v6  ;;  %1453 = vmatpush.msra.mxu2 %v4544_v9  ;;  %v5907_v6 = vld [vmem:[#allocation19_spill] sm:$0xff]  ;;  %v5910_v9 = vld [vmem:[#allocation20_spill] sm:$0xff] }
0x180c   :  { %1434 = vmatpush.msra.mxu0 %v4538_v7  ;;  %1454 = vmatpush.msra.mxu2 %v4548_v11  ;;  %v5908_v7 = vld [vmem:[#allocation18_spill] sm:$0xff] }
0x180d   :  { %v5912_v11 = vld [vmem:[#allocation22_spill] sm:$0xff] }
0x180e   :  { %1435 = vmatpush.msra.mxu0 %v4546_v10  ;;  %1455 = vmatpush.msra.mxu2 %v4554_v13  ;;  %v5911_v10 = vld [vmem:[#allocation23_spill] sm:$0xff]  ;;  %v5914_v13 = vld [vmem:[#allocation24_spill] sm:$0xff] }
0x180f   :  { %3935 = vmatmul.msk.f32.vlgmr.msrb.gmra.mxu0 %vm182_vm5, %v1246_v43  ;;  %3936 = vmatmul.msk.f32.vlgmr.msrb.gmra.mxu2 %vm182_vm5, %v1246_v43 }
0x1810   :  { %1436 = vmatpush.msra.mxu0 %v4552_v12  ;;  %1456 = vmatpush.msra.mxu2 %v4560_v15  ;;  %v5913_v12 = vld [vmem:[#allocation25_spill] sm:$0xff]  ;;  %v1159_v15 = vpop.f32.mrf.mxu1 }
0x1812   :  { %1437 = vmatpush.msra.mxu0 %v4558_v14  ;;  %1457 = vmatpush.msra.mxu2 %v4566_v17  ;;  %v5915_v14 = vld [vmem:[#allocation26_spill] sm:$0xff] }
0x1814   :  { %1438 = vmatpush.msra.mxu0 %v4564_v16  ;;  %1458 = vmatpush.msra.mxu2 %v4572_v22 }
0x1816   :  { %1439 = vmatpush.msra.mxu0 %v4570_v21  ;;  %1459 = vmatpush.msra.mxu2 %v4586_v29 }
0x1818   :  { %1440 = vmatpush.msra.mxu0 %v4576_v24  ;;  %1460 = vmatpush.msra.mxu2 %v4588_v30  ;;  %v1237_v16 = vpop.f32.mrf.mxu1  ;;  %v5916_v30 = vld [vmem:[#allocation27_spill] sm:$0xff] }
0x1819   :  { %v1238_v17 = vadd.f32 %v1237_v16, %v1159_v15 }
0x181a   :  { %1441 = vmatpush.msra.mxu0 %v5902_v57  ;;  %1461 = vmatpush.msra.mxu2 %v5903_v51  ;;  %v5924_v57 = vmov 1  }
0x181c   :  { %1442 = vmatpush.msra.mxu0 %v5904_v59  ;;  %1462 = vmatpush.msra.mxu2 %v5905_v61 }
0x181e   :  { %1443 = vmatpush.msra.mxu0 %v5906_v5  ;;  %1463 = vmatpush.msra.mxu2 %v5907_v6 }
0x1820   :  { %1444 = vmatpush.msra.mxu0 %v5908_v7  ;;  %1464 = vmatpush.msra.mxu2 %v5909_v8  ;;  %v5925_v8 = vld [vmem:[#allocation6_spill] sm:$0xff] }
0x1822   :  { %1445 = vmatpush.msra.mxu0 %v5910_v9  ;;  %1465 = vmatpush.msra.mxu2 %v5911_v10 }
0x1824   :  { %1446 = vmatpush.msra.mxu0 %v5912_v11  ;;  %1466 = vmatpush.msra.mxu2 %v5913_v12  ;;  %v5926_v12 = vld [vmem:[#allocation7_spill] sm:$0xff] }
0x1826   :  { %1447 = vmatpush.msra.mxu0 %v5914_v13  ;;  %1467 = vmatpush.msra.mxu2 %v5915_v14 }
0x1828   :  { %1696 = vmatpush.msrb.mxu0 %v1243_v37  ;;  %v5919_v37 = vmov 0  }
0x182a   :  { %1697 = vmatpush.msrb.mxu0 %v1242_v58  ;;  %v5920_v58 = vmov 4  }
0x182c   :  { %1698 = vmatpush.msrb.mxu0 %v1241_v42  ;;  %v5921_v42 = vmov 5  }
0x182e   :  { %1699 = vmatpush.msrb.mxu0 %v1240_v41  ;;  %v5922_v41 = vmov 6  }
0x1884   :  { %v1266_v21 = vpop.f32.mrf.mxu0 }
0x1885   :  { %v1269_v22 = vadd.f32 %v1266_v21, %v1238_v17  ;;  %v5927_v17 = vld [vmem:[#allocation8_spill] sm:$0xff] }
0x1887   :  { %1270 = vst [vmem:[%s5759_s2] sm:$0xff] %v1269_v22  ;;  %1271 = vmax.xlane.f32.xlu1 %v1269_v22 }
0x188a   :  { %v4804_v24 = vpop.f32.mrf.mxu2 }
0x188c   :  { %v1373_v29 = vpop.f32.mrf.mxu0 }
0x188d   :  { %v1396_v47 = vadd.f32 %v1373_v29, %v5916_v30 }
0x188f   :  { %4164 = vtanh.f32 %v1396_v47 }
0x1892   :  { %v1393_v1 = vpop.f32.mrf.mxu2 }
0x1893   :  { %v1397_v2 = vadd.f32 %v1393_v1, %v5917_v0 }
0x1895   :  { %v4165_v62 = vpop.eup %4164  ;;  %4166 = vtanh.f32 %v1397_v2 }
0x1896   :  { %1448 = vmatmul.f32.vlgmr.msra.gmra.mxu0 %v4165_v62 }
0x189b   :  { %v4167_v49 = vpop.eup %4166 }
0x189c   :  { %1468 = vmatmul.f32.vlgmr.msra.gmra.mxu2 %v4167_v49 }
0x18fa   :  { %v1272_v53 = vpop.xlane.xlu1 %1271 }
0x18fb   :  { %vm1273_vm12 = vcmp.eq.f32.partialorder %v1269_v22, %v1272_v53  ;;  %v5928_v22 = vld [vmem:[#allocation9_spill] sm:$0xff] }
0x18fc   :  { %v1274_v43 = vsel %vm1273_vm12, %v4369_v25, 128 }
0x18fd   :  { %v1276_v51 = vshra.s32 %v1274_v43, 16 }
0x18ff   :  { %v1278_v59 = vcvt.s32.f32 %v1276_v51 }
0x1913   :  { %v1449_v26 = vpop.f32.mrf.mxu0 }
0x191f   :  { %v1469_v19 = vpop.f32.mrf.mxu2 }
0x1920   :  { %v1470_v31 = vadd.f32 %v1469_v19, %v1449_v26 }
0x1922   :  { %v1472_v46 = vsel %vm1036_vm13, %v1470_v31, -inf }
0x1923   :  { %1473 = vmax.xlane.f32.xlu2 %v1472_v46 }
0x1996   :  { %v1474_v60 = vpop.xlane.xlu2 %1473 }
0x1997   :  { %v1475_v56 = vsub.f32 %v1470_v31, %v1474_v60 }
0x1999   :  { %v1476_v35 = vmul.f32 1.442695, %v1475_v56  ;;  %v1275_v56 = vand.u32 65535, %v1274_v43 }
0x199b   :  { %4168 = vpow2.f32 %v1476_v35 }
0x19a1   :  { %v4169_v63 = vpop.eup %4168 }
0x19a2   :  { %v1478_v27 = vsel %vm1036_vm13, %v4169_v63, 0.0 }
0x19a3   :  { %1479 = vadd.xlane.f32.xlu0 %v1478_v27 }
0x1a16   :  { %v1480_v36 = vpop.xlane.xlu0 %1479 }
0x1a17   :  { %4170 = vrcp.f32 %v1480_v36  ;;  %v1492_v54 = vand.u32 2147483648, %v1480_v36  ;;  %v1490_v38 = vand.u32 2147483647, %v1480_v36  ;;  %vm1486_vm9 = vweird.f32 %v1480_v36 }
0x1a19   :  { %v1493_v50 = vor.u32 1.1754944e-38, %v1492_v54  ;;  %vm1491_vm11 = vcmp.eq.f32.partialorder %v1490_v38, 8.507059e+37 }
0x1a1d   :  { %v4171_v32 = vpop.eup %4170 }
0x1a1e   :  { %v1482_v33 = vmul.f32 %v4171_v32, %v1480_v36  ;;  %vm1487_vm8 = vweird.f32 %v4171_v32 }
0x1a1f   :  { %vm1488_vm10 = vmor %vm1486_vm9, %vm1487_vm8 }
0x1a20   :  { %v1483_v40 = vsub.f32 1.0, %v1482_v33 }
0x1a22   :  { %v1484_v28 = vmul.f32 %v4171_v32, %v1483_v40 }
0x1a24   :  { %v1485_v34 = vadd.f32 %v4171_v32, %v1484_v28 }
0x1a26   :  { %v1489_v18 = vsel %vm1488_vm10, %v4171_v32, %v1485_v34 }
0x1a27   :  { %v1494_v44 = vsel %vm1491_vm11, %v1493_v50, %v1489_v18 }
0x1a28   :  { %v1495_v45 = vmul.f32 %v4169_v63, %v1494_v44  ;;  %v1277_v63 = vcvt.s32.f32 %v1275_v56  ;;  %v4866_v56 = vld [vmem:[#allocation2 + $0x458] sm:$0xff] }
0x1a2a   :  { %1503 = vperm.xlu0 %4038, %v1495_v45   ;;  %1498 = vperm.xlu2 %4037, %v1495_v45  }
0x1a2b   :  { %1509 = vperm.xlu1 %4039, %v1495_v45  }
0x1a32   :  { %4040 = vset.pattern.permute.xlu2 %v5918_v4  ;;  %4045 = vset.pattern.permute.xlu0 %v5919_v37 }
0x1a33   :  { %4041 = vset.pattern.permute.xlu1 %v5920_v58  ;;  %1515 = vperm.xlu2 %4040, %v1495_v45  }
0x1a34   :  { %1521 = vperm.xlu1 %4041, %v1495_v45  }
0x1a3b   :  { %4042 = vset.pattern.permute.xlu2 %v5921_v42 }
0x1a3c   :  { %4043 = vset.pattern.permute.xlu1 %v5922_v41  ;;  %1527 = vperm.xlu2 %4042, %v1495_v45  }
0x1a3d   :  { %1533 = vperm.xlu1 %4043, %v1495_v45  }
0x1a44   :  { %4044 = vset.pattern.permute.xlu2 %v5923_v23 }
0x1a45   :  { %1539 = vperm.xlu2 %4044, %v1495_v45   ;;  %4048 = vset.pattern.permute.xlu1 %v5918_v4  ;;  %v4974_v4 = vld [vmem:[#allocation2 + $0x780] sm:$0xff] }
0x1a4d   :  { %4046 = vset.pattern.permute.xlu2 %v5924_v57 }
0x1a54   :  { %1279 = vmin.xlane.f32.xlu0 %v1278_v59 }
0x1a84   :  { %v1499_v61 = vpop.permute.xlu2 %1498 }
0x1a85   :  { %v1501_v10 = vmul.f32 %v1499_v61, %v4376_v52 }
0x1a8d   :  { %v1516_v5 = vpop.permute.xlu2 %1515 }
0x1a8e   :  { %v1518_v21 = vmul.f32 %v1516_v5, %v5927_v17 }
0x1a96   :  { %v1528_v14 = vpop.permute.xlu2 %1527 }
0x1a97   :  { %v1530_v2 = vmul.f32 %v1528_v14, %v4444_v20 }
0x1a9c   :  { %v1504_v6 = vpop.permute.xlu0 %1503 }
0x1a9d   :  { %v1510_v7 = vpop.permute.xlu1 %1509  ;;  %v1506_v9 = vmul.f32 %v1504_v6, %v5925_v8 }
0x1a9e   :  { %v1512_v13 = vmul.f32 %v1510_v7, %v5926_v12 }
0x1a9f   :  { %v1507_v11 = vadd.f32 %v1506_v9, %v1501_v10  ;;  %v1540_v62 = vpop.permute.xlu2 %1539 }
0x1aa0   :  { %v1542_v31 = vmul.f32 %v1540_v62, %v4487_v48  ;;  %v4849_v62 = vld [vmem:[#allocation2 + $0x340] sm:$0xff] }
0x1aa1   :  { %v1513_v15 = vadd.f32 %v1512_v13, %v1507_v11 }
0x1aa3   :  { %v1519_v47 = vadd.f32 %v1518_v21, %v1513_v15 }
0x1aa6   :  { %v1522_v16 = vpop.permute.xlu1 %1521 }
0x1aa7   :  { %v1524_v29 = vmul.f32 %v1522_v16, %v5928_v22 }
0x1aa9   :  { %v1525_v1 = vadd.f32 %v1524_v29, %v1519_v47  ;;  %v4841_v47 = vld [vmem:[#allocation2 + $0x370] sm:$0xff] }
0x1aaa   :  { %1776 = vmatpush.msrb.mxu2 %v4841_v47 }
0x1aab   :  { %v1531_v26 = vadd.f32 %v1530_v2, %v1525_v1  ;;  %v4843_v1 = vld [vmem:[#allocation2 + $0x360] sm:$0xff]  ;;  %v4846_v2 = vld [vmem:[#allocation2 + $0x350] sm:$0xff] }
0x1aac   :  { %1777 = vmatpush.msrb.mxu2 %v4843_v1 }
0x1aae   :  { %1778 = vmatpush.msrb.mxu2 %v4846_v2 }
0x1aaf   :  { %v1534_v49 = vpop.permute.xlu1 %1533 }
0x1ab0   :  { %v1536_v19 = vmul.f32 %v1534_v49, %v4458_v55  ;;  %1779 = vmatpush.msrb.mxu2 %v4849_v62 }
0x1ab2   :  { %v1537_v46 = vadd.f32 %v1536_v19, %v1531_v26  ;;  %v4854_v26 = vld [vmem:[#allocation2 + $0x470] sm:$0xff]  ;;  %v4856_v19 = vld [vmem:[#allocation2 + $0x478] sm:$0xff] }
0x1ab3   :  { %5930 = vst [vmem:[#allocation16_spill] sm:$0xff] %v4854_v26  ;;  %1804 = vmatpush.msra.mxu0 %v4854_v26  ;;  %1824 = vmatpush.msra.mxu2 %v4856_v19 }
0x1ab4   :  { %v1543_v60 = vadd.f32 %v1542_v31, %v1537_v46  ;;  %v4858_v31 = vld [vmem:[#allocation2 + $0x460] sm:$0xff]  ;;  %v4862_v46 = vld [vmem:[#allocation2 + $0x468] sm:$0xff] }
0x1ab5   :  { %5931 = vst [vmem:[#allocation14_spill] sm:$0xff] %v4858_v31  ;;  %1805 = vmatpush.msra.mxu0 %v4858_v31  ;;  %1825 = vmatpush.msra.mxu2 %v4862_v46 }
0x1ab6   :  { %1549 = vrot.lane.b32.xlu1 %v1543_v60, %s4292_s18  ;;  %v4864_v60 = vld [vmem:[#allocation2 + $0x450] sm:$0xff] }
0x1ab7   :  { %5932 = vst [vmem:[#allocation17_spill] sm:$0xff] %v4864_v60  ;;  %1806 = vmatpush.msra.mxu0 %v4864_v60  ;;  %1826 = vmatpush.msra.mxu2 %v4866_v56 }
0x1ac7   :  { %v1280_v35 = vpop.xlane.xlu0 %1279 }
0x1ac8   :  { %vm1281_vm14 = vcmp.eq.f32.partialorder %v1278_v59, %v1280_v35  ;;  %v1286_v32 = vcvt.f32.s32 %v1280_v35  ;;  %v4870_v35 = vld [vmem:[#allocation2 + $0x440] sm:$0xff] }
0x1ac9   :  { %v1282_v27 = vsel %vm1281_vm14, %v1277_v63, inf  ;;  %5933 = vst [vmem:[#allocation15_spill] sm:$0xff] %v4870_v35  ;;  %v4872_v63 = vld [vmem:[#allocation2 + $0x448] sm:$0xff]  ;;  %1807 = vmatpush.msra.mxu0 %v4870_v35 }
0x1aca   :  { %1283 = vmin.xlane.f32.xlu2 %v1282_v27  ;;  %v1287_v40 = vshll.u32 %v1286_v32, 16  ;;  %1827 = vmatpush.msra.mxu2 %v4872_v63  ;;  %v4878_v27 = vld [vmem:[#allocation2 + $0x770] sm:$0xff] }
0x1acb   :  { %v4883_v32 = vld [vmem:[#allocation2 + $0x750] sm:$0xff] }
0x1b28   :  { %v1550_v36 = vpop.permute.xlu1 %1549 }
0x1b29   :  { %3937 = vmatmul.msk.f32.vlgmr.msrb.gmra.mxu3 %vm182_vm5, %v1550_v36  ;;  %3938 = vmatmul.msk.f32.vlgmr.msrb.gmra.mxu1 %vm182_vm5, %v1550_v36  ;;  %v4880_v36 = vld [vmem:[#allocation2 + $0x760] sm:$0xff] }
0x1b2a   :  { %1868 = vmatpush.msrb.mxu3 %v4878_v27 }
0x1b2c   :  { %1869 = vmatpush.msrb.mxu3 %v4880_v36 }
0x1b2e   :  { %1870 = vmatpush.msrb.mxu3 %v4883_v32 }
0x1b3d   :  { %v1284_v33 = vpop.xlane.xlu2 %1283 }
0x1b3e   :  { %v1285_v54 = vcvt.f32.s32 %v1284_v33  ;;  %v4886_v33 = vld [vmem:[#allocation2 + $0x740] sm:$0xff] }
0x1b3f   :  { %1871 = vmatpush.msrb.mxu3 %v4886_v33 }
0x1b40   :  { %v1288_v28 = vadd.s32 %v1287_v40, %v1285_v54  ;;  %v4889_v40 = vld [vmem:[#allocation2 + $0x730] sm:$0xff]  ;;  %v4892_v54 = vld [vmem:[#allocation2 + $0x720] sm:$0xff] }
0x1b41   :  { %1872 = vmatpush.msrb.mxu3 %v4889_v40 }
0x1b42   :  { %vm1289_vm15 = vcmp.eq.s32.totalorder %v4369_v25, %v1288_v28  ;;  %v4895_v28 = vld [vmem:[#allocation2 + $0x710] sm:$0xff] }
0x1b43   :  { %3939 = vmatmul.msk.f32.vlgmr.msra.gmra.mxu3 %vm1289_vm15, %v5901_v39  ;;  %3941 = vmatmul.msk.f32.vlgmr.msra.gmra.mxu1 %vm1289_vm15, %v5901_v39 }
0x1b44   :  { %1873 = vmatpush.msrb.mxu3 %v4892_v54 }
0x1b46   :  { %1874 = vmatpush.msrb.mxu3 %v4895_v28 }
0x1bac   :  { %v1570_v38 = vpop.f32.mrf.mxu3 }
0x1bc6   :  { %v1614_v34 = vpop.f32.mrf.mxu3 }
0x1bc7   :  { %v1615_v50 = vadd.f32 %v1614_v34, %v4804_v24 }
0x1bc9   :  { %v1617_v18 = vadd.f32 %v1615_v50, %v1570_v38  ;;  %v4899_v38 = vld [vmem:[#allocation2 + $0x870] sm:$0xff]  ;;  %v4903_v50 = vld [vmem:[#allocation2 + $0x860] sm:$0xff] }
0x1bcb   :  { %4172 = vtanh.f32 %v1617_v18  ;;  %v3940_v45 = vmul.f32 -1.442695, %v1617_v18  ;;  %v4906_v18 = vld [vmem:[#allocation2 + $0x850] sm:$0xff] }
0x1bcd   :  { %4174 = vpow2.f32 %v3940_v45  ;;  %v4915_v45 = vld [vmem:[#allocation2 + $0x700] sm:$0xff] }
0x1bce   :  { %1875 = vmatpush.msrb.mxu3 %v4915_v45 }
0x1bd1   :  { %v4173_v44 = vpop.eup %4172 }
0x1bd2   :  { %1640 = vrot.lane.b32.xlu1 %v4173_v44, %s4291_s17  ;;  %v4909_v44 = vld [vmem:[#allocation2 + $0x840] sm:$0xff] }
0x1bd3   :  { %v4175_v53 = vpop.eup %4174 }
0x1bd4   :  { %v1621_v43 = vadd.f32 1.0, %v4175_v53  ;;  %v4917_v53 = vld [vmem:[#allocation2 + $0x830] sm:$0xff] }
0x1bd6   :  { %4176 = vrcp.f32 %v1621_v43  ;;  %v1633_v7 = vand.u32 2147483648, %v1621_v43  ;;  %vm1627_vm1 = vweird.f32 %v1621_v43  ;;  %v1631_v9 = vand.u32 2147483647, %v1621_v43 }
0x1bd8   :  { %v1634_v10 = vor.u32 1.1754944e-38, %v1633_v7  ;;  %vm1632_vm3 = vcmp.eq.f32.partialorder %v1631_v9, 8.507059e+37  ;;  %v4939_v7 = vld [vmem:[#allocation2 + $0x6c0] sm:$0xff]  ;;  %v4941_v9 = vld [vmem:[#allocation2 + $0x7f0] sm:$0xff] }
0x1bdc   :  { %v4177_v51 = vpop.eup %4176 }
0x1bdd   :  { %v1623_v59 = vmul.f32 %v4177_v51, %v1621_v43  ;;  %vm1628_vm0 = vweird.f32 %v4177_v51  ;;  %v4921_v43 = vld [vmem:[#allocation2 + $0x6f0] sm:$0xff] }
0x1bde   :  { %vm1629_vm2 = vmor %vm1627_vm1, %vm1628_vm0  ;;  %1876 = vmatpush.msrb.mxu3 %v4921_v43 }
0x1bdf   :  { %v1624_v61 = vsub.f32 1.0, %v1623_v59  ;;  %v4925_v59 = vld [vmem:[#allocation2 + $0x6e0] sm:$0xff] }
0x1be0   :  { %1877 = vmatpush.msrb.mxu3 %v4925_v59 }
0x1be1   :  { %v1625_v5 = vmul.f32 %v4177_v51, %v1624_v61  ;;  %v4929_v61 = vld [vmem:[#allocation2 + $0x810] sm:$0xff] }
0x1be3   :  { %v1626_v6 = vadd.f32 %v4177_v51, %v1625_v5  ;;  %v4933_v5 = vld [vmem:[#allocation2 + $0x6d0] sm:$0xff] }
0x1be4   :  { %1878 = vmatpush.msrb.mxu3 %v4933_v5 }
0x1be5   :  { %v1630_v24 = vsel %vm1629_vm2, %v4177_v51, %v1626_v6  ;;  %v4923_v51 = vld [vmem:[#allocation2 + $0x820] sm:$0xff] }
0x1be6   :  { %v1635_v13 = vsel %vm1632_vm3, %v1634_v10, %v1630_v24  ;;  %v4935_v6 = vld [vmem:[#allocation2 + $0x800] sm:$0xff]  ;;  %1879 = vmatpush.msrb.mxu3 %v4939_v7  ;;  %v4945_v24 = vld [vmem:[#allocation2 + $0x6b0] sm:$0xff] }
0x1be7   :  { %v1638_v15 = vmul.f32 %v1635_v13, %v4756_v3  ;;  %v4947_v10 = vld [vmem:[#allocation2 + $0x7e0] sm:$0xff] }
0x1be8   :  { %1880 = vmatpush.msrb.mxu3 %v4945_v24 }
0x1c44   :  { %v1641_v11 = vpop.permute.xlu1 %1640 }
0x1c45   :  { %v1643_v14 = vmul.f32 %v1641_v11, %v1635_v13  ;;  %v4949_v11 = vld [vmem:[#allocation2 + $0x6a0] sm:$0xff] }
0x1c46   :  { %1881 = vmatpush.msrb.mxu3 %v4949_v11 }
0x1c47   :  { %1645 = vrot.lane.b32.xlu1 %v1643_v14, %s4292_s18  ;;  %v4957_v14 = vld [vmem:[#allocation2 + $0x690] sm:$0xff] }
0x1c48   :  { %1882 = vmatpush.msrb.mxu3 %v4957_v14 }
0x1cb9   :  { %v1646_v16 = vpop.permute.xlu1 %1645 }
0x1cba   :  { %v4837_v21 = vadd.f32 %v1646_v16, %v1638_v15  ;;  %v4959_v15 = vld [vmem:[#allocation2 + $0x7c0] sm:$0xff] }
0x1cbb   :  { %v4963_v16 = vld [vmem:[#allocation2 + $0x680] sm:$0xff] }
0x1cbc   :  { %5929 = vst [vmem:[#allocation13_spill] sm:$0xff] %v4837_v21  ;;  %4178 = vtanh.f32 %v4837_v21  ;;  %1883 = vmatpush.msrb.mxu3 %v4963_v16 }
0x1cc2   :  { %v4179_v29 = vpop.eup %4178 }
0x1cc3   :  { %1651 = vrot.lane.b32.xlu1 %v4179_v29, %s4291_s17  ;;  %v4965_v29 = vld [vmem:[#allocation2 + $0x7b0] sm:$0xff] }
0x1d35   :  { %v1652_v3 = vpop.permute.xlu1 %1651 }
0x1d36   :  { %v1654_v49 = vmul.f32 %v1652_v3, %v1635_v13  ;;  %v4953_v13 = vld [vmem:[#allocation2 + $0x7d0] sm:$0xff]  ;;  %v4969_v3 = vld [vmem:[#allocation2 + $0x7a0] sm:$0xff] }
0x1d38   :  { %1680 = vrot.lane.b32.xlu1 %v1654_v49, %s4292_s18  ;;  %v4971_v49 = vld [vmem:[#allocation2 + $0x790] sm:$0xff] }
0x1daa   :  { %v1681_v34 = vpop.permute.xlu1 %1680 }
0x1dab   :  { %3942 = vmatmul.msk.f32.vlgmr.msrb.gmra.mxu0 %vm182_vm5, %v1681_v34  ;;  %3945 = vmatmul.msk.f32.vlgmr.msrb.gmra.mxu2 %vm182_vm5, %v1681_v34 }
0x1dac   :  { %1888 = vmatpush.msrb.mxu0 %v4899_v38 }
0x1dae   :  { %1889 = vmatpush.msrb.mxu0 %v4903_v50 }
0x1db0   :  { %1890 = vmatpush.msrb.mxu0 %v4906_v18 }
0x1db2   :  { %1891 = vmatpush.msrb.mxu0 %v4909_v44 }
0x1db3   :  { %3946 = vmatmul.msk.f32.vlgmr.msra.gmra.mxu0 %vm182_vm5, %v1681_v34  ;;  %3947 = vmatmul.msk.f32.vlgmr.msra.gmra.mxu2 %vm182_vm5, %v1681_v34  ;;  %v1594_v34 = vpop.f32.mrf.mxu1 }
0x1db4   :  { %1892 = vmatpush.msrb.mxu0 %v4917_v53 }
0x1db6   :  { %1893 = vmatpush.msrb.mxu0 %v4923_v51 }
0x1db8   :  { %1894 = vmatpush.msrb.mxu0 %v4929_v61 }
0x1dba   :  { %1895 = vmatpush.msrb.mxu0 %v4935_v6 }
0x1dbb   :  { %v1672_v35 = vpop.f32.mrf.mxu1 }
0x1dbc   :  { %1896 = vmatpush.msrb.mxu0 %v4941_v9  ;;  %v1673_v60 = vadd.f32 %v1672_v35, %v1594_v34 }
0x1dbe   :  { %1897 = vmatpush.msrb.mxu0 %v4947_v10 }
0x1dc0   :  { %1898 = vmatpush.msrb.mxu0 %v4953_v13 }
0x1dc2   :  { %1899 = vmatpush.msrb.mxu0 %v4959_v15 }
0x1dc4   :  { %1900 = vmatpush.msrb.mxu0 %v4965_v29 }
0x1dc6   :  { %1901 = vmatpush.msrb.mxu0 %v4969_v3 }
0x1dc8   :  { %1902 = vmatpush.msrb.mxu0 %v4971_v49 }
0x1dca   :  { %1903 = vmatpush.msrb.mxu0 %v4974_v4 }
0x1dcc   :  { %2212 = vmatpush.msra.mxu0 %v4841_v47 }
0x1dce   :  { %2213 = vmatpush.msra.mxu0 %v4843_v1 }
0x1dd0   :  { %2214 = vmatpush.msra.mxu0 %v4846_v2 }
0x1dd2   :  { %2215 = vmatpush.msra.mxu0 %v4849_v62 }
0x1e28   :  { %v1701_v31 = vpop.f32.mrf.mxu0 }
0x1e29   :  { %v4982_v26 = vadd.f32 %v1701_v31, %v1673_v60 }
0x1e2b   :  { %3943 = vst [vmem:[%s5759_s2 + $0x8] sm:$0xff] %v4982_v26  ;;  %1707 = vmax.xlane.f32.xlu2 %v4982_v26 }
0x1e2e   :  { %v4989_v21 = vpop.f32.mrf.mxu2 }
0x1e2f   :  { %5934 = vst [vmem:[#allocation19_spill] sm:$0xff] %v4989_v21 }
0x1e30   :  { %v1809_v47 = vpop.f32.mrf.mxu0 }
0x1e31   :  { %v1832_v1 = vadd.f32 %v1809_v47, %v5916_v30 }
0x1e33   :  { %4180 = vtanh.f32 %v1832_v1 }
0x1e36   :  { %v1829_v2 = vpop.f32.mrf.mxu2 }
0x1e37   :  { %v1833_v35 = vadd.f32 %v1829_v2, %v5917_v0 }
0x1e39   :  { %v4181_v62 = vpop.eup %4180  ;;  %4182 = vtanh.f32 %v1833_v35 }
0x1e3a   :  { %1884 = vmatmul.f32.vlgmr.msrb.gmra.mxu3 %v4181_v62 }
0x1e3f   :  { %v4183_v31 = vpop.eup %4182 }
0x1e40   :  { %1904 = vmatmul.f32.vlgmr.msrb.gmra.mxu0 %v4183_v31 }
0x1e41   :  { %2260 = vmatpush.msrb.mxu0 %v4856_v19 }
0x1e43   :  { %2261 = vmatpush.msrb.mxu0 %v4862_v46 }
0x1e45   :  { %2262 = vmatpush.msrb.mxu0 %v4866_v56 }
0x1e47   :  { %2263 = vmatpush.msrb.mxu0 %v4872_v63 }
0x1ebd   :  { %v1885_v60 = vpop.f32.mrf.mxu3  ;;  %v1905_v34 = vpop.f32.mrf.mxu0 }
0x1ebe   :  { %v1906_v47 = vadd.f32 %v1905_v34, %v1885_v60 }
0x1ec0   :  { %v1908_v1 = vsel %vm1036_vm13, %v1906_v47, -inf }
0x1ec1   :  { %1909 = vmax.xlane.f32.xlu0 %v1908_v1 }
0x1f34   :  { %v1910_v2 = vpop.xlane.xlu0 %1909 }
0x1f35   :  { %v1911_v30 = vsub.f32 %v1906_v47, %v1910_v2 }
0x1f37   :  { %v1912_v35 = vmul.f32 1.442695, %v1911_v30 }
0x1f39   :  { %4184 = vpow2.f32 %v1912_v35  ;;  %v5935_v35 = vmov 2  }
0x1f3f   :  { %v4185_v62 = vpop.eup %4184 }
0x1f40   :  { %v1914_v31 = vsel %vm1036_vm13, %v4185_v62, 0.0 }
0x1f41   :  { %1915 = vadd.xlane.f32.xlu1 %v1914_v31 }
0x1fb4   :  { %v1916_v19 = vpop.xlane.xlu1 %1915 }
0x1fb5   :  { %4186 = vrcp.f32 %v1916_v19  ;;  %v1928_v63 = vand.u32 2147483648, %v1916_v19  ;;  %v1926_v60 = vand.u32 2147483647, %v1916_v19  ;;  %vm1922_vm6 = vweird.f32 %v1916_v19 }
0x1fb7   :  { %v1929_v1 = vor.u32 1.1754944e-38, %v1928_v63  ;;  %vm1927_vm8 = vcmp.eq.f32.partialorder %v1926_v60, 8.507059e+37 }
0x1fbb   :  { %v4187_v46 = vpop.eup %4186 }
0x1fbc   :  { %v1918_v56 = vmul.f32 %v4187_v46, %v1916_v19  ;;  %vm1923_vm4 = vweird.f32 %v4187_v46 }
0x1fbd   :  { %vm1924_vm7 = vmor %vm1922_vm6, %vm1923_vm4 }
0x1fbe   :  { %v1919_v0 = vsub.f32 1.0, %v1918_v56 }
0x1fc0   :  { %v1920_v21 = vmul.f32 %v4187_v46, %v1919_v0  ;;  %v1708_v0 = vpop.xlane.xlu2 %1707 }
0x1fc1   :  { %vm1709_vm9 = vcmp.eq.f32.partialorder %v4982_v26, %v1708_v0 }
0x1fc2   :  { %v1921_v34 = vadd.f32 %v4187_v46, %v1920_v21  ;;  %v1710_v21 = vsel %vm1709_vm9, %v4369_v25, 128 }
0x1fc4   :  { %v1925_v47 = vsel %vm1924_vm7, %v4187_v46, %v1921_v34 }
0x1fc5   :  { %v1930_v30 = vsel %vm1927_vm8, %v1929_v1, %v1925_v47 }
0x1fc6   :  { %v1931_v2 = vmul.f32 %v4185_v62, %v1930_v30  ;;  %v1712_v62 = vshra.s32 %v1710_v21, 16 }
0x1fc8   :  { %1951 = vperm.xlu1 %4048, %v1931_v2   ;;  %1934 = vperm.xlu0 %4045, %v1931_v2   ;;  %v1714_v31 = vcvt.s32.f32 %v1712_v62 }
0x1fc9   :  { %1939 = vperm.xlu2 %4046, %v1931_v2  }
0x1fd0   :  { %4050 = vset.pattern.permute.xlu0 %v5921_v42  ;;  %v5102_v42 = vld [vmem:[#allocation2 + $0x150] sm:$0xff] }
0x1fd1   :  { %4047 = vset.pattern.permute.xlu2 %v5935_v35  ;;  %1963 = vperm.xlu0 %4050, %v1931_v2   ;;  %5942 = vst [vmem:[#allocation24_spill] sm:$0xff] %v5102_v42 }
0x1fd2   :  { %1945 = vperm.xlu2 %4047, %v1931_v2  }
0x1fd9   :  { %4053 = vset.pattern.permute.xlu0 %v5919_v37 }
0x1fda   :  { %4049 = vset.pattern.permute.xlu2 %v5920_v58 }
0x1fdb   :  { %1957 = vperm.xlu2 %4049, %v1931_v2  }
0x1fe3   :  { %4051 = vset.pattern.permute.xlu2 %v5922_v41 }
0x1fe4   :  { %1969 = vperm.xlu2 %4051, %v1931_v2  }
0x1fec   :  { %4052 = vset.pattern.permute.xlu2 %v5923_v23 }
0x1fed   :  { %1975 = vperm.xlu2 %4052, %v1931_v2  }
0x1ff5   :  { %4054 = vset.pattern.permute.xlu2 %v5924_v57  ;;  %v5098_v57 = vld [vmem:[#allocation2 + $0x260] sm:$0xff] }
0x1ff6   :  { %5941 = vst [vmem:[#allocation25_spill] sm:$0xff] %v5098_v57 }
0x1ffb   :  { %1715 = vmin.xlane.f32.xlu0 %v1714_v31 }
0x2023   :  { %v1940_v19 = vpop.permute.xlu2 %1939 }
0x2024   :  { %v1942_v60 = vmul.f32 %v1940_v19, %v5925_v8 }
0x202c   :  { %v1946_v46 = vpop.permute.xlu2 %1945 }
0x202d   :  { %v1948_v47 = vmul.f32 %v1946_v46, %v5926_v12  ;;  %v5096_v12 = vld [vmem:[#allocation2 + $0x160] sm:$0xff] }
0x2035   :  { %v1958_v56 = vpop.permute.xlu2 %1957 }
0x2036   :  { %v1960_v23 = vmul.f32 %v1958_v56, %v5928_v22  ;;  %v5021_v56 = vld [vmem:[#allocation2 + $0x3a0] sm:$0xff]  ;;  %v5090_v22 = vld [vmem:[#allocation2 + $0x170] sm:$0xff] }
0x2037   :  { %5940 = vst [vmem:[#allocation22_spill] sm:$0xff] %v5090_v22 }
0x203a   :  { %v1935_v63 = vpop.permute.xlu0 %1934  ;;  %v1952_v1 = vpop.permute.xlu1 %1951 }
0x203b   :  { %v1937_v34 = vmul.f32 %v1935_v63, %v4376_v52  ;;  %v1954_v2 = vmul.f32 %v1952_v1, %v5927_v17  ;;  %v5092_v17 = vld [vmem:[#allocation2 + $0x270] sm:$0xff] }
0x203d   :  { %v1943_v30 = vadd.f32 %v1942_v60, %v1937_v34  ;;  %v5017_v60 = vld [vmem:[#allocation2 + $0x3b0] sm:$0xff] }
0x203e   :  { %v1970_v26 = vpop.permute.xlu2 %1969  ;;  %v5019_v34 = vld [vmem:[#allocation2 + $0x430] sm:$0xff]  ;;  %2001 = vmatpush.msrb.mxu1 %v5017_v60 }
0x203f   :  { %v1949_v0 = vadd.f32 %v1948_v47, %v1943_v30  ;;  %v1972_v35 = vmul.f32 %v1970_v26, %v4458_v55  ;;  %2025 = vmatpush.msrb.mxu2 %v5019_v34  ;;  %v5044_v30 = vld [vmem:[#allocation2 + $0x1f0] sm:$0xff]  ;;  %v5084_v55 = vld [vmem:[#allocation2 + $0x180] sm:$0xff] }
0x2040   :  { %2002 = vmatpush.msrb.mxu1 %v5021_v56  ;;  %v5046_v26 = vld [vmem:[#allocation2 + $0x2f0] sm:$0xff]  ;;  %5938 = vst [vmem:[#allocation20_spill] sm:$0xff] %v5084_v55 }
0x2041   :  { %v1955_v62 = vadd.f32 %v1954_v2, %v1949_v0  ;;  %v5048_v2 = vld [vmem:[#allocation2 + $0x1e0] sm:$0xff] }
0x2042   :  { %v5052_v0 = vld [vmem:[#allocation2 + $0x2e0] sm:$0xff] }
0x2043   :  { %v1964_v41 = vpop.permute.xlu0 %1963  ;;  %v1961_v58 = vadd.f32 %v1960_v23, %v1955_v62  ;;  %v5035_v23 = vld [vmem:[#allocation2 + $0x400] sm:$0xff]  ;;  %v5056_v62 = vld [vmem:[#allocation2 + $0x2d0] sm:$0xff] }
0x2044   :  { %v1966_v37 = vmul.f32 %v1964_v41, %v4444_v20  ;;  %v5025_v41 = vld [vmem:[#allocation2 + $0x420] sm:$0xff] }
0x2045   :  { %2026 = vmatpush.msrb.mxu2 %v5025_v41  ;;  %v5086_v20 = vld [vmem:[#allocation2 + $0x280] sm:$0xff] }
0x2046   :  { %v1967_v19 = vadd.f32 %v1966_v37, %v1961_v58  ;;  %v5027_v37 = vld [vmem:[#allocation2 + $0x390] sm:$0xff]  ;;  %5939 = vst [vmem:[#allocation23_spill] sm:$0xff] %v5086_v20 }
0x2047   :  { %v1976_v8 = vpop.permute.xlu2 %1975  ;;  %v5029_v58 = vld [vmem:[#allocation2 + $0x410] sm:$0xff]  ;;  %2003 = vmatpush.msrb.mxu1 %v5027_v37 }
0x2048   :  { %v1973_v63 = vadd.f32 %v1972_v35, %v1967_v19  ;;  %v1978_v52 = vmul.f32 %v1976_v8, %v4487_v48  ;;  %2027 = vmatpush.msrb.mxu2 %v5029_v58  ;;  %v1711_v8 = vand.u32 65535, %v1710_v21  ;;  %v5054_v21 = vld [vmem:[#allocation2 + $0x1d0] sm:$0xff]  ;;  %v5062_v19 = vld [vmem:[#allocation2 + $0x2c0] sm:$0xff] }
0x2049   :  { %v5080_v48 = vld [vmem:[#allocation2 + $0x290] sm:$0xff] }
0x204a   :  { %v1979_v46 = vadd.f32 %v1978_v52, %v1973_v63  ;;  %v5033_v52 = vld [vmem:[#allocation2 + $0x380] sm:$0xff]  ;;  %2028 = vmatpush.msrb.mxu2 %v5035_v23  ;;  %v1713_v1 = vcvt.s32.f32 %v1711_v8  ;;  %v5066_v63 = vld [vmem:[#allocation2 + $0x1b0] sm:$0xff]  ;;  %5937 = vst [vmem:[#allocation21_spill] sm:$0xff] %v5080_v48 }
0x204b   :  { %2004 = vmatpush.msrb.mxu1 %v5033_v52  ;;  %v5072_v8 = vld [vmem:[#allocation2 + $0x1a0] sm:$0xff] }
0x204c   :  { %1985 = vrot.lane.b32.xlu1 %v1979_v46, %s4292_s18  ;;  %2091 = vmatpush.msra.mxu2 %v5046_v26  ;;  %v5068_v46 = vld [vmem:[#allocation2 + $0x2b0] sm:$0xff] }
0x204d   :  { %2033 = vmatpush.msra.mxu1 %v5044_v30 }
0x204e   :  { %2092 = vmatpush.msra.mxu2 %v5052_v0 }
0x204f   :  { %2034 = vmatpush.msra.mxu1 %v5048_v2 }
0x2050   :  { %2093 = vmatpush.msra.mxu2 %v5056_v62 }
0x2051   :  { %2035 = vmatpush.msra.mxu1 %v5054_v21 }
0x2052   :  { %2094 = vmatpush.msra.mxu2 %v5062_v19 }
0x2054   :  { %2095 = vmatpush.msra.mxu2 %v5068_v46 }
0x206e   :  { %v5041_v35 = vpop.xlane.xlu0 %1715 }
0x206f   :  { %vm1717_vm10 = vcmp.eq.f32.partialorder %v1714_v31, %v5041_v35  ;;  %v5060_v31 = vld [vmem:[#allocation2 + $0x1c0] sm:$0xff] }
0x2070   :  { %v1718_v47 = vsel %vm1717_vm10, %v1713_v1, inf  ;;  %2036 = vmatpush.msra.mxu1 %v5060_v31  ;;  %v5074_v1 = vld [vmem:[#allocation2 + $0x2a0] sm:$0xff] }
0x2071   :  { %1719 = vmin.xlane.f32.xlu2 %v1718_v47  ;;  %v5078_v47 = vld [vmem:[#allocation2 + $0x190] sm:$0xff]  ;;  %2096 = vmatpush.msra.mxu2 %v5074_v1 }
0x2072   :  { %2037 = vmatpush.msra.mxu1 %v5066_v63  ;;  %5936 = vst [vmem:[#allocation18_spill] sm:$0xff] %v5078_v47 }
0x2073   :  { %2097 = vmatpush.msra.mxu2 %v5080_v48  ;;  %v5108_v48 = vld [vmem:[#allocation2 + $0x140] sm:$0xff] }
0x2074   :  { %2038 = vmatpush.msra.mxu1 %v5072_v8  ;;  %5944 = vst [vmem:[#allocation29_spill] sm:$0xff] %v5108_v48 }
0x2075   :  { %2098 = vmatpush.msra.mxu2 %v5086_v20  ;;  %v5114_v20 = vld [vmem:[#allocation2 + $0x130] sm:$0xff] }
0x2076   :  { %2039 = vmatpush.msra.mxu1 %v5078_v47  ;;  %v5104_v47 = vld [vmem:[#allocation2 + $0x250] sm:$0xff]  ;;  %5946 = vst [vmem:[#allocation31_spill] sm:$0xff] %v5114_v20 }
0x2077   :  { %2099 = vmatpush.msra.mxu2 %v5092_v17  ;;  %5943 = vst [vmem:[#allocation26_spill] sm:$0xff] %v5104_v47 }
0x2078   :  { %2040 = vmatpush.msra.mxu1 %v5084_v55  ;;  %v5110_v55 = vld [vmem:[#allocation2 + $0x240] sm:$0xff] }
0x2079   :  { %2100 = vmatpush.msra.mxu2 %v5098_v57  ;;  %5945 = vst [vmem:[#allocation30_spill] sm:$0xff] %v5110_v55 }
0x207a   :  { %2041 = vmatpush.msra.mxu1 %v5090_v22  ;;  %v5116_v22 = vld [vmem:[#allocation2 + $0x230] sm:$0xff] }
0x207b   :  { %2101 = vmatpush.msra.mxu2 %v5104_v47  ;;  %5947 = vst [vmem:[#allocation32_spill] sm:$0xff] %v5116_v22  ;;  %v5126_v47 = vld [vmem:[#allocation2 + $0x220] sm:$0xff] }
0x207c   :  { %2042 = vmatpush.msra.mxu1 %v5096_v12 }
0x207d   :  { %2102 = vmatpush.msra.mxu2 %v5110_v55  ;;  %v5132_v55 = vld [vmem:[#allocation2 + $0x210] sm:$0xff] }
0x207e   :  { %2043 = vmatpush.msra.mxu1 %v5102_v42  ;;  %v5124_v42 = vld [vmem:[#allocation2 + $0x120] sm:$0xff] }
0x207f   :  { %2103 = vmatpush.msra.mxu2 %v5116_v22  ;;  %v5136_v22 = vld [vmem:[#allocation2 + $0x100] sm:$0xff] }
0x2080   :  { %2044 = vmatpush.msra.mxu1 %v5108_v48  ;;  %v5130_v48 = vld [vmem:[#allocation2 + $0x110] sm:$0xff] }
0x2081   :  { %2104 = vmatpush.msra.mxu2 %v5126_v47 }
0x2082   :  { %2045 = vmatpush.msra.mxu1 %v5114_v20  ;;  %v5138_v20 = vld [vmem:[#allocation2 + $0x200] sm:$0xff] }
0x2083   :  { %2105 = vmatpush.msra.mxu2 %v5132_v55 }
0x2084   :  { %2046 = vmatpush.msra.mxu1 %v5124_v42 }
0x2085   :  { %2106 = vmatpush.msra.mxu2 %v5138_v20 }
0x2086   :  { %2047 = vmatpush.msra.mxu1 %v5130_v48 }
0x2088   :  { %2048 = vmatpush.msra.mxu1 %v5136_v22 }
0x20be   :  { %v1986_v57 = vpop.permute.xlu1 %1985 }
0x20bf   :  { %3948 = vmatmul.msk.f32.vlgmr.msrb.gmra.mxu1 %vm182_vm5, %v1986_v57  ;;  %3949 = vmatmul.msk.f32.vlgmr.msrb.gmra.mxu2 %vm182_vm5, %v1986_v57  ;;  %v1722_v57 = vcvt.f32.s32 %v5041_v35  ;;  %v2112_v35 = vld [vmem:[#allocation2 + $0x3d0] sm:$0xff] }
0x20c0   :  { %2324 = vmatpush.msrb.mxu2 %v4899_v38  ;;  %2304 = vmatpush.msrb.mxu1 %v4878_v27 }
0x20c2   :  { %2325 = vmatpush.msrb.mxu2 %v4903_v50  ;;  %2305 = vmatpush.msrb.mxu1 %v4880_v36  ;;  %v1723_v36 = vshll.u32 %v1722_v57, 16  ;;  %v2111_v57 = vld [vmem:[#allocation2 + $0x3c0] sm:$0xff] }
0x20c4   :  { %2326 = vmatpush.msrb.mxu2 %v4906_v18  ;;  %2306 = vmatpush.msrb.mxu1 %v4883_v32 }
0x20c6   :  { %2327 = vmatpush.msrb.mxu2 %v4909_v44  ;;  %2307 = vmatpush.msrb.mxu1 %v4886_v33 }
0x20c8   :  { %2328 = vmatpush.msrb.mxu2 %v4917_v53  ;;  %2308 = vmatpush.msrb.mxu1 %v4889_v40 }
0x20ca   :  { %2329 = vmatpush.msrb.mxu2 %v4923_v51  ;;  %2309 = vmatpush.msrb.mxu1 %v4892_v54 }
0x20cc   :  { %2330 = vmatpush.msrb.mxu2 %v4929_v61  ;;  %2310 = vmatpush.msrb.mxu1 %v4895_v28  ;;  %v5948_v28 = vld [vmem:[#allocation19_spill] sm:$0xff] }
0x20ce   :  { %2331 = vmatpush.msrb.mxu2 %v4935_v6  ;;  %2311 = vmatpush.msrb.mxu1 %v4915_v45 }
0x20d0   :  { %2332 = vmatpush.msrb.mxu2 %v4941_v9  ;;  %2312 = vmatpush.msrb.mxu1 %v4921_v43 }
0x20d2   :  { %2333 = vmatpush.msrb.mxu2 %v4947_v10  ;;  %2313 = vmatpush.msrb.mxu1 %v4925_v59 }
0x20d4   :  { %2334 = vmatpush.msrb.mxu2 %v4953_v13  ;;  %2314 = vmatpush.msrb.mxu1 %v4933_v5  ;;  %v5949_v13 = vld [vmem:[#allocation13_spill] sm:$0xff] }
0x20d6   :  { %2335 = vmatpush.msrb.mxu2 %v4959_v15  ;;  %2315 = vmatpush.msrb.mxu1 %v4939_v7 }
0x20d8   :  { %2336 = vmatpush.msrb.mxu2 %v4965_v29  ;;  %2316 = vmatpush.msrb.mxu1 %v4945_v24 }
0x20da   :  { %2337 = vmatpush.msrb.mxu2 %v4969_v3  ;;  %2317 = vmatpush.msrb.mxu1 %v4949_v11  ;;  %v2114_v3 = vld [vmem:[#allocation2 + $0x3f0] sm:$0xff] }
0x20db   :  { %2132 = vmatpush.msra.mxu3 %v2114_v3 }
0x20dc   :  { %2338 = vmatpush.msrb.mxu2 %v4971_v49  ;;  %2318 = vmatpush.msrb.mxu1 %v4957_v14  ;;  %v2113_v49 = vld [vmem:[#allocation2 + $0x3e0] sm:$0xff] }
0x20dd   :  { %2133 = vmatpush.msra.mxu3 %v2113_v49 }
0x20de   :  { %2339 = vmatpush.msrb.mxu2 %v4974_v4  ;;  %2319 = vmatpush.msrb.mxu1 %v4963_v16 }
0x20df   :  { %2134 = vmatpush.msra.mxu3 %v2112_v35 }
0x20e1   :  { %2135 = vmatpush.msra.mxu3 %v2111_v57 }
0x20e4   :  { %v1720_v27 = vpop.xlane.xlu2 %1719 }
0x20e5   :  { %v1721_v32 = vcvt.f32.s32 %v1720_v27  ;;  %v5950_v27 = vld [vmem:[#allocation16_spill] sm:$0xff] }
0x20e6   :  { %2240 = vmatpush.msrb.mxu3 %v5950_v27  ;;  %v5974_v27 = vmov 7  }
0x20e7   :  { %v1724_v33 = vadd.s32 %v1723_v36, %v1721_v32  ;;  %v5951_v36 = vld [vmem:[#allocation14_spill] sm:$0xff]  ;;  %v5952_v32 = vld [vmem:[#allocation17_spill] sm:$0xff] }
0x20e8   :  { %2241 = vmatpush.msrb.mxu3 %v5951_v36 }
0x20e9   :  { %vm1725_vm11 = vcmp.eq.s32.totalorder %v4369_v25, %v1724_v33  ;;  %v5953_v33 = vld [vmem:[#allocation15_spill] sm:$0xff] }
0x20ea   :  { %3950 = vmatmul.msk.f32.vlgmr.msra.gmra.mxu1 %vm1725_vm11, %v5901_v39  ;;  %3952 = vmatmul.msk.f32.vlgmr.msra.gmra.mxu2 %vm1725_vm11, %v5901_v39 }
0x20eb   :  { %2568 = vmatpush.msra.mxu1 %v2114_v3  ;;  %2242 = vmatpush.msrb.mxu3 %v5952_v32  ;;  %v5971_v3 = vmov 0  }
0x20ed   :  { %2569 = vmatpush.msra.mxu1 %v2113_v49  ;;  %2243 = vmatpush.msrb.mxu3 %v5953_v33  ;;  %v5972_v49 = vmov 4   ;;  %v5975_v33 = vmov 3  }
0x20ef   :  { %2570 = vmatpush.msra.mxu1 %v2112_v35  ;;  %v5973_v35 = vmov 6  }
0x20f1   :  { %2571 = vmatpush.msra.mxu1 %v2111_v57 }
0x213c   :  { %v2006_v40 = vpop.f32.mrf.mxu1 }
0x2167   :  { %v2050_v54 = vpop.f32.mrf.mxu1 }
0x2168   :  { %v2051_v38 = vadd.f32 %v2050_v54, %v5948_v28 }
0x216a   :  { %v2053_v50 = vadd.f32 %v2051_v38, %v2006_v40 }
0x216c   :  { %4188 = vtanh.f32 %v2053_v50  ;;  %v3951_v44 = vmul.f32 -1.442695, %v2053_v50 }
0x216e   :  { %4190 = vpow2.f32 %v3951_v44 }
0x2172   :  { %v4189_v18 = vpop.eup %4188 }
0x2173   :  { %2076 = vrot.lane.b32.xlu1 %v4189_v18, %s4291_s17 }
0x2174   :  { %v4191_v45 = vpop.eup %4190 }
0x2175   :  { %v2057_v53 = vadd.f32 1.0, %v4191_v45 }
0x2177   :  { %4192 = vrcp.f32 %v2057_v53  ;;  %v2069_v5 = vand.u32 2147483648, %v2057_v53  ;;  %vm2063_vm14 = vweird.f32 %v2057_v53  ;;  %v2067_v6 = vand.u32 2147483647, %v2057_v53 }
0x2179   :  { %v2070_v9 = vor.u32 1.1754944e-38, %v2069_v5  ;;  %vm2068_vm0 = vcmp.eq.f32.partialorder %v2067_v6, 8.507059e+37 }
0x217d   :  { %v4193_v4 = vpop.eup %4192 }
0x217e   :  { %v2059_v43 = vmul.f32 %v4193_v4, %v2057_v53  ;;  %vm2064_vm12 = vweird.f32 %v4193_v4 }
0x217f   :  { %vm2065_vm15 = vmor %vm2063_vm14, %vm2064_vm12 }
0x2180   :  { %v2060_v51 = vsub.f32 1.0, %v2059_v43 }
0x2182   :  { %v2061_v59 = vmul.f32 %v4193_v4, %v2060_v51 }
0x2184   :  { %v2062_v61 = vadd.f32 %v4193_v4, %v2061_v59 }
0x2186   :  { %v2066_v7 = vsel %vm2065_vm15, %v4193_v4, %v2062_v61 }
0x2187   :  { %v2071_v10 = vsel %vm2068_vm0, %v2070_v9, %v2066_v7 }
0x2188   :  { %v2074_v14 = vmul.f32 %v2071_v10, %v5949_v13 }
0x21e5   :  { %v2077_v24 = vpop.permute.xlu1 %2076 }
0x21e6   :  { %v2079_v11 = vmul.f32 %v2077_v24, %v2071_v10 }
0x21e8   :  { %2081 = vrot.lane.b32.xlu1 %v2079_v11, %s4292_s18 }
0x225a   :  { %v2082_v15 = vpop.permute.xlu1 %2081 }
0x225b   :  { %v5182_v16 = vadd.f32 %v2082_v15, %v2074_v14  ;;  %v5968_v14 = vmov 5   ;;  %v5969_v15 = vmov 1  }
0x225d   :  { %4194 = vtanh.f32 %v5182_v16 }
0x2263   :  { %v4195_v29 = vpop.eup %4194 }
0x2264   :  { %2087 = vrot.lane.b32.xlu1 %v4195_v29, %s4291_s17  ;;  %v5970_v29 = vmov 2  }
0x22d6   :  { %v2088_v40 = vpop.permute.xlu1 %2087 }
0x22d7   :  { %v2090_v54 = vmul.f32 %v2088_v40, %v2071_v10 }
0x22d9   :  { %2116 = vrot.lane.b32.xlu1 %v2090_v54, %s4292_s18 }
0x234b   :  { %v2117_v28 = vpop.permute.xlu1 %2116 }
0x234c   :  { %3953 = vmatmul.msk.f32.vlgmr.msra.gmra.mxu3 %vm182_vm5, %v2117_v28  ;;  %3956 = vmatmul.msk.f32.vlgmr.msra.gmra.mxu0 %vm182_vm5, %v2117_v28 }
0x234d   :  { %2437 = vmatpush.msra.mxu3 %v5017_v60  ;;  %2461 = vmatpush.msra.mxu0 %v5019_v34  ;;  %v5954_v60 = vld [vmem:[#allocation18_spill] sm:$0xff]  ;;  %v5955_v34 = vld [vmem:[#allocation21_spill] sm:$0xff] }
0x234f   :  { %2438 = vmatpush.msra.mxu3 %v5021_v56  ;;  %2462 = vmatpush.msra.mxu0 %v5025_v41  ;;  %v5956_v56 = vld [vmem:[#allocation20_spill] sm:$0xff]  ;;  %v5957_v41 = vld [vmem:[#allocation23_spill] sm:$0xff] }
0x2351   :  { %2439 = vmatpush.msra.mxu3 %v5027_v37  ;;  %2463 = vmatpush.msra.mxu0 %v5029_v58  ;;  %v5958_v37 = vld [vmem:[#allocation22_spill] sm:$0xff]  ;;  %v5959_v58 = vld [vmem:[#allocation25_spill] sm:$0xff] }
0x2353   :  { %2440 = vmatpush.msra.mxu3 %v5033_v52  ;;  %2464 = vmatpush.msra.mxu0 %v5035_v23  ;;  %v5960_v52 = vld [vmem:[#allocation24_spill] sm:$0xff]  ;;  %v5961_v23 = vld [vmem:[#allocation26_spill] sm:$0xff] }
0x2354   :  { %3957 = vmatmul.msk.f32.vlgmr.msrb.gmra.mxu3 %vm182_vm5, %v2117_v28  ;;  %3958 = vmatmul.msk.f32.vlgmr.msrb.gmra.mxu0 %vm182_vm5, %v2117_v28 }
0x2355   :  { %2469 = vmatpush.msrb.mxu3 %v5044_v30  ;;  %2527 = vmatpush.msrb.mxu0 %v5046_v26  ;;  %v5962_v30 = vld [vmem:[#allocation29_spill] sm:$0xff]  ;;  %v5963_v26 = vld [vmem:[#allocation30_spill] sm:$0xff] }
0x2357   :  { %2470 = vmatpush.msrb.mxu3 %v5048_v2  ;;  %2528 = vmatpush.msrb.mxu0 %v5052_v0  ;;  %v5964_v2 = vld [vmem:[#allocation31_spill] sm:$0xff]  ;;  %v5965_v0 = vld [vmem:[#allocation32_spill] sm:$0xff] }
0x2359   :  { %2471 = vmatpush.msrb.mxu3 %v5054_v21  ;;  %2529 = vmatpush.msrb.mxu0 %v5056_v62 }
0x235b   :  { %2472 = vmatpush.msrb.mxu3 %v5060_v31  ;;  %2530 = vmatpush.msrb.mxu0 %v5062_v19 }
0x235d   :  { %2473 = vmatpush.msrb.mxu3 %v5066_v63  ;;  %2531 = vmatpush.msrb.mxu0 %v5068_v46 }
0x235f   :  { %2474 = vmatpush.msrb.mxu3 %v5072_v8  ;;  %2532 = vmatpush.msrb.mxu0 %v5074_v1 }
0x2361   :  { %2475 = vmatpush.msrb.mxu3 %v5954_v60  ;;  %2533 = vmatpush.msrb.mxu0 %v5955_v34 }
0x2363   :  { %2476 = vmatpush.msrb.mxu3 %v5956_v56  ;;  %2534 = vmatpush.msrb.mxu0 %v5957_v41  ;;  %v5976_v56 = vld [vmem:[#allocation6_spill] sm:$0xff] }
0x2365   :  { %2477 = vmatpush.msrb.mxu3 %v5958_v37  ;;  %2535 = vmatpush.msrb.mxu0 %v5092_v17  ;;  %v5977_v37 = vld [vmem:[#allocation5_spill] sm:$0xff] }
0x2367   :  { %2478 = vmatpush.msrb.mxu3 %v5096_v12  ;;  %2536 = vmatpush.msrb.mxu0 %v5959_v58  ;;  %v2030_v12 = vpop.f32.mrf.mxu2 }
0x2369   :  { %2479 = vmatpush.msrb.mxu3 %v5960_v52  ;;  %2537 = vmatpush.msrb.mxu0 %v5961_v23  ;;  %v5978_v23 = vld [vmem:[#allocation7_spill] sm:$0xff] }
0x236b   :  { %2480 = vmatpush.msrb.mxu3 %v5962_v30  ;;  %2538 = vmatpush.msrb.mxu0 %v5963_v26 }
0x236d   :  { %2481 = vmatpush.msrb.mxu3 %v5964_v2  ;;  %2539 = vmatpush.msrb.mxu0 %v5965_v0  ;;  %v5979_v0 = vld [vmem:[#allocation8_spill] sm:$0xff] }
0x236f   :  { %2482 = vmatpush.msrb.mxu3 %v5124_v42  ;;  %2540 = vmatpush.msrb.mxu0 %v5126_v47  ;;  %v2108_v21 = vpop.f32.mrf.mxu2  ;;  %v5966_v42 = vld [vmem:[#allocation28_spill] sm:$0xff] }
0x2370   :  { %v2109_v62 = vadd.f32 %v2108_v21, %v2030_v12 }
0x2371   :  { %2483 = vmatpush.msrb.mxu3 %v5130_v48  ;;  %2541 = vmatpush.msrb.mxu0 %v5132_v55 }
0x2373   :  { %2484 = vmatpush.msrb.mxu3 %v5136_v22  ;;  %2542 = vmatpush.msrb.mxu0 %v5138_v20  ;;  %v5967_v22 = vld [vmem:[#allocation27_spill] sm:$0xff] }
0x23c9   :  { %v5235_v17 = vpop.f32.mrf.mxu0 }
0x23cf   :  { %v2137_v31 = vpop.f32.mrf.mxu3 }
0x23d0   :  { %v2140_v19 = vadd.f32 %v2137_v31, %v2109_v62  ;;  %v5980_v62 = vld [vmem:[#allocation9_spill] sm:$0xff] }
0x23d1   :  { %v2265_v63 = vpop.f32.mrf.mxu0 }
0x23d2   :  { %3954 = vst [vmem:[%s5759_s2 + $0x10] sm:$0xff] %v2140_v19  ;;  %v2269_v48 = vadd.f32 %v2265_v63, %v5966_v42  ;;  %2143 = vmax.xlane.f32.xlu2 %v2140_v19 }
0x23d4   :  { %4196 = vtanh.f32 %v2269_v48 }
0x23d7   :  { %v2245_v55 = vpop.f32.mrf.mxu3 }
0x23d8   :  { %v2268_v46 = vadd.f32 %v2245_v55, %v5967_v22  ;;  %v5981_v55 = vld [vmem:[#allocation10_spill] sm:$0xff] }
0x23da   :  { %v4197_v20 = vpop.eup %4196  ;;  %4198 = vtanh.f32 %v2268_v46 }
0x23db   :  { %2340 = vmatmul.f32.vlgmr.msrb.gmra.mxu2 %v4197_v20  ;;  %v5982_v20 = vld [vmem:[#allocation11_spill] sm:$0xff] }
0x23e0   :  { %v4199_v8 = vpop.eup %4198 }
0x23e1   :  { %2320 = vmatmul.f32.vlgmr.msrb.gmra.mxu1 %v4199_v8 }
0x2445   :  { %v2144_v57 = vpop.xlane.xlu2 %2143 }
0x2446   :  { %vm2145_vm6 = vcmp.eq.f32.partialorder %v2140_v19, %v2144_v57 }
0x2447   :  { %v2146_v36 = vsel %vm2145_vm6, %v4369_v25, 128 }
0x2448   :  { %v2148_v32 = vshra.s32 %v2146_v36, 16 }
0x244a   :  { %v2150_v40 = vcvt.s32.f32 %v2148_v32 }
0x245e   :  { %v2321_v1 = vpop.f32.mrf.mxu1  ;;  %v2341_v47 = vpop.f32.mrf.mxu2 }
0x245f   :  { %v2342_v38 = vadd.f32 %v2341_v47, %v2321_v1 }
0x2461   :  { %v2344_v50 = vsel %vm1036_vm13, %v2342_v38, -inf }
0x2462   :  { %2345 = vmax.xlane.f32.xlu0 %v2344_v50  ;;  %v5983_v50 = vld [vmem:[#allocation12_spill] sm:$0xff] }
0x24d5   :  { %v2346_v18 = vpop.xlane.xlu0 %2345 }
0x24d6   :  { %v2347_v44 = vsub.f32 %v2342_v38, %v2346_v18 }
0x24d8   :  { %v2348_v45 = vmul.f32 1.442695, %v2347_v44 }
0x24da   :  { %4200 = vpow2.f32 %v2348_v45  ;;  %v2147_v45 = vand.u32 65535, %v2146_v36 }
0x24e0   :  { %v4201_v53 = vpop.eup %4200 }
0x24e1   :  { %v2350_v4 = vsel %vm1036_vm13, %v4201_v53, 0.0 }
0x24e2   :  { %2351 = vadd.xlane.f32.xlu1 %v2350_v4  ;;  %v2149_v4 = vcvt.s32.f32 %v2147_v45  ;;  %v5300_v45 = vld [vmem:[#allocation2 + $0x458] sm:$0xff] }
0x2555   :  { %v2352_v43 = vpop.xlane.xlu1 %2351 }
0x2556   :  { %4202 = vrcp.f32 %v2352_v43  ;;  %v2364_v5 = vand.u32 2147483648, %v2352_v43  ;;  %v2362_v7 = vand.u32 2147483647, %v2352_v43  ;;  %vm2358_vm2 = vweird.f32 %v2352_v43 }
0x2558   :  { %v2365_v24 = vor.u32 1.1754944e-38, %v2364_v5  ;;  %vm2363_vm4 = vcmp.eq.f32.partialorder %v2362_v7, 8.507059e+37 }
0x255c   :  { %v4203_v51 = vpop.eup %4202 }
0x255d   :  { %v2354_v59 = vmul.f32 %v4203_v51, %v2352_v43  ;;  %vm2359_vm1 = vweird.f32 %v4203_v51 }
0x255e   :  { %vm2360_vm3 = vmor %vm2358_vm2, %vm2359_vm1 }
0x255f   :  { %v2355_v61 = vsub.f32 1.0, %v2354_v59 }
0x2561   :  { %v2356_v6 = vmul.f32 %v4203_v51, %v2355_v61 }
0x2563   :  { %v2357_v9 = vadd.f32 %v4203_v51, %v2356_v6 }
0x2565   :  { %v2361_v10 = vsel %vm2360_vm3, %v4203_v51, %v2357_v9 }
0x2566   :  { %v2366_v11 = vsel %vm2363_vm4, %v2365_v24, %v2361_v10 }
0x2567   :  { %v2367_v13 = vmul.f32 %v4201_v53, %v2366_v11 }
0x2569   :  { %2387 = vperm.xlu1 %4048, %v2367_v13   ;;  %2370 = vperm.xlu0 %4053, %v2367_v13  }
0x256a   :  { %2375 = vperm.xlu2 %4054, %v2367_v13  }
0x2571   :  { %4057 = vset.pattern.permute.xlu0 %v5968_v14  ;;  %4061 = vset.pattern.permute.xlu1 %v5969_v15 }
0x2572   :  { %4055 = vset.pattern.permute.xlu2 %v5970_v29  ;;  %2399 = vperm.xlu0 %4057, %v2367_v13  }
0x2573   :  { %2381 = vperm.xlu2 %4055, %v2367_v13  }
0x257a   :  { %4060 = vset.pattern.permute.xlu0 %v5971_v3 }
0x257b   :  { %4056 = vset.pattern.permute.xlu2 %v5972_v49 }
0x257c   :  { %2393 = vperm.xlu2 %4056, %v2367_v13  }
0x2584   :  { %4058 = vset.pattern.permute.xlu2 %v5973_v35 }
0x2585   :  { %2405 = vperm.xlu2 %4058, %v2367_v13  }
0x258d   :  { %4059 = vset.pattern.permute.xlu2 %v5974_v27 }
0x258e   :  { %2411 = vperm.xlu2 %4059, %v2367_v13  }
0x2596   :  { %4063 = vset.pattern.permute.xlu2 %v5975_v33 }
0x259c   :  { %2151 = vmin.xlane.f32.xlu0 %v2150_v40 }
0x25c4   :  { %v2376_v54 = vpop.permute.xlu2 %2375 }
0x25c5   :  { %v2378_v41 = vmul.f32 %v2376_v54, %v5976_v56 }
0x25cd   :  { %v2382_v28 = vpop.permute.xlu2 %2381 }
0x25ce   :  { %v2384_v30 = vmul.f32 %v2382_v28, %v5978_v23 }
0x25d6   :  { %v2394_v60 = vpop.permute.xlu2 %2393 }
0x25d7   :  { %v2396_v31 = vmul.f32 %v2394_v60, %v5980_v62 }
0x25db   :  { %v2371_v34 = vpop.permute.xlu0 %2370  ;;  %v2388_v52 = vpop.permute.xlu1 %2387 }
0x25dc   :  { %v2373_v58 = vmul.f32 %v2371_v34, %v5977_v37  ;;  %v2390_v12 = vmul.f32 %v2388_v52, %v5979_v0 }
0x25de   :  { %v2379_v26 = vadd.f32 %v2378_v41, %v2373_v58 }
0x25df   :  { %v2406_v2 = vpop.permute.xlu2 %2405 }
0x25e0   :  { %v2385_v21 = vadd.f32 %v2384_v30, %v2379_v26  ;;  %v2408_v8 = vmul.f32 %v2406_v2, %v5982_v20 }
0x25e2   :  { %v2391_v19 = vadd.f32 %v2390_v12, %v2385_v21 }
0x25e4   :  { %v2400_v63 = vpop.permute.xlu0 %2399  ;;  %v2397_v48 = vadd.f32 %v2396_v31, %v2391_v19  ;;  %v5275_v19 = vld [vmem:[#allocation2 + $0x370] sm:$0xff] }
0x25e5   :  { %v2402_v46 = vmul.f32 %v2400_v63, %v5981_v55  ;;  %v5277_v63 = vld [vmem:[#allocation2 + $0x360] sm:$0xff]  ;;  %2648 = vmatpush.msra.mxu2 %v5275_v19 }
0x25e7   :  { %v2403_v1 = vadd.f32 %v2402_v46, %v2397_v48  ;;  %v5280_v48 = vld [vmem:[#allocation2 + $0x350] sm:$0xff]  ;;  %2649 = vmatpush.msra.mxu2 %v5277_v63  ;;  %v5283_v46 = vld [vmem:[#allocation2 + $0x340] sm:$0xff] }
0x25e8   :  { %v2412_v47 = vpop.permute.xlu2 %2411 }
0x25e9   :  { %v2409_v38 = vadd.f32 %v2408_v8, %v2403_v1  ;;  %v2414_v18 = vmul.f32 %v2412_v47, %v5983_v50  ;;  %2650 = vmatpush.msra.mxu2 %v5280_v48  ;;  %v5288_v1 = vld [vmem:[#allocation2 + $0x470] sm:$0xff]  ;;  %v5290_v47 = vld [vmem:[#allocation2 + $0x478] sm:$0xff] }
0x25ea   :  { %5985 = vst [vmem:[#allocation13_spill] sm:$0xff] %v5288_v1  ;;  %2676 = vmatpush.msrb.mxu1 %v5288_v1 }
0x25eb   :  { %v2415_v44 = vadd.f32 %v2414_v18, %v2409_v38  ;;  %2651 = vmatpush.msra.mxu2 %v5283_v46  ;;  %v5292_v38 = vld [vmem:[#allocation2 + $0x460] sm:$0xff]  ;;  %v5296_v18 = vld [vmem:[#allocation2 + $0x468] sm:$0xff] }
0x25ec   :  { %5986 = vst [vmem:[#allocation16_spill] sm:$0xff] %v5292_v38  ;;  %2677 = vmatpush.msrb.mxu1 %v5292_v38 }
0x25ed   :  { %2421 = vrot.lane.b32.xlu2 %v2415_v44, %s4292_s18  ;;  %2696 = vmatpush.msrb.mxu2 %v5290_v47  ;;  %v5298_v44 = vld [vmem:[#allocation2 + $0x450] sm:$0xff] }
0x25ee   :  { %5987 = vst [vmem:[#allocation14_spill] sm:$0xff] %v5298_v44  ;;  %2678 = vmatpush.msrb.mxu1 %v5298_v44 }
0x25ef   :  { %2697 = vmatpush.msrb.mxu2 %v5296_v18 }
0x25f1   :  { %2698 = vmatpush.msrb.mxu2 %v5300_v45 }
0x260f   :  { %v2152_v53 = vpop.xlane.xlu0 %2151 }
0x2610   :  { %vm2153_vm7 = vcmp.eq.f32.partialorder %v2150_v40, %v2152_v53  ;;  %v2158_v59 = vcvt.f32.s32 %v2152_v53  ;;  %v5304_v53 = vld [vmem:[#allocation2 + $0x440] sm:$0xff] }
0x2611   :  { %v2154_v43 = vsel %vm2153_vm7, %v2149_v4, inf  ;;  %5988 = vst [vmem:[#allocation17_spill] sm:$0xff] %v5304_v53  ;;  %v5306_v4 = vld [vmem:[#allocation2 + $0x448] sm:$0xff]  ;;  %2679 = vmatpush.msrb.mxu1 %v5304_v53  ;;  %v5408_v53 = vld [vmem:[#allocation2 + $0x780] sm:$0xff] }
0x2612   :  { %2155 = vmin.xlane.f32.xlu1 %v2154_v43  ;;  %v2159_v5 = vshll.u32 %v2158_v59, 16  ;;  %2699 = vmatpush.msrb.mxu2 %v5306_v4  ;;  %v5312_v43 = vld [vmem:[#allocation2 + $0x770] sm:$0xff] }
0x2613   :  { %v5317_v59 = vld [vmem:[#allocation2 + $0x870] sm:$0xff] }
0x2647   :  { %v2422_v51 = vpop.permute.xlu2 %2421 }
0x2648   :  { %3959 = vmatmul.msk.f32.vlgmr.msra.gmra.mxu3 %vm182_vm5, %v2422_v51  ;;  %3960 = vmatmul.msk.f32.vlgmr.msra.gmra.mxu0 %vm182_vm5, %v2422_v51  ;;  %v5314_v51 = vld [vmem:[#allocation2 + $0x760] sm:$0xff] }
0x2649   :  { %2740 = vmatpush.msra.mxu3 %v5312_v43  ;;  %2760 = vmatpush.msra.mxu0 %v5317_v59 }
0x264b   :  { %2741 = vmatpush.msra.mxu3 %v5314_v51 }
0x2685   :  { %v2156_v61 = vpop.xlane.xlu1 %2155 }
0x2686   :  { %v2157_v6 = vcvt.f32.s32 %v2156_v61  ;;  %v5319_v61 = vld [vmem:[#allocation2 + $0x750] sm:$0xff] }
0x2687   :  { %2742 = vmatpush.msra.mxu3 %v5319_v61 }
0x2688   :  { %v2160_v7 = vadd.s32 %v2159_v5, %v2157_v6  ;;  %v5322_v5 = vld [vmem:[#allocation2 + $0x860] sm:$0xff]  ;;  %v5325_v6 = vld [vmem:[#allocation2 + $0x850] sm:$0xff] }
0x2689   :  { %2761 = vmatpush.msra.mxu0 %v5322_v5 }
0x268a   :  { %vm2161_vm8 = vcmp.eq.s32.totalorder %v4369_v25, %v2160_v7  ;;  %v5327_v7 = vld [vmem:[#allocation2 + $0x740] sm:$0xff] }
0x268b   :  { %3961 = vmatmul.msk.f32.vlgmr.msrb.gmra.mxu3 %vm2161_vm8, %v5901_v39  ;;  %3963 = vmatmul.msk.f32.vlgmr.msrb.gmra.mxu0 %vm2161_vm8, %v5901_v39 }
0x268c   :  { %2762 = vmatpush.msra.mxu0 %v5325_v6  ;;  %2743 = vmatpush.msra.mxu3 %v5327_v7 }
0x26cb   :  { %v2442_v9 = vpop.f32.mrf.mxu3 }
0x270e   :  { %v2486_v24 = vpop.f32.mrf.mxu3 }
0x270f   :  { %v2487_v10 = vadd.f32 %v2486_v24, %v5235_v17  ;;  %v5333_v24 = vld [vmem:[#allocation2 + $0x730] sm:$0xff] }
0x2710   :  { %2744 = vmatpush.msra.mxu3 %v5333_v24 }
0x2711   :  { %v2489_v11 = vadd.f32 %v2487_v10, %v2442_v9  ;;  %v5331_v9 = vld [vmem:[#allocation2 + $0x840] sm:$0xff] }
0x2712   :  { %v5337_v10 = vld [vmem:[#allocation2 + $0x720] sm:$0xff]  ;;  %2763 = vmatpush.msra.mxu0 %v5331_v9 }
0x2713   :  { %4204 = vtanh.f32 %v2489_v11  ;;  %v3962_v57 = vmul.f32 -1.442695, %v2489_v11  ;;  %v5341_v11 = vld [vmem:[#allocation2 + $0x710] sm:$0xff]  ;;  %2745 = vmatpush.msra.mxu3 %v5337_v10 }
0x2715   :  { %4206 = vpow2.f32 %v3962_v57  ;;  %2746 = vmatpush.msra.mxu3 %v5341_v11  ;;  %v5349_v57 = vld [vmem:[#allocation2 + $0x700] sm:$0xff] }
0x2717   :  { %2747 = vmatpush.msra.mxu3 %v5349_v57 }
0x2719   :  { %v4205_v13 = vpop.eup %4204 }
0x271a   :  { %2512 = vrot.lane.b32.xlu2 %v4205_v13, %s4291_s17 }
0x271b   :  { %v4207_v36 = vpop.eup %4206 }
0x271c   :  { %v2493_v32 = vadd.f32 1.0, %v4207_v36  ;;  %v5351_v36 = vld [vmem:[#allocation2 + $0x830] sm:$0xff] }
0x271d   :  { %2764 = vmatpush.msra.mxu0 %v5351_v36 }
0x271e   :  { %4208 = vrcp.f32 %v2493_v32  ;;  %v2505_v34 = vand.u32 2147483648, %v2493_v32  ;;  %vm2499_vm10 = vweird.f32 %v2493_v32  ;;  %v2503_v41 = vand.u32 2147483647, %v2493_v32 }
0x2720   :  { %v2506_v58 = vor.u32 1.1754944e-38, %v2505_v34  ;;  %vm2504_vm12 = vcmp.eq.f32.partialorder %v2503_v41, 8.507059e+37  ;;  %v5373_v34 = vld [vmem:[#allocation2 + $0x6c0] sm:$0xff]  ;;  %v5375_v41 = vld [vmem:[#allocation2 + $0x7f0] sm:$0xff] }
0x2724   :  { %v4209_v33 = vpop.eup %4208 }
0x2725   :  { %v2495_v40 = vmul.f32 %v4209_v33, %v2493_v32  ;;  %vm2500_vm9 = vweird.f32 %v4209_v33  ;;  %v5355_v32 = vld [vmem:[#allocation2 + $0x6f0] sm:$0xff] }
0x2726   :  { %vm2501_vm11 = vmor %vm2499_vm10, %vm2500_vm9  ;;  %2748 = vmatpush.msra.mxu3 %v5355_v32 }
0x2727   :  { %v2496_v54 = vsub.f32 1.0, %v2495_v40  ;;  %v5359_v40 = vld [vmem:[#allocation2 + $0x6e0] sm:$0xff] }
0x2728   :  { %2749 = vmatpush.msra.mxu3 %v5359_v40 }
0x2729   :  { %v2497_v28 = vmul.f32 %v4209_v33, %v2496_v54  ;;  %v5363_v54 = vld [vmem:[#allocation2 + $0x810] sm:$0xff] }
0x272b   :  { %v2498_v60 = vadd.f32 %v4209_v33, %v2497_v28  ;;  %v5367_v28 = vld [vmem:[#allocation2 + $0x6d0] sm:$0xff] }
0x272c   :  { %2750 = vmatpush.msra.mxu3 %v5367_v28 }
0x272d   :  { %v2502_v17 = vsel %vm2501_vm11, %v4209_v33, %v2498_v60  ;;  %v5357_v33 = vld [vmem:[#allocation2 + $0x820] sm:$0xff] }
0x272e   :  { %v2507_v30 = vsel %vm2504_vm12, %v2506_v58, %v2502_v17  ;;  %2765 = vmatpush.msra.mxu0 %v5357_v33  ;;  %v5369_v60 = vld [vmem:[#allocation2 + $0x800] sm:$0xff]  ;;  %2751 = vmatpush.msra.mxu3 %v5373_v34  ;;  %v5379_v17 = vld [vmem:[#allocation2 + $0x6b0] sm:$0xff] }
0x272f   :  { %v2510_v2 = vmul.f32 %v2507_v30, %v5182_v16  ;;  %v5381_v58 = vld [vmem:[#allocation2 + $0x7e0] sm:$0xff] }
0x2730   :  { %2766 = vmatpush.msra.mxu0 %v5363_v54  ;;  %2752 = vmatpush.msra.mxu3 %v5379_v17 }
0x2732   :  { %2767 = vmatpush.msra.mxu0 %v5369_v60 }
0x2734   :  { %2768 = vmatpush.msra.mxu0 %v5375_v41 }
0x2736   :  { %2769 = vmatpush.msra.mxu0 %v5381_v58 }
0x2774   :  { %v2513_v52 = vpop.permute.xlu2 %2512 }
0x2775   :  { %v2515_v26 = vmul.f32 %v2513_v52, %v2507_v30  ;;  %v5383_v52 = vld [vmem:[#allocation2 + $0x6a0] sm:$0xff] }
0x2776   :  { %2753 = vmatpush.msra.mxu3 %v5383_v52 }
0x2777   :  { %2517 = vrot.lane.b32.xlu2 %v2515_v26, %s4292_s18  ;;  %v5391_v26 = vld [vmem:[#allocation2 + $0x690] sm:$0xff] }
0x2778   :  { %2754 = vmatpush.msra.mxu3 %v5391_v26 }
0x27d1   :  { %v2518_v12 = vpop.permute.xlu2 %2517 }
0x27d2   :  { %v5271_v21 = vadd.f32 %v2518_v12, %v2510_v2  ;;  %v5393_v2 = vld [vmem:[#allocation2 + $0x7c0] sm:$0xff] }
0x27d3   :  { %v5397_v12 = vld [vmem:[#allocation2 + $0x680] sm:$0xff] }
0x27d4   :  { %5984 = vst [vmem:[#allocation19_spill] sm:$0xff] %v5271_v21  ;;  %4210 = vtanh.f32 %v5271_v21  ;;  %2755 = vmatpush.msra.mxu3 %v5397_v12 }
0x27da   :  { %v4211_v31 = vpop.eup %4210 }
0x27db   :  { %2523 = vrot.lane.b32.xlu2 %v4211_v31, %s4291_s17  ;;  %v5399_v31 = vld [vmem:[#allocation2 + $0x7b0] sm:$0xff] }
0x2835   :  { %v2524_v16 = vpop.permute.xlu2 %2523 }
0x2836   :  { %v2526_v8 = vmul.f32 %v2524_v16, %v2507_v30  ;;  %v5387_v30 = vld [vmem:[#allocation2 + $0x7d0] sm:$0xff]  ;;  %v5403_v16 = vld [vmem:[#allocation2 + $0x7a0] sm:$0xff] }
0x2837   :  { %2770 = vmatpush.msra.mxu0 %v5387_v30 }
0x2838   :  { %2552 = vrot.lane.b32.xlu2 %v2526_v8, %s4292_s18  ;;  %v5405_v8 = vld [vmem:[#allocation2 + $0x790] sm:$0xff] }
0x2839   :  { %2771 = vmatpush.msra.mxu0 %v5393_v2 }
0x283b   :  { %2772 = vmatpush.msra.mxu0 %v5399_v31 }
0x283d   :  { %2773 = vmatpush.msra.mxu0 %v5403_v16 }
0x283f   :  { %2774 = vmatpush.msra.mxu0 %v5405_v8 }
0x2841   :  { %2775 = vmatpush.msra.mxu0 %v5408_v53 }
0x2843   :  { %3084 = vmatpush.msrb.mxu0 %v5275_v19 }
0x2845   :  { %3085 = vmatpush.msrb.mxu0 %v5277_v63 }
0x2847   :  { %3086 = vmatpush.msrb.mxu0 %v5280_v48 }
0x2849   :  { %3087 = vmatpush.msrb.mxu0 %v5283_v46 }
0x2892   :  { %v2553_v13 = vpop.permute.xlu2 %2552 }
0x2893   :  { %3964 = vmatmul.msk.f32.vlgmr.msra.gmra.mxu1 %vm182_vm5, %v2553_v13  ;;  %3967 = vmatmul.msk.f32.vlgmr.msra.gmra.mxu2 %vm182_vm5, %v2553_v13 }
0x289b   :  { %3968 = vmatmul.msk.f32.vlgmr.msrb.gmra.mxu1 %vm182_vm5, %v2553_v13  ;;  %3969 = vmatmul.msk.f32.vlgmr.msrb.gmra.mxu2 %vm182_vm5, %v2553_v13  ;;  %v2466_v13 = vpop.f32.mrf.mxu0 }
0x28a3   :  { %v2544_v44 = vpop.f32.mrf.mxu0 }
0x28a4   :  { %v2545_v38 = vadd.f32 %v2544_v44, %v2466_v13 }
0x2910   :  { %v2573_v1 = vpop.f32.mrf.mxu1 }
0x2911   :  { %v5416_v21 = vadd.f32 %v2573_v1, %v2545_v38 }
0x2913   :  { %3965 = vst [vmem:[%s5759_s2 + $0x18] sm:$0xff] %v5416_v21  ;;  %2579 = vmax.xlane.f32.xlu1 %v5416_v21 }
0x2916   :  { %v5423_v39 = vpop.f32.mrf.mxu2 }
0x2917   :  { %5989 = vst [vmem:[#allocation15_spill] sm:$0xff] %v5423_v39 }
0x2918   :  { %v2681_v19 = vpop.f32.mrf.mxu1 }
0x2919   :  { %v2704_v63 = vadd.f32 %v2681_v19, %v5967_v22 }
0x291b   :  { %4212 = vtanh.f32 %v2704_v63 }
0x291e   :  { %v2701_v48 = vpop.f32.mrf.mxu2 }
0x291f   :  { %v2705_v44 = vadd.f32 %v2701_v48, %v5966_v42 }
0x2921   :  { %v4213_v46 = vpop.eup %4212  ;;  %4214 = vtanh.f32 %v2705_v44 }
0x2922   :  { %2756 = vmatmul.f32.vlgmr.msra.gmra.mxu3 %v4213_v46 }
0x2927   :  { %v4215_v1 = vpop.eup %4214 }
0x2928   :  { %2776 = vmatmul.f32.vlgmr.msra.gmra.mxu0 %v4215_v1 }
0x2929   :  { %3132 = vmatpush.msra.mxu0 %v5290_v47 }
0x292b   :  { %3133 = vmatpush.msra.mxu0 %v5296_v18 }
0x292d   :  { %3134 = vmatpush.msra.mxu0 %v5300_v45 }
0x292f   :  { %3135 = vmatpush.msra.mxu0 %v5306_v4 }
0x29a5   :  { %v2757_v38 = vpop.f32.mrf.mxu3  ;;  %v2777_v13 = vpop.f32.mrf.mxu0 }
0x29a6   :  { %v2778_v19 = vadd.f32 %v2777_v13, %v2757_v38 }
0x29a8   :  { %v2780_v63 = vsel %vm1036_vm13, %v2778_v19, -inf }
0x29a9   :  { %2781 = vmax.xlane.f32.xlu0 %v2780_v63 }
0x2a1c   :  { %v2782_v48 = vpop.xlane.xlu0 %2781 }
0x2a1d   :  { %v2783_v22 = vsub.f32 %v2778_v19, %v2782_v48 }
0x2a1f   :  { %v2784_v44 = vmul.f32 1.442695, %v2783_v22 }
0x2a21   :  { %4216 = vpow2.f32 %v2784_v44 }
0x2a27   :  { %v4217_v46 = vpop.eup %4216 }
0x2a28   :  { %v2786_v1 = vsel %vm1036_vm13, %v4217_v46, 0.0 }
0x2a29   :  { %2787 = vadd.xlane.f32.xlu2 %v2786_v1 }
0x2a9c   :  { %v2788_v47 = vpop.xlane.xlu2 %2787 }
0x2a9d   :  { %4218 = vrcp.f32 %v2788_v47  ;;  %v2800_v4 = vand.u32 2147483648, %v2788_v47  ;;  %v2798_v38 = vand.u32 2147483647, %v2788_v47  ;;  %vm2794_vm15 = vweird.f32 %v2788_v47 }
0x2a9f   :  { %v2801_v63 = vor.u32 1.1754944e-38, %v2800_v4  ;;  %vm2799_vm1 = vcmp.eq.f32.partialorder %v2798_v38, 8.507059e+37 }
0x2aa3   :  { %v4219_v18 = vpop.eup %4218 }
0x2aa4   :  { %v2790_v45 = vmul.f32 %v4219_v18, %v2788_v47  ;;  %vm2795_vm14 = vweird.f32 %v4219_v18 }
0x2aa5   :  { %vm2796_vm0 = vmor %vm2794_vm15, %vm2795_vm14 }
0x2aa6   :  { %v2791_v42 = vsub.f32 1.0, %v2790_v45 }
0x2aa8   :  { %v2792_v39 = vmul.f32 %v4219_v18, %v2791_v42 }
0x2aaa   :  { %v2793_v13 = vadd.f32 %v4219_v18, %v2792_v39  ;;  %v2580_v39 = vpop.xlane.xlu1 %2579 }
0x2aab   :  { %vm2581_vm2 = vcmp.eq.f32.partialorder %v5416_v21, %v2580_v39  ;;  %v5447_v21 = vld [vmem:[#allocation2 + $0x430] sm:$0xff] }
0x2aac   :  { %v2797_v19 = vsel %vm2796_vm0, %v4219_v18, %v2793_v13  ;;  %v2582_v42 = vsel %vm2581_vm2, %v4369_v25, 128  ;;  %2897 = vmatpush.msra.mxu2 %v5447_v21 }
0x2aad   :  { %v2802_v22 = vsel %vm2799_vm1, %v2801_v63, %v2797_v19  ;;  %v2584_v44 = vshra.s32 %v2582_v42, 16  ;;  %v5445_v63 = vld [vmem:[#allocation2 + $0x3b0] sm:$0xff]  ;;  %v5449_v19 = vld [vmem:[#allocation2 + $0x3a0] sm:$0xff] }
0x2aae   :  { %v2803_v48 = vmul.f32 %v4217_v46, %v2802_v22  ;;  %2873 = vmatpush.msra.mxu1 %v5445_v63 }
0x2aaf   :  { %v2586_v46 = vcvt.s32.f32 %v2584_v44  ;;  %v5455_v44 = vld [vmem:[#allocation2 + $0x390] sm:$0xff] }
0x2ab0   :  { %2823 = vperm.xlu2 %4063, %v2803_v48   ;;  %2806 = vperm.xlu0 %4060, %v2803_v48  }
0x2ab1   :  { %2811 = vperm.xlu1 %4061, %v2803_v48   ;;  %2874 = vmatpush.msra.mxu1 %v5449_v19 }
0x2ab3   :  { %2875 = vmatpush.msra.mxu1 %v5455_v44 }
0x2ab8   :  { %4065 = vset.pattern.permute.xlu0 %v5968_v14  ;;  %v5538_v14 = vld [vmem:[#allocation2 + $0x250] sm:$0xff] }
0x2ab9   :  { %4062 = vset.pattern.permute.xlu1 %v5970_v29  ;;  %2835 = vperm.xlu0 %4065, %v2803_v48   ;;  %v5536_v29 = vld [vmem:[#allocation2 + $0x150] sm:$0xff]  ;;  %5996 = vst [vmem:[#allocation24_spill] sm:$0xff] %v5538_v14 }
0x2aba   :  { %2817 = vperm.xlu1 %4062, %v2803_v48   ;;  %5995 = vst [vmem:[#allocation25_spill] sm:$0xff] %v5536_v29 }
0x2ac1   :  { %4068 = vset.pattern.permute.xlu0 %v5971_v3 }
0x2ac2   :  { %4064 = vset.pattern.permute.xlu1 %v5972_v49  ;;  %v2583_v49 = vand.u32 65535, %v2582_v42  ;;  %v5506_v42 = vld [vmem:[#allocation2 + $0x1a0] sm:$0xff] }
0x2ac3   :  { %2829 = vperm.xlu1 %4064, %v2803_v48  }
0x2acb   :  { %4066 = vset.pattern.permute.xlu1 %v5973_v35 }
0x2acc   :  { %2841 = vperm.xlu1 %4066, %v2803_v48  }
0x2ad4   :  { %4067 = vset.pattern.permute.xlu1 %v5974_v27 }
0x2ad5   :  { %2847 = vperm.xlu1 %4067, %v2803_v48   ;;  %v5453_v48 = vld [vmem:[#allocation2 + $0x420] sm:$0xff] }
0x2ad6   :  { %2898 = vmatpush.msra.mxu2 %v5453_v48 }
0x2add   :  { %4069 = vset.pattern.permute.xlu1 %v5969_v15 }
0x2ae3   :  { %2587 = vmin.xlane.f32.xlu0 %v2586_v46 }
0x2b0a   :  { %v2824_v39 = vpop.permute.xlu2 %2823 }
0x2b22   :  { %v2807_v18 = vpop.permute.xlu0 %2806 }
0x2b23   :  { %v2812_v1 = vpop.permute.xlu1 %2811  ;;  %v2809_v4 = vmul.f32 %v2807_v18, %v5977_v37  ;;  %v5457_v18 = vld [vmem:[#allocation2 + $0x410] sm:$0xff] }
0x2b24   :  { %v2814_v38 = vmul.f32 %v2812_v1, %v5976_v56  ;;  %2899 = vmatpush.msra.mxu2 %v5457_v18 }
0x2b26   :  { %v2815_v22 = vadd.f32 %v2814_v38, %v2809_v4  ;;  %v2826_v4 = vmul.f32 %v2824_v39, %v5979_v0 }
0x2b2c   :  { %v2818_v47 = vpop.permute.xlu1 %2817 }
0x2b2d   :  { %v2820_v13 = vmul.f32 %v2818_v47, %v5978_v23  ;;  %v5461_v47 = vld [vmem:[#allocation2 + $0x380] sm:$0xff] }
0x2b2e   :  { %v5463_v23 = vld [vmem:[#allocation2 + $0x400] sm:$0xff]  ;;  %2876 = vmatpush.msra.mxu1 %v5461_v47 }
0x2b2f   :  { %v2821_v1 = vadd.f32 %v2820_v13, %v2815_v22  ;;  %2900 = vmatpush.msra.mxu2 %v5463_v23  ;;  %v2836_v13 = vpop.permute.xlu0 %2835 }
0x2b30   :  { %v2838_v15 = vmul.f32 %v2836_v13, %v5981_v55  ;;  %v5512_v13 = vld [vmem:[#allocation2 + $0x190] sm:$0xff]  ;;  %v5532_v55 = vld [vmem:[#allocation2 + $0x260] sm:$0xff] }
0x2b31   :  { %v2827_v37 = vadd.f32 %v2826_v4, %v2821_v1  ;;  %v2585_v4 = vcvt.s32.f32 %v2583_v49  ;;  %v5496_v49 = vld [vmem:[#allocation2 + $0x2c0] sm:$0xff]  ;;  %5994 = vst [vmem:[#allocation22_spill] sm:$0xff] %v5532_v55 }
0x2b35   :  { %v2830_v45 = vpop.permute.xlu1 %2829 }
0x2b36   :  { %v2832_v38 = vmul.f32 %v2830_v45, %v5980_v62 }
0x2b38   :  { %v2833_v22 = vadd.f32 %v2832_v38, %v2827_v37  ;;  %v5478_v37 = vld [vmem:[#allocation2 + $0x1f0] sm:$0xff] }
0x2b39   :  { %v5480_v38 = vld [vmem:[#allocation2 + $0x2f0] sm:$0xff]  ;;  %2905 = vmatpush.msrb.mxu1 %v5478_v37 }
0x2b3a   :  { %v2839_v35 = vadd.f32 %v2838_v15, %v2833_v22  ;;  %v5482_v15 = vld [vmem:[#allocation2 + $0x1e0] sm:$0xff]  ;;  %2963 = vmatpush.msrb.mxu2 %v5480_v38  ;;  %v5514_v22 = vld [vmem:[#allocation2 + $0x290] sm:$0xff] }
0x2b3b   :  { %2906 = vmatpush.msrb.mxu1 %v5482_v15  ;;  %5990 = vst [vmem:[#allocation18_spill] sm:$0xff] %v5514_v22 }
0x2b3e   :  { %v2842_v56 = vpop.permute.xlu1 %2841 }
0x2b3f   :  { %v2844_v27 = vmul.f32 %v2842_v56, %v5982_v20  ;;  %v5490_v56 = vld [vmem:[#allocation2 + $0x2d0] sm:$0xff]  ;;  %v5530_v20 = vld [vmem:[#allocation2 + $0x160] sm:$0xff] }
0x2b41   :  { %v2845_v0 = vadd.f32 %v2844_v27, %v2839_v35  ;;  %v5486_v35 = vld [vmem:[#allocation2 + $0x2e0] sm:$0xff]  ;;  %v5488_v27 = vld [vmem:[#allocation2 + $0x1d0] sm:$0xff] }
0x2b42   :  { %2964 = vmatpush.msrb.mxu2 %v5486_v35  ;;  %2907 = vmatpush.msrb.mxu1 %v5488_v27 }
0x2b44   :  { %2965 = vmatpush.msrb.mxu2 %v5490_v56 }
0x2b46   :  { %2966 = vmatpush.msrb.mxu2 %v5496_v49 }
0x2b47   :  { %v2848_v39 = vpop.permute.xlu1 %2847 }
0x2b48   :  { %v2850_v45 = vmul.f32 %v2848_v39, %v5983_v50  ;;  %v5518_v39 = vld [vmem:[#allocation2 + $0x180] sm:$0xff]  ;;  %v5526_v50 = vld [vmem:[#allocation2 + $0x270] sm:$0xff] }
0x2b49   :  { %5991 = vst [vmem:[#allocation21_spill] sm:$0xff] %v5518_v39 }
0x2b4a   :  { %v2851_v62 = vadd.f32 %v2850_v45, %v2845_v0  ;;  %v5500_v0 = vld [vmem:[#allocation2 + $0x1b0] sm:$0xff]  ;;  %v5520_v45 = vld [vmem:[#allocation2 + $0x280] sm:$0xff] }
0x2b4b   :  { %5992 = vst [vmem:[#allocation20_spill] sm:$0xff] %v5520_v45 }
0x2b4c   :  { %2857 = vrot.lane.b32.xlu2 %v2851_v62, %s4292_s18  ;;  %v5502_v62 = vld [vmem:[#allocation2 + $0x2b0] sm:$0xff] }
0x2b4d   :  { %2967 = vmatpush.msrb.mxu2 %v5502_v62 }
0x2b56   :  { %v5475_v1 = vpop.xlane.xlu0 %2587 }
0x2b57   :  { %vm2589_vm3 = vcmp.eq.f32.partialorder %v2586_v46, %v5475_v1  ;;  %v5508_v46 = vld [vmem:[#allocation2 + $0x2a0] sm:$0xff] }
0x2b58   :  { %v2590_v3 = vsel %vm2589_vm3, %v2585_v4, inf  ;;  %2968 = vmatpush.msrb.mxu2 %v5508_v46  ;;  %v5524_v4 = vld [vmem:[#allocation2 + $0x170] sm:$0xff] }
0x2b59   :  { %2591 = vmin.xlane.f32.xlu1 %v2590_v3  ;;  %v5494_v3 = vld [vmem:[#allocation2 + $0x1c0] sm:$0xff]  ;;  %5993 = vst [vmem:[#allocation23_spill] sm:$0xff] %v5524_v4 }
0x2b5a   :  { %2908 = vmatpush.msrb.mxu1 %v5494_v3  ;;  %2969 = vmatpush.msrb.mxu2 %v5514_v22  ;;  %v5542_v22 = vld [vmem:[#allocation2 + $0x140] sm:$0xff] }
0x2b5b   :  { %5997 = vst [vmem:[#allocation26_spill] sm:$0xff] %v5542_v22 }
0x2b5c   :  { %2909 = vmatpush.msrb.mxu1 %v5500_v0  ;;  %2970 = vmatpush.msrb.mxu2 %v5520_v45  ;;  %v5548_v45 = vld [vmem:[#allocation2 + $0x130] sm:$0xff] }
0x2b5d   :  { %5999 = vst [vmem:[#allocation30_spill] sm:$0xff] %v5548_v45 }
0x2b5e   :  { %2910 = vmatpush.msrb.mxu1 %v5506_v42  ;;  %2971 = vmatpush.msrb.mxu2 %v5526_v50 }
0x2b60   :  { %2911 = vmatpush.msrb.mxu1 %v5512_v13  ;;  %2972 = vmatpush.msrb.mxu2 %v5532_v55 }
0x2b62   :  { %2912 = vmatpush.msrb.mxu1 %v5518_v39  ;;  %v5544_v39 = vld [vmem:[#allocation2 + $0x240] sm:$0xff]  ;;  %2973 = vmatpush.msrb.mxu2 %v5538_v14 }
0x2b63   :  { %5998 = vst [vmem:[#allocation29_spill] sm:$0xff] %v5544_v39  ;;  %v5560_v14 = vld [vmem:[#allocation2 + $0x220] sm:$0xff] }
0x2b64   :  { %2913 = vmatpush.msrb.mxu1 %v5524_v4  ;;  %v5550_v4 = vld [vmem:[#allocation2 + $0x230] sm:$0xff]  ;;  %2974 = vmatpush.msrb.mxu2 %v5544_v39 }
0x2b65   :  { %6000 = vst [vmem:[#allocation31_spill] sm:$0xff] %v5550_v4  ;;  %v5566_v39 = vld [vmem:[#allocation2 + $0x210] sm:$0xff] }
0x2b66   :  { %2914 = vmatpush.msrb.mxu1 %v5530_v20  ;;  %2975 = vmatpush.msrb.mxu2 %v5550_v4  ;;  %v5570_v4 = vld [vmem:[#allocation2 + $0x100] sm:$0xff] }
0x2b68   :  { %2915 = vmatpush.msrb.mxu1 %v5536_v29  ;;  %v5558_v29 = vld [vmem:[#allocation2 + $0x120] sm:$0xff]  ;;  %2976 = vmatpush.msrb.mxu2 %v5560_v14 }
0x2b6a   :  { %2916 = vmatpush.msrb.mxu1 %v5542_v22  ;;  %v5564_v22 = vld [vmem:[#allocation2 + $0x110] sm:$0xff]  ;;  %2977 = vmatpush.msrb.mxu2 %v5566_v39 }
0x2b6c   :  { %2917 = vmatpush.msrb.mxu1 %v5548_v45  ;;  %v5572_v45 = vld [vmem:[#allocation2 + $0x200] sm:$0xff] }
0x2b6d   :  { %2978 = vmatpush.msrb.mxu2 %v5572_v45 }
0x2b6e   :  { %2918 = vmatpush.msrb.mxu1 %v5558_v29 }
0x2b70   :  { %2919 = vmatpush.msrb.mxu1 %v5564_v22 }
0x2b72   :  { %2920 = vmatpush.msrb.mxu1 %v5570_v4 }
0x2ba6   :  { %v2858_v55 = vpop.permute.xlu2 %2857 }
0x2ba7   :  { %3970 = vmatmul.msk.f32.vlgmr.msra.gmra.mxu1 %vm182_vm5, %v2858_v55  ;;  %3971 = vmatmul.msk.f32.vlgmr.msra.gmra.mxu2 %vm182_vm5, %v2858_v55  ;;  %v2594_v55 = vcvt.f32.s32 %v5475_v1  ;;  %v2985_v1 = vld [vmem:[#allocation2 + $0x3e0] sm:$0xff] }
0x2ba8   :  { %3196 = vmatpush.msra.mxu2 %v5317_v59  ;;  %3176 = vmatpush.msra.mxu1 %v5312_v43 }
0x2baa   :  { %3197 = vmatpush.msra.mxu2 %v5322_v5  ;;  %3177 = vmatpush.msra.mxu1 %v5314_v51  ;;  %v2595_v51 = vshll.u32 %v2594_v55, 16  ;;  %v6001_v5 = vmov 1.0   ;;  %v2984_v55 = vld [vmem:[#allocation2 + $0x3d0] sm:$0xff] }
0x2bac   :  { %3198 = vmatpush.msra.mxu2 %v5325_v6  ;;  %3178 = vmatpush.msra.mxu1 %v5319_v61 }
0x2bae   :  { %3199 = vmatpush.msra.mxu2 %v5331_v9  ;;  %3179 = vmatpush.msra.mxu1 %v5327_v7  ;;  %v6002_v9 = vld [vmem:[#allocation15_spill] sm:$0xff] }
0x2bb0   :  { %3200 = vmatpush.msra.mxu2 %v5351_v36  ;;  %3180 = vmatpush.msra.mxu1 %v5333_v24 }
0x2bb2   :  { %3201 = vmatpush.msra.mxu2 %v5357_v33  ;;  %3181 = vmatpush.msra.mxu1 %v5337_v10 }
0x2bb4   :  { %3202 = vmatpush.msra.mxu2 %v5363_v54  ;;  %3182 = vmatpush.msra.mxu1 %v5341_v11 }
0x2bb6   :  { %3203 = vmatpush.msra.mxu2 %v5369_v60  ;;  %3183 = vmatpush.msra.mxu1 %v5349_v57 }
0x2bb8   :  { %3204 = vmatpush.msra.mxu2 %v5375_v41  ;;  %3184 = vmatpush.msra.mxu1 %v5355_v32 }
0x2bba   :  { %3205 = vmatpush.msra.mxu2 %v5381_v58  ;;  %3185 = vmatpush.msra.mxu1 %v5359_v40 }
0x2bbc   :  { %3206 = vmatpush.msra.mxu2 %v5387_v30  ;;  %3186 = vmatpush.msra.mxu1 %v5367_v28 }
0x2bbe   :  { %3207 = vmatpush.msra.mxu2 %v5393_v2  ;;  %3187 = vmatpush.msra.mxu1 %v5373_v34 }
0x2bc0   :  { %3208 = vmatpush.msra.mxu2 %v5399_v31  ;;  %3188 = vmatpush.msra.mxu1 %v5379_v17 }
0x2bc2   :  { %3209 = vmatpush.msra.mxu2 %v5403_v16  ;;  %3189 = vmatpush.msra.mxu1 %v5383_v52 }
0x2bc4   :  { %3210 = vmatpush.msra.mxu2 %v5405_v8  ;;  %3190 = vmatpush.msra.mxu1 %v5391_v26  ;;  %v6003_v26 = vld [vmem:[#allocation19_spill] sm:$0xff] }
0x2bc5   :  { %v2986_v8 = vld [vmem:[#allocation2 + $0x3f0] sm:$0xff] }
0x2bc6   :  { %3211 = vmatpush.msra.mxu2 %v5408_v53  ;;  %3191 = vmatpush.msra.mxu1 %v5397_v12 }
0x2bc7   :  { %3004 = vmatpush.msrb.mxu3 %v2986_v8 }
0x2bc9   :  { %3005 = vmatpush.msrb.mxu3 %v2985_v1 }
0x2bcb   :  { %3006 = vmatpush.msrb.mxu3 %v2984_v55 }
0x2bcc   :  { %v2592_v43 = vpop.xlane.xlu1 %2591 }
0x2bcd   :  { %v2593_v59 = vcvt.f32.s32 %v2592_v43  ;;  %v2983_v43 = vld [vmem:[#allocation2 + $0x3c0] sm:$0xff] }
0x2bce   :  { %3007 = vmatpush.msrb.mxu3 %v2983_v43 }
0x2bcf   :  { %v2596_v61 = vadd.s32 %v2595_v51, %v2593_v59  ;;  %v6004_v51 = vld [vmem:[#allocation13_spill] sm:$0xff]  ;;  %v6005_v59 = vld [vmem:[#allocation16_spill] sm:$0xff] }
0x2bd0   :  { %3112 = vmatpush.msra.mxu3 %v6004_v51 }
0x2bd1   :  { %vm2597_vm4 = vcmp.eq.s32.totalorder %v4369_v25, %v2596_v61  ;;  %v6006_v61 = vld [vmem:[#allocation14_spill] sm:$0xff] }
0x2bd2   :  { %3972 = vmatmul.msk.f32.vlgmr.msrb.gmra.mxu1 %vm2597_vm4, %v6001_v5  ;;  %3974 = vmatmul.msk.f32.vlgmr.msrb.gmra.mxu2 %vm2597_vm4, %v6001_v5 }
0x2bd3   :  { %3440 = vmatpush.msrb.mxu1 %v2986_v8  ;;  %3113 = vmatpush.msra.mxu3 %v6005_v59  ;;  %v6025_v8 = vmov 6   ;;  %v6027_v59 = vmov 1  }
0x2bd5   :  { %3441 = vmatpush.msrb.mxu1 %v2985_v1  ;;  %3114 = vmatpush.msra.mxu3 %v6006_v61 }
0x2bd7   :  { %3442 = vmatpush.msrb.mxu1 %v2984_v55  ;;  %v6026_v55 = vmov 7  }
0x2bd9   :  { %3443 = vmatpush.msrb.mxu1 %v2983_v43 }
0x2c24   :  { %v2878_v6 = vpop.f32.mrf.mxu1 }
0x2c4f   :  { %v2922_v7 = vpop.f32.mrf.mxu1 }
0x2c50   :  { %v2923_v24 = vadd.f32 %v2922_v7, %v6002_v9 }
0x2c52   :  { %v2925_v10 = vadd.f32 %v2923_v24, %v2878_v6  ;;  %v6007_v6 = vld [vmem:[#allocation17_spill] sm:$0xff] }
0x2c53   :  { %3115 = vmatpush.msra.mxu3 %v6007_v6 }
0x2c54   :  { %4220 = vtanh.f32 %v2925_v10  ;;  %v3973_v57 = vmul.f32 -1.442695, %v2925_v10 }
0x2c56   :  { %4222 = vpow2.f32 %v3973_v57 }
0x2c5a   :  { %v4221_v11 = vpop.eup %4220 }
0x2c5b   :  { %2948 = vrot.lane.b32.xlu2 %v4221_v11, %s4291_s17 }
0x2c5c   :  { %v4223_v36 = vpop.eup %4222 }
0x2c5d   :  { %v2929_v32 = vadd.f32 1.0, %v4223_v36 }
0x2c5f   :  { %4224 = vrcp.f32 %v2929_v32  ;;  %v2941_v60 = vand.u32 2147483648, %v2929_v32  ;;  %vm2935_vm7 = vweird.f32 %v2929_v32  ;;  %v2939_v34 = vand.u32 2147483647, %v2929_v32 }
0x2c61   :  { %v2942_v17 = vor.u32 1.1754944e-38, %v2941_v60  ;;  %vm2940_vm9 = vcmp.eq.f32.partialorder %v2939_v34, 8.507059e+37 }
0x2c65   :  { %v4225_v53 = vpop.eup %4224 }
0x2c66   :  { %v2931_v33 = vmul.f32 %v4225_v53, %v2929_v32  ;;  %vm2936_vm6 = vweird.f32 %v4225_v53 }
0x2c67   :  { %vm2937_vm8 = vmor %vm2935_vm7, %vm2936_vm6 }
0x2c68   :  { %v2932_v40 = vsub.f32 1.0, %v2931_v33 }
0x2c6a   :  { %v2933_v54 = vmul.f32 %v4225_v53, %v2932_v40 }
0x2c6c   :  { %v2934_v28 = vadd.f32 %v4225_v53, %v2933_v54 }
0x2c6e   :  { %v2938_v41 = vsel %vm2937_vm8, %v4225_v53, %v2934_v28 }
0x2c6f   :  { %v2943_v52 = vsel %vm2940_vm9, %v2942_v17, %v2938_v41 }
0x2c70   :  { %v2946_v2 = vmul.f32 %v2943_v52, %v6003_v26  ;;  %v6021_v26 = vmov 5  }
0x2cb5   :  { %v2949_v58 = vpop.permute.xlu2 %2948 }
0x2cb6   :  { %v2951_v30 = vmul.f32 %v2949_v58, %v2943_v52 }
0x2cb8   :  { %2953 = vrot.lane.b32.xlu2 %v2951_v30, %s4292_s18 }
0x2d12   :  { %v2954_v12 = vpop.permute.xlu2 %2953 }
0x2d13   :  { %v5616_v31 = vadd.f32 %v2954_v12, %v2946_v2  ;;  %v6022_v2 = vmov 2   ;;  %v6023_v12 = vmov 0  }
0x2d15   :  { %4226 = vtanh.f32 %v5616_v31 }
0x2d1b   :  { %v4227_v16 = vpop.eup %4226 }
0x2d1c   :  { %2959 = vrot.lane.b32.xlu2 %v4227_v16, %s4291_s17  ;;  %v6024_v16 = vmov 4  }
0x2d76   :  { %v2960_v7 = vpop.permute.xlu2 %2959 }
0x2d77   :  { %v2962_v9 = vmul.f32 %v2960_v7, %v2943_v52 }
0x2d79   :  { %2988 = vrot.lane.b32.xlu2 %v2962_v9, %s4292_s18 }
0x2dd3   :  { %v2989_v24 = vpop.permute.xlu2 %2988 }
0x2dd4   :  { %3975 = vmatmul.msk.f32.vlgmr.msrb.gmra.mxu3 %vm182_vm5, %v2989_v24  ;;  %3978 = vmatmul.msk.f32.vlgmr.msrb.gmra.mxu0 %vm182_vm5, %v2989_v24 }
0x2dd5   :  { %3309 = vmatpush.msrb.mxu3 %v5445_v63  ;;  %3333 = vmatpush.msrb.mxu0 %v5447_v21  ;;  %v6009_v63 = vld [vmem:[#allocation21_spill] sm:$0xff]  ;;  %v6010_v21 = vld [vmem:[#allocation20_spill] sm:$0xff] }
0x2dd7   :  { %3310 = vmatpush.msrb.mxu3 %v5449_v19  ;;  %3334 = vmatpush.msrb.mxu0 %v5453_v48  ;;  %v6011_v19 = vld [vmem:[#allocation23_spill] sm:$0xff]  ;;  %v6012_v48 = vld [vmem:[#allocation22_spill] sm:$0xff] }
0x2dd9   :  { %3311 = vmatpush.msrb.mxu3 %v5455_v44  ;;  %3335 = vmatpush.msrb.mxu0 %v5457_v18  ;;  %v6013_v44 = vld [vmem:[#allocation25_spill] sm:$0xff]  ;;  %v6014_v18 = vld [vmem:[#allocation24_spill] sm:$0xff] }
0x2ddb   :  { %3312 = vmatpush.msrb.mxu3 %v5461_v47  ;;  %3336 = vmatpush.msrb.mxu0 %v5463_v23  ;;  %v6008_v23 = vld [vmem:[#allocation18_spill] sm:$0xff] }
0x2ddc   :  { %3979 = vmatmul.msk.f32.vlgmr.msra.gmra.mxu3 %vm182_vm5, %v2989_v24  ;;  %3980 = vmatmul.msk.f32.vlgmr.msra.gmra.mxu0 %vm182_vm5, %v2989_v24  ;;  %v6015_v47 = vld [vmem:[#allocation26_spill] sm:$0xff] }
0x2ddd   :  { %3341 = vmatpush.msra.mxu3 %v5478_v37  ;;  %3399 = vmatpush.msra.mxu0 %v5480_v38  ;;  %v6016_v37 = vld [vmem:[#allocation29_spill] sm:$0xff]  ;;  %v6017_v38 = vld [vmem:[#allocation30_spill] sm:$0xff] }
0x2ddf   :  { %3342 = vmatpush.msra.mxu3 %v5482_v15  ;;  %3400 = vmatpush.msra.mxu0 %v5486_v35  ;;  %v6018_v15 = vld [vmem:[#allocation31_spill] sm:$0xff] }
0x2de1   :  { %3343 = vmatpush.msra.mxu3 %v5488_v27  ;;  %3401 = vmatpush.msra.mxu0 %v5490_v56 }
0x2de3   :  { %3344 = vmatpush.msra.mxu3 %v5494_v3  ;;  %3402 = vmatpush.msra.mxu0 %v5496_v49 }
0x2de5   :  { %3345 = vmatpush.msra.mxu3 %v5500_v0  ;;  %3403 = vmatpush.msra.mxu0 %v5502_v62  ;;  %v6020_v62 = vld [vmem:[#allocation27_spill] sm:$0xff] }
0x2de7   :  { %3346 = vmatpush.msra.mxu3 %v5506_v42  ;;  %3404 = vmatpush.msra.mxu0 %v5508_v46 }
0x2de9   :  { %3347 = vmatpush.msra.mxu3 %v5512_v13  ;;  %3405 = vmatpush.msra.mxu0 %v6008_v23  ;;  %v6028_v23 = vld [vmem:[#allocation5_spill] sm:$0xff] }
0x2deb   :  { %3348 = vmatpush.msra.mxu3 %v6009_v63  ;;  %3406 = vmatpush.msra.mxu0 %v6010_v21  ;;  %v6029_v21 = vld [vmem:[#allocation6_spill] sm:$0xff] }
0x2ded   :  { %3349 = vmatpush.msra.mxu3 %v6011_v19  ;;  %3407 = vmatpush.msra.mxu0 %v5526_v50 }
0x2def   :  { %3350 = vmatpush.msra.mxu3 %v5530_v20  ;;  %3408 = vmatpush.msra.mxu0 %v6012_v48  ;;  %v2902_v20 = vpop.f32.mrf.mxu2  ;;  %v6030_v48 = vld [vmem:[#allocation7_spill] sm:$0xff] }
0x2df1   :  { %3351 = vmatpush.msra.mxu3 %v6013_v44  ;;  %3409 = vmatpush.msra.mxu0 %v6014_v18 }
0x2df3   :  { %3352 = vmatpush.msra.mxu3 %v6015_v47  ;;  %3410 = vmatpush.msra.mxu0 %v6016_v37 }
0x2df5   :  { %3353 = vmatpush.msra.mxu3 %v6017_v38  ;;  %3411 = vmatpush.msra.mxu0 %v6018_v15  ;;  %v6031_v38 = vld [vmem:[#allocation8_spill] sm:$0xff] }
0x2df7   :  { %3354 = vmatpush.msra.mxu3 %v5558_v29  ;;  %3412 = vmatpush.msra.mxu0 %v5560_v14  ;;  %v2980_v35 = vpop.f32.mrf.mxu2  ;;  %v6019_v14 = vld [vmem:[#allocation28_spill] sm:$0xff] }
0x2df8   :  { %v2981_v27 = vadd.f32 %v2980_v35, %v2902_v20  ;;  %v6032_v20 = vld [vmem:[#allocation9_spill] sm:$0xff] }
0x2df9   :  { %3355 = vmatpush.msra.mxu3 %v5564_v22  ;;  %3413 = vmatpush.msra.mxu0 %v5566_v39 }
0x2dfb   :  { %3356 = vmatpush.msra.mxu3 %v5570_v4  ;;  %3414 = vmatpush.msra.mxu0 %v5572_v45 }
0x2e51   :  { %v5669_v50 = vpop.f32.mrf.mxu0 }
0x2e57   :  { %v3009_v56 = vpop.f32.mrf.mxu3 }
0x2e58   :  { %v3012_v3 = vadd.f32 %v3009_v56, %v2981_v27 }
0x2e59   :  { %v3137_v49 = vpop.f32.mrf.mxu0 }
0x2e5a   :  { %3976 = vst [vmem:[%s5759_s2 + $0x20] sm:$0xff] %v3012_v3  ;;  %v3141_v29 = vadd.f32 %v3137_v49, %v6019_v14  ;;  %3015 = vmax.xlane.f32.xlu1 %v3012_v3 }
0x2e5c   :  { %4228 = vtanh.f32 %v3141_v29  ;;  %v6033_v29 = vld [vmem:[#allocation10_spill] sm:$0xff] }
0x2e5f   :  { %v3117_v0 = vpop.f32.mrf.mxu3 }
0x2e60   :  { %v3140_v42 = vadd.f32 %v3117_v0, %v6020_v62 }
0x2e62   :  { %v4229_v46 = vpop.eup %4228  ;;  %4230 = vtanh.f32 %v3140_v42  ;;  %v6034_v42 = vld [vmem:[#allocation11_spill] sm:$0xff] }
0x2e63   :  { %3212 = vmatmul.f32.vlgmr.msra.gmra.mxu2 %v4229_v46 }
0x2e68   :  { %v4231_v13 = vpop.eup %4230 }
0x2e69   :  { %3192 = vmatmul.f32.vlgmr.msra.gmra.mxu1 %v4231_v13 }
0x2ecd   :  { %v3016_v1 = vpop.xlane.xlu1 %3015 }
0x2ece   :  { %vm3017_vm15 = vcmp.eq.f32.partialorder %v3012_v3, %v3016_v1 }
0x2ecf   :  { %v3018_v43 = vsel %vm3017_vm15, %v4369_v25, 128 }
0x2ed0   :  { %v3020_v51 = vshra.s32 %v3018_v43, 16 }
0x2ed2   :  { %v3022_v61 = vcvt.s32.f32 %v3020_v51 }
0x2ee6   :  { %v3193_v22 = vpop.f32.mrf.mxu1  ;;  %v3213_v39 = vpop.f32.mrf.mxu2 }
0x2ee7   :  { %v3214_v45 = vadd.f32 %v3213_v39, %v3193_v22 }
0x2ee9   :  { %v3216_v4 = vsel %vm1036_vm13, %v3214_v45, -inf }
0x2eea   :  { %3217 = vmax.xlane.f32.xlu0 %v3216_v4 }
0x2f5d   :  { %v3218_v10 = vpop.xlane.xlu0 %3217 }
0x2f5e   :  { %v3219_v11 = vsub.f32 %v3214_v45, %v3218_v10  ;;  %v6035_v45 = vld [vmem:[#allocation12_spill] sm:$0xff] }
0x2f60   :  { %v3220_v57 = vmul.f32 1.442695, %v3219_v11  ;;  %v3019_v11 = vand.u32 65535, %v3018_v43 }
0x2f62   :  { %4232 = vpow2.f32 %v3220_v57  ;;  %v3021_v57 = vcvt.s32.f32 %v3019_v11  ;;  %v3529_v11 = vld [vmem:[#allocation2 + $0x448] sm:$0xff] }
0x2f68   :  { %v4233_v36 = vpop.eup %4232 }
0x2f69   :  { %v3222_v32 = vsel %vm1036_vm13, %v4233_v36, 0.0 }
0x2f6a   :  { %3223 = vadd.xlane.f32.xlu2 %v3222_v32 }
0x2fdd   :  { %v3224_v53 = vpop.xlane.xlu2 %3223 }
0x2fde   :  { %4234 = vrcp.f32 %v3224_v53  ;;  %v3236_v28 = vand.u32 2147483648, %v3224_v53  ;;  %v3234_v34 = vand.u32 2147483647, %v3224_v53  ;;  %vm3230_vm11 = vweird.f32 %v3224_v53 }
0x2fe0   :  { %v3237_v17 = vor.u32 1.1754944e-38, %v3236_v28  ;;  %vm3235_vm14 = vcmp.eq.f32.partialorder %v3234_v34, 8.507059e+37 }
0x2fe4   :  { %v4235_v33 = vpop.eup %4234 }
0x2fe5   :  { %v3226_v40 = vmul.f32 %v4235_v33, %v3224_v53  ;;  %vm3231_vm10 = vweird.f32 %v4235_v33 }
0x2fe6   :  { %vm3232_vm12 = vmor %vm3230_vm11, %vm3231_vm10 }
0x2fe7   :  { %v3227_v54 = vsub.f32 1.0, %v3226_v40 }
0x2fe9   :  { %v3228_v60 = vmul.f32 %v4235_v33, %v3227_v54 }
0x2feb   :  { %v3229_v41 = vadd.f32 %v4235_v33, %v3228_v60 }
0x2fed   :  { %v3233_v58 = vsel %vm3232_vm12, %v4235_v33, %v3229_v41 }
0x2fee   :  { %v3238_v52 = vsel %vm3235_vm14, %v3237_v17, %v3233_v58 }
0x2fef   :  { %v3239_v30 = vmul.f32 %v4233_v36, %v3238_v52 }
0x2ff1   :  { %3259 = vperm.xlu2 %4063, %v3239_v30   ;;  %3242 = vperm.xlu0 %4068, %v3239_v30  }
0x2ff2   :  { %3247 = vperm.xlu1 %4069, %v3239_v30  }
0x2ff9   :  { %4072 = vset.pattern.permute.xlu0 %v6021_v26 }
0x2ffa   :  { %4070 = vset.pattern.permute.xlu1 %v6022_v2  ;;  %3271 = vperm.xlu0 %4072, %v3239_v30  }
0x2ffb   :  { %3253 = vperm.xlu1 %4070, %v3239_v30  }
0x3002   :  { %4075 = vset.pattern.permute.xlu0 %v6023_v12 }
0x3003   :  { %4071 = vset.pattern.permute.xlu1 %v6024_v16 }
0x3004   :  { %3265 = vperm.xlu1 %4071, %v3239_v30  }
0x300c   :  { %4073 = vset.pattern.permute.xlu1 %v6025_v8 }
0x300d   :  { %3277 = vperm.xlu1 %4073, %v3239_v30  }
0x3015   :  { %4074 = vset.pattern.permute.xlu1 %v6026_v55 }
0x3016   :  { %3283 = vperm.xlu1 %4074, %v3239_v30  }
0x301e   :  { %4076 = vset.pattern.permute.xlu1 %v6027_v59 }
0x3024   :  { %3023 = vmin.xlane.f32.xlu0 %v3022_v61 }
0x304b   :  { %v3260_v47 = vpop.permute.xlu2 %3259 }
0x304c   :  { %v3262_v15 = vmul.f32 %v3260_v47, %v6031_v38 }
0x3063   :  { %v3243_v9 = vpop.permute.xlu0 %3242 }
0x3064   :  { %v3248_v6 = vpop.permute.xlu1 %3247  ;;  %v3245_v63 = vmul.f32 %v3243_v9, %v6028_v23 }
0x3065   :  { %v3250_v19 = vmul.f32 %v3248_v6, %v6029_v21 }
0x3067   :  { %v3251_v18 = vadd.f32 %v3250_v19, %v3245_v63 }
0x306c   :  { %v3272_v3 = vpop.permute.xlu0 %3271 }
0x306d   :  { %v3254_v7 = vpop.permute.xlu1 %3253  ;;  %v3274_v0 = vmul.f32 %v3272_v3, %v6033_v29  ;;  %v3504_v3 = vld [vmem:[#allocation2 + $0x340] sm:$0xff] }
0x306e   :  { %v3256_v44 = vmul.f32 %v3254_v7, %v6030_v48 }
0x3070   :  { %v3257_v37 = vadd.f32 %v3256_v44, %v3251_v18 }
0x3072   :  { %v3263_v56 = vadd.f32 %v3262_v15, %v3257_v37 }
0x3076   :  { %v3266_v24 = vpop.permute.xlu1 %3265 }
0x3077   :  { %v3268_v35 = vmul.f32 %v3266_v24, %v6032_v20 }
0x3079   :  { %v3269_v49 = vadd.f32 %v3268_v35, %v3263_v56  ;;  %v3507_v35 = vld [vmem:[#allocation2 + $0x370] sm:$0xff] }
0x307a   :  { %3520 = vmatpush.msrb.mxu2 %v3507_v35  ;;  %v3505_v56 = vld [vmem:[#allocation2 + $0x350] sm:$0xff] }
0x307b   :  { %v3275_v13 = vadd.f32 %v3274_v0, %v3269_v49 }
0x307f   :  { %v3278_v27 = vpop.permute.xlu1 %3277 }
0x3080   :  { %v3280_v46 = vmul.f32 %v3278_v27, %v6034_v42  ;;  %v3506_v27 = vld [vmem:[#allocation2 + $0x360] sm:$0xff] }
0x3081   :  { %3521 = vmatpush.msrb.mxu2 %v3506_v27  ;;  %v3596_v27 = vld [vmem:[#allocation2 + $0x780] sm:$0xff] }
0x3082   :  { %v3281_v39 = vadd.f32 %v3280_v46, %v3275_v13  ;;  %v3535_v46 = vld [vmem:[#allocation2 + $0x478] sm:$0xff]  ;;  %v3532_v13 = vld [vmem:[#allocation2 + $0x460] sm:$0xff] }
0x3083   :  { %3522 = vmatpush.msrb.mxu2 %v3505_v56 }
0x3085   :  { %3523 = vmatpush.msrb.mxu2 %v3504_v3 }
0x3087   :  { %3568 = vmatpush.msra.mxu2 %v3535_v46 }
0x3088   :  { %v3284_v22 = vpop.permute.xlu1 %3283 }
0x3089   :  { %v3286_v4 = vmul.f32 %v3284_v22, %v6035_v45  ;;  %v3533_v22 = vld [vmem:[#allocation2 + $0x468] sm:$0xff] }
0x308a   :  { %3569 = vmatpush.msra.mxu2 %v3533_v22 }
0x308b   :  { %v3287_v10 = vadd.f32 %v3286_v4, %v3281_v39  ;;  %v3530_v39 = vld [vmem:[#allocation2 + $0x450] sm:$0xff]  ;;  %v3531_v4 = vld [vmem:[#allocation2 + $0x458] sm:$0xff] }
0x308c   :  { %3570 = vmatpush.msra.mxu2 %v3531_v4 }
0x308d   :  { %3293 = vrot.lane.b32.xlu2 %v3287_v10, %s4292_s18  ;;  %v3528_v10 = vld [vmem:[#allocation2 + $0x440] sm:$0xff] }
0x308e   :  { %3571 = vmatpush.msra.mxu2 %v3529_v11 }
0x3097   :  { %v3024_v36 = vpop.xlane.xlu0 %3023 }
0x3098   :  { %vm3025_vm0 = vcmp.eq.f32.partialorder %v3022_v61, %v3024_v36  ;;  %v3030_v33 = vcvt.f32.s32 %v3024_v36  ;;  %v3594_v36 = vld [vmem:[#allocation2 + $0x760] sm:$0xff] }
0x3099   :  { %v3026_v32 = vsel %vm3025_vm0, %v3021_v57, inf  ;;  %v3595_v57 = vld [vmem:[#allocation2 + $0x770] sm:$0xff] }
0x309a   :  { %3027 = vmin.xlane.f32.xlu1 %v3026_v32  ;;  %v3031_v54 = vshll.u32 %v3030_v33, 16  ;;  %v3611_v32 = vld [vmem:[#allocation2 + $0x870] sm:$0xff]  ;;  %v3610_v33 = vld [vmem:[#allocation2 + $0x860] sm:$0xff] }
0x30e7   :  { %v3294_v53 = vpop.permute.xlu2 %3293 }
0x30e8   :  { %3981 = vmatmul.msk.f32.vlgmr.msrb.gmra.mxu3 %vm182_vm5, %v3294_v53  ;;  %3982 = vmatmul.msk.f32.vlgmr.msrb.gmra.mxu0 %vm182_vm5, %v3294_v53  ;;  %v3593_v53 = vld [vmem:[#allocation2 + $0x750] sm:$0xff] }
0x30e9   :  { %3612 = vmatpush.msrb.mxu3 %v3595_v57  ;;  %3632 = vmatpush.msrb.mxu0 %v3611_v32 }
0x30eb   :  { %3613 = vmatpush.msrb.mxu3 %v3594_v36  ;;  %3633 = vmatpush.msrb.mxu0 %v3610_v33 }
0x30ed   :  { %3614 = vmatpush.msrb.mxu3 %v3593_v53 }
0x310d   :  { %v3028_v40 = vpop.xlane.xlu1 %3027 }
0x310e   :  { %v3029_v28 = vcvt.f32.s32 %v3028_v40  ;;  %v3609_v40 = vld [vmem:[#allocation2 + $0x850] sm:$0xff] }
0x310f   :  { %3634 = vmatpush.msrb.mxu0 %v3609_v40 }
0x3110   :  { %v3032_v60 = vadd.s32 %v3031_v54, %v3029_v28  ;;  %v3592_v54 = vld [vmem:[#allocation2 + $0x740] sm:$0xff] }
0x3111   :  { %v3608_v28 = vld [vmem:[#allocation2 + $0x840] sm:$0xff]  ;;  %3615 = vmatpush.msrb.mxu3 %v3592_v54 }
0x3112   :  { %vm3033_vm1 = vcmp.eq.s32.totalorder %v4369_v25, %v3032_v60  ;;  %v3591_v60 = vld [vmem:[#allocation2 + $0x730] sm:$0xff]  ;;  %3635 = vmatpush.msrb.mxu0 %v3608_v28 }
0x3113   :  { %3983 = vmatmul.msk.f32.vlgmr.msra.gmra.mxu3 %vm3033_vm1, %v6001_v5  ;;  %3985 = vmatmul.msk.f32.vlgmr.msra.gmra.mxu0 %vm3033_vm1, %v6001_v5 }
0x3114   :  { %3616 = vmatpush.msrb.mxu3 %v3591_v60 }
0x3165   :  { %v3338_v35 = vpop.f32.mrf.mxu0 }
0x316b   :  { %v3314_v34 = vpop.f32.mrf.mxu3 }
0x3190   :  { %v3416_v56 = vpop.f32.mrf.mxu0 }
0x3191   :  { %v3417_v3 = vadd.f32 %v3416_v56, %v3338_v35  ;;  %v3753_v56 = vld [vmem:[#allocation2 + $0x400] sm:$0xff] }
0x3196   :  { %v3358_v41 = vpop.f32.mrf.mxu3 }
0x3197   :  { %v3359_v17 = vadd.f32 %v3358_v41, %v5669_v50  ;;  %v3589_v41 = vld [vmem:[#allocation2 + $0x710] sm:$0xff] }
0x3199   :  { %v3361_v58 = vadd.f32 %v3359_v17, %v3314_v34  ;;  %v3590_v34 = vld [vmem:[#allocation2 + $0x720] sm:$0xff] }
0x319a   :  { %3617 = vmatpush.msrb.mxu3 %v3590_v34 }
0x319b   :  { %4236 = vtanh.f32 %v3361_v58  ;;  %v3984_v30 = vmul.f32 -1.442695, %v3361_v58  ;;  %v3588_v58 = vld [vmem:[#allocation2 + $0x700] sm:$0xff] }
0x319c   :  { %3618 = vmatpush.msrb.mxu3 %v3589_v41 }
0x319d   :  { %4238 = vpow2.f32 %v3984_v30  ;;  %v3587_v30 = vld [vmem:[#allocation2 + $0x6f0] sm:$0xff] }
0x319e   :  { %3619 = vmatpush.msrb.mxu3 %v3588_v58 }
0x31a0   :  { %3620 = vmatpush.msrb.mxu3 %v3587_v30 }
0x31a1   :  { %v4237_v52 = vpop.eup %4236 }
0x31a2   :  { %3384 = vrot.lane.b32.xlu2 %v4237_v52, %s4291_s17  ;;  %v3607_v52 = vld [vmem:[#allocation2 + $0x830] sm:$0xff] }
0x31a3   :  { %v4239_v12 = vpop.eup %4238  ;;  %3636 = vmatpush.msrb.mxu0 %v3607_v52 }
0x31a4   :  { %v3365_v1 = vadd.f32 1.0, %v4239_v12  ;;  %v3606_v12 = vld [vmem:[#allocation2 + $0x820] sm:$0xff] }
0x31a5   :  { %3637 = vmatpush.msrb.mxu0 %v3606_v12 }
0x31a6   :  { %4240 = vrcp.f32 %v3365_v1  ;;  %v3377_v7 = vand.u32 2147483648, %v3365_v1  ;;  %vm3371_vm3 = vweird.f32 %v3365_v1  ;;  %v3375_v9 = vand.u32 2147483647, %v3365_v1 }
0x31a8   :  { %v3378_v24 = vor.u32 1.1754944e-38, %v3377_v7  ;;  %vm3376_vm6 = vcmp.eq.f32.partialorder %v3375_v9, 8.507059e+37  ;;  %v3583_v7 = vld [vmem:[#allocation2 + $0x6b0] sm:$0xff]  ;;  %v3602_v9 = vld [vmem:[#allocation2 + $0x7e0] sm:$0xff] }
0x31ac   :  { %v4241_v43 = vpop.eup %4240 }
0x31ad   :  { %v3367_v51 = vmul.f32 %v4241_v43, %v3365_v1  ;;  %vm3372_vm2 = vweird.f32 %v4241_v43  ;;  %v3586_v1 = vld [vmem:[#allocation2 + $0x6e0] sm:$0xff] }
0x31ae   :  { %vm3373_vm4 = vmor %vm3371_vm3, %vm3372_vm2  ;;  %3621 = vmatpush.msrb.mxu3 %v3586_v1 }
0x31af   :  { %v3368_v59 = vsub.f32 1.0, %v3367_v51  ;;  %v3585_v51 = vld [vmem:[#allocation2 + $0x6d0] sm:$0xff] }
0x31b0   :  { %3622 = vmatpush.msrb.mxu3 %v3585_v51 }
0x31b1   :  { %v3369_v61 = vmul.f32 %v4241_v43, %v3368_v59  ;;  %v3604_v59 = vld [vmem:[#allocation2 + $0x800] sm:$0xff] }
0x31b3   :  { %v3370_v6 = vadd.f32 %v4241_v43, %v3369_v61  ;;  %v3584_v61 = vld [vmem:[#allocation2 + $0x6c0] sm:$0xff] }
0x31b4   :  { %3623 = vmatpush.msrb.mxu3 %v3584_v61 }
0x31b5   :  { %v3374_v50 = vsel %vm3373_vm4, %v4241_v43, %v3370_v6  ;;  %v3605_v43 = vld [vmem:[#allocation2 + $0x810] sm:$0xff] }
0x31b6   :  { %v3379_v19 = vsel %vm3376_vm6, %v3378_v24, %v3374_v50  ;;  %3638 = vmatpush.msrb.mxu0 %v3605_v43  ;;  %v3603_v6 = vld [vmem:[#allocation2 + $0x7f0] sm:$0xff]  ;;  %v3582_v50 = vld [vmem:[#allocation2 + $0x6a0] sm:$0xff]  ;;  %3624 = vmatpush.msrb.mxu3 %v3583_v7 }
0x31b7   :  { %v3382_v18 = vmul.f32 %v3379_v19, %v5616_v31  ;;  %v3534_v31 = vld [vmem:[#allocation2 + $0x470] sm:$0xff] }
0x31b8   :  { %3548 = vmatpush.msra.mxu1 %v3534_v31  ;;  %3639 = vmatpush.msrb.mxu0 %v3604_v59  ;;  %v3601_v24 = vld [vmem:[#allocation2 + $0x7d0] sm:$0xff] }
0x31b9   :  { %3625 = vmatpush.msrb.mxu3 %v3582_v50 }
0x31ba   :  { %3549 = vmatpush.msra.mxu1 %v3532_v13  ;;  %3640 = vmatpush.msrb.mxu0 %v3603_v6 }
0x31bc   :  { %3550 = vmatpush.msra.mxu1 %v3530_v39  ;;  %3641 = vmatpush.msrb.mxu0 %v3602_v9 }
0x31be   :  { %3551 = vmatpush.msra.mxu1 %v3528_v10  ;;  %3642 = vmatpush.msrb.mxu0 %v3601_v24  ;;  %v3727_v24 = vld [vmem:[#allocation2 + $0x3b0] sm:$0xff] }
0x31fc   :  { %v3385_v63 = vpop.permute.xlu2 %3384 }
0x31fd   :  { %v3387_v44 = vmul.f32 %v3385_v63, %v3379_v19  ;;  %v3581_v63 = vld [vmem:[#allocation2 + $0x690] sm:$0xff] }
0x31fe   :  { %3626 = vmatpush.msrb.mxu3 %v3581_v63  ;;  %v3756_v63 = vld [vmem:[#allocation2 + $0x430] sm:$0xff] }
0x31ff   :  { %3389 = vrot.lane.b32.xlu2 %v3387_v44, %s4292_s18  ;;  %v3580_v44 = vld [vmem:[#allocation2 + $0x680] sm:$0xff] }
0x3200   :  { %3627 = vmatpush.msrb.mxu3 %v3580_v44  ;;  %v3755_v44 = vld [vmem:[#allocation2 + $0x420] sm:$0xff] }
0x3259   :  { %v3390_v47 = vpop.permute.xlu2 %3389 }
0x325a   :  { %v5704_v37 = vadd.f32 %v3390_v47, %v3382_v18  ;;  %v3599_v18 = vld [vmem:[#allocation2 + $0x7b0] sm:$0xff]  ;;  %v3598_v47 = vld [vmem:[#allocation2 + $0x7a0] sm:$0xff] }
0x325c   :  { %4242 = vtanh.f32 %v5704_v37 }
0x3262   :  { %v4243_v15 = vpop.eup %4242 }
0x3263   :  { %3395 = vrot.lane.b32.xlu2 %v4243_v15, %s4291_s17  ;;  %v3597_v15 = vld [vmem:[#allocation2 + $0x790] sm:$0xff] }
0x32bd   :  { %v3396_v49 = vpop.permute.xlu2 %3395 }
0x32be   :  { %v3398_v0 = vmul.f32 %v3396_v49, %v3379_v19  ;;  %v3600_v19 = vld [vmem:[#allocation2 + $0x7c0] sm:$0xff] }
0x32bf   :  { %3643 = vmatpush.msrb.mxu0 %v3600_v19 }
0x32c0   :  { %3424 = vrot.lane.b32.xlu2 %v3398_v0, %s4292_s18 }
0x32c1   :  { %3644 = vmatpush.msrb.mxu0 %v3599_v18 }
0x32c3   :  { %3645 = vmatpush.msrb.mxu0 %v3598_v47  ;;  %v3725_v47 = vld [vmem:[#allocation2 + $0x390] sm:$0xff] }
0x32c5   :  { %3646 = vmatpush.msrb.mxu0 %v3597_v15  ;;  %v3754_v15 = vld [vmem:[#allocation2 + $0x410] sm:$0xff] }
0x32c7   :  { %3647 = vmatpush.msrb.mxu0 %v3596_v27  ;;  %v3724_v27 = vld [vmem:[#allocation2 + $0x380] sm:$0xff] }
0x331a   :  { %v3425_v17 = vpop.permute.xlu2 %3424 }
0x331b   :  { %3986 = vmatmul.msk.f32.vlgmr.msrb.gmra.mxu1 %vm182_vm5, %v3425_v17  ;;  %3989 = vmatmul.msk.f32.vlgmr.msrb.gmra.mxu2 %vm182_vm5, %v3425_v17 }
0x331c   :  { %3745 = vmatpush.msrb.mxu1 %v3727_v24  ;;  %3769 = vmatpush.msrb.mxu2 %v3756_v63  ;;  %v3488_v24 = vld [vmem:[#allocation2 + $0x200] sm:$0xff] }
0x331e   :  { %3770 = vmatpush.msrb.mxu2 %v3755_v44 }
0x3320   :  { %3771 = vmatpush.msrb.mxu2 %v3754_v15 }
0x3322   :  { %3772 = vmatpush.msrb.mxu2 %v3753_v56 }
0x3323   :  { %3990 = vmatmul.msk.f32.vlgmr.msra.gmra.mxu1 %vm182_vm5, %v3425_v17  ;;  %3991 = vmatmul.msk.f32.vlgmr.msra.gmra.mxu2 %vm182_vm5, %v3425_v17 }
0x3398   :  { %v3445_v49 = vpop.f32.mrf.mxu1 }
0x3399   :  { %v3448_v0 = vadd.f32 %v3445_v49, %v3417_v3 }
0x339b   :  { %3987 = vst [vmem:[%s5759_s2 + $0x28] sm:$0xff] %v3448_v0  ;;  %3451 = vmax.xlane.f32.xlu1 %v3448_v0 }
0x339e   :  { %v5716_v31 = vpop.f32.mrf.mxu2 }
0x33a0   :  { %v3553_v46 = vpop.f32.mrf.mxu1 }
0x33a1   :  { %v3576_v13 = vadd.f32 %v3553_v46, %v6020_v62 }
0x33a3   :  { %4244 = vtanh.f32 %v3576_v13 }
0x33a6   :  { %v3573_v22 = vpop.f32.mrf.mxu2 }
0x33a7   :  { %v3577_v39 = vadd.f32 %v3573_v22, %v6019_v14 }
0x33a9   :  { %v4245_v4 = vpop.eup %4244  ;;  %4246 = vtanh.f32 %v3577_v39 }
0x33aa   :  { %3628 = vmatmul.f32.vlgmr.msrb.gmra.mxu3 %v4245_v4 }
0x33af   :  { %v4247_v10 = vpop.eup %4246 }
0x33b0   :  { %3648 = vmatmul.f32.vlgmr.msrb.gmra.mxu0 %v4247_v10 }
0x340e   :  { %v3452_v51 = vpop.xlane.xlu1 %3451 }
0x342d   :  { %v3629_v11 = vpop.f32.mrf.mxu3  ;;  %v3649_v57 = vpop.f32.mrf.mxu0 }
0x342e   :  { %v3650_v36 = vadd.f32 %v3649_v57, %v3629_v11 }
0x3430   :  { %v3652_v32 = vsel %vm1036_vm13, %v3650_v36, -inf }
0x3431   :  { %3653 = vmax.xlane.f32.xlu2 %v3652_v32  ;;  %v3487_v32 = vld [vmem:[#allocation2 + $0x1f0] sm:$0xff] }
0x34a4   :  { %v3654_v53 = vpop.xlane.xlu2 %3653 }
0x34a5   :  { %v3655_v33 = vsub.f32 %v3650_v36, %v3654_v53  ;;  %v3486_v53 = vld [vmem:[#allocation2 + $0x1e0] sm:$0xff] }
0x34a7   :  { %v3656_v40 = vmul.f32 1.442695, %v3655_v33  ;;  %v3485_v33 = vld [vmem:[#allocation2 + $0x1d0] sm:$0xff] }
0x34a9   :  { %4248 = vpow2.f32 %v3656_v40  ;;  %v3501_v40 = vld [vmem:[#allocation2 + $0x2d0] sm:$0xff] }
0x34af   :  { %v4249_v62 = vpop.eup %4248 }
0x34b0   :  { %v3658_v54 = vsel %vm1036_vm13, %v4249_v62, 0.0  ;;  %vm3453_vm13 = vcmp.eq.f32.partialorder %v3448_v0, %v3452_v51  ;;  %v3493_v51 = vld [vmem:[#allocation2 + $0x250] sm:$0xff] }
0x34b1   :  { %3659 = vadd.xlane.f32.xlu0 %v3658_v54  ;;  %v3454_v59 = vsel %vm3453_vm13, %v4369_v25, 128  ;;  %v3483_v54 = vld [vmem:[#allocation2 + $0x1b0] sm:$0xff] }
0x3524   :  { %v3660_v14 = vpop.xlane.xlu0 %3659 }
0x3525   :  { %4250 = vrcp.f32 %v3660_v14  ;;  %v3672_v41 = vand.u32 2147483648, %v3660_v14  ;;  %v3670_v58 = vand.u32 2147483647, %v3660_v14  ;;  %vm3666_vm8 = vweird.f32 %v3660_v14 }
0x3527   :  { %v3673_v30 = vor.u32 1.1754944e-38, %v3672_v41  ;;  %vm3671_vm10 = vcmp.eq.f32.partialorder %v3670_v58, 8.507059e+37  ;;  %v3497_v41 = vld [vmem:[#allocation2 + $0x290] sm:$0xff]  ;;  %v3496_v58 = vld [vmem:[#allocation2 + $0x280] sm:$0xff] }
0x352b   :  { %v4251_v28 = vpop.eup %4250 }
0x352c   :  { %v3662_v60 = vmul.f32 %v4251_v28, %v3660_v14  ;;  %vm3667_vm7 = vweird.f32 %v4251_v28  ;;  %v3499_v14 = vld [vmem:[#allocation2 + $0x2b0] sm:$0xff] }
0x352d   :  { %vm3668_vm9 = vmor %vm3666_vm8, %vm3667_vm7 }
0x352e   :  { %v3663_v34 = vsub.f32 1.0, %v3662_v60  ;;  %v3498_v60 = vld [vmem:[#allocation2 + $0x2a0] sm:$0xff] }
0x3530   :  { %v3664_v17 = vmul.f32 %v4251_v28, %v3663_v34  ;;  %v3481_v34 = vld [vmem:[#allocation2 + $0x190] sm:$0xff] }
0x3532   :  { %v3665_v52 = vadd.f32 %v4251_v28, %v3664_v17  ;;  %v3480_v17 = vld [vmem:[#allocation2 + $0x180] sm:$0xff] }
0x3534   :  { %v3669_v12 = vsel %vm3668_vm9, %v4251_v28, %v3665_v52  ;;  %v3482_v28 = vld [vmem:[#allocation2 + $0x1a0] sm:$0xff]  ;;  %v3479_v52 = vld [vmem:[#allocation2 + $0x170] sm:$0xff] }
0x3535   :  { %v3674_v1 = vsel %vm3671_vm10, %v3673_v30, %v3669_v12  ;;  %v3495_v30 = vld [vmem:[#allocation2 + $0x270] sm:$0xff]  ;;  %v3478_v12 = vld [vmem:[#allocation2 + $0x160] sm:$0xff] }
0x3536   :  { %v3675_v43 = vmul.f32 %v4249_v62, %v3674_v1  ;;  %v3500_v62 = vld [vmem:[#allocation2 + $0x2c0] sm:$0xff] }
0x3537   :  { %v3494_v1 = vld [vmem:[#allocation2 + $0x260] sm:$0xff] }
0x3538   :  { %3695 = vperm.xlu2 %4063, %v3675_v43   ;;  %3678 = vperm.xlu0 %4075, %v3675_v43  }
0x3539   :  { %3683 = vperm.xlu1 %4076, %v3675_v43  }
0x3540   :  { %4079 = vset.pattern.permute.xlu0 %v6021_v26  ;;  %v3456_v26 = vshra.s32 %v3454_v59, 16 }
0x3541   :  { %4077 = vset.pattern.permute.xlu1 %v6022_v2  ;;  %3707 = vperm.xlu0 %4079, %v3675_v43  }
0x3542   :  { %3689 = vperm.xlu1 %4077, %v3675_v43   ;;  %v3458_v61 = vcvt.s32.f32 %v3456_v26  ;;  %v3492_v26 = vld [vmem:[#allocation2 + $0x240] sm:$0xff] }
0x3549   :  { %4082 = vset.pattern.permute.xlu0 %v6026_v55 }
0x354a   :  { %4078 = vset.pattern.permute.xlu1 %v6024_v16 }
0x354b   :  { %3701 = vperm.xlu1 %4078, %v3675_v43  }
0x3553   :  { %4080 = vset.pattern.permute.xlu1 %v6025_v8 }
0x3554   :  { %3713 = vperm.xlu1 %4080, %v3675_v43  }
0x355c   :  { %4081 = vset.pattern.permute.xlu1 %v6026_v55  ;;  %v3726_v55 = vld [vmem:[#allocation2 + $0x3a0] sm:$0xff] }
0x355d   :  { %3719 = vperm.xlu1 %4081, %v3675_v43   ;;  %3746 = vmatpush.msrb.mxu1 %v3726_v55  ;;  %v3477_v43 = vld [vmem:[#allocation2 + $0x150] sm:$0xff] }
0x355f   :  { %3747 = vmatpush.msrb.mxu1 %v3725_v47 }
0x3561   :  { %3748 = vmatpush.msrb.mxu1 %v3724_v27 }
0x3563   :  { %3777 = vmatpush.msra.mxu1 %v3487_v32  ;;  %v3857_v32 = vld [vmem:[#allocation2 + $0x3e0] sm:$0xff] }
0x3565   :  { %3778 = vmatpush.msra.mxu1 %v3486_v53  ;;  %v3855_v53 = vld [vmem:[#allocation2 + $0x3c0] sm:$0xff] }
0x3567   :  { %3779 = vmatpush.msra.mxu1 %v3485_v33 }
0x356b   :  { %3459 = vmin.xlane.f32.xlu0 %v3458_v61 }
0x3592   :  { %v3696_v18 = vpop.permute.xlu2 %3695 }
0x35aa   :  { %v3679_v7 = vpop.permute.xlu0 %3678 }
0x35ab   :  { %v3684_v2 = vpop.permute.xlu1 %3683  ;;  %v3681_v16 = vmul.f32 %v3679_v7, %v6028_v23  ;;  %v3698_v23 = vmul.f32 %v3696_v18, %v6031_v38  ;;  %v3474_v7 = vld [vmem:[#allocation2 + $0x120] sm:$0xff] }
0x35ac   :  { %v3686_v50 = vmul.f32 %v3684_v2, %v6029_v21  ;;  %v3491_v2 = vld [vmem:[#allocation2 + $0x230] sm:$0xff] }
0x35ae   :  { %v3687_v19 = vadd.f32 %v3686_v50, %v3681_v16  ;;  %v3473_v16 = vld [vmem:[#allocation2 + $0x110] sm:$0xff] }
0x35af   :  { %v3489_v50 = vld [vmem:[#allocation2 + $0x210] sm:$0xff] }
0x35b3   :  { %v3708_v49 = vpop.permute.xlu0 %3707 }
0x35b4   :  { %v3690_v6 = vpop.permute.xlu1 %3689  ;;  %v3710_v46 = vmul.f32 %v3708_v49, %v6033_v29  ;;  %v3503_v29 = vld [vmem:[#allocation2 + $0x2f0] sm:$0xff] }
0x35b5   :  { %v3692_v8 = vmul.f32 %v3690_v6, %v6030_v48  ;;  %3835 = vmatpush.msra.mxu2 %v3503_v29  ;;  %v3856_v29 = vld [vmem:[#allocation2 + $0x3d0] sm:$0xff] }
0x35b7   :  { %v3693_v35 = vadd.f32 %v3692_v8, %v3687_v19  ;;  %v3472_v8 = vld [vmem:[#allocation2 + $0x100] sm:$0xff] }
0x35b9   :  { %v3699_v3 = vadd.f32 %v3698_v23, %v3693_v35 }
0x35bd   :  { %v3702_v9 = vpop.permute.xlu1 %3701 }
0x35be   :  { %v3704_v21 = vmul.f32 %v3702_v9, %v6032_v20  ;;  %v3455_v20 = vand.u32 65535, %v3454_v59  ;;  %v3476_v59 = vld [vmem:[#allocation2 + $0x140] sm:$0xff] }
0x35bf   :  { %v3490_v9 = vld [vmem:[#allocation2 + $0x220] sm:$0xff] }
0x35c0   :  { %v3705_v0 = vadd.f32 %v3704_v21, %v3699_v3  ;;  %v3457_v11 = vcvt.s32.f32 %v3455_v20 }
0x35c2   :  { %v3711_v22 = vadd.f32 %v3710_v46, %v3705_v0 }
0x35c6   :  { %v3714_v48 = vpop.permute.xlu1 %3713 }
0x35c7   :  { %v3716_v13 = vmul.f32 %v3714_v48, %v6034_v42  ;;  %v3502_v42 = vld [vmem:[#allocation2 + $0x2e0] sm:$0xff] }
0x35c8   :  { %3836 = vmatpush.msra.mxu2 %v3502_v42 }
0x35c9   :  { %v3717_v4 = vadd.f32 %v3716_v13, %v3711_v22 }
0x35ca   :  { %3837 = vmatpush.msra.mxu2 %v3501_v40 }
0x35cc   :  { %3838 = vmatpush.msra.mxu2 %v3500_v62 }
0x35ce   :  { %3839 = vmatpush.msra.mxu2 %v3499_v14 }
0x35cf   :  { %v3720_v39 = vpop.permute.xlu1 %3719 }
0x35d0   :  { %v3722_v10 = vmul.f32 %v3720_v39, %v6035_v45  ;;  %v3484_v45 = vld [vmem:[#allocation2 + $0x1c0] sm:$0xff]  ;;  %3840 = vmatpush.msra.mxu2 %v3498_v60 }
0x35d1   :  { %3780 = vmatpush.msra.mxu1 %v3484_v45 }
0x35d2   :  { %v3723_v38 = vadd.f32 %v3722_v10, %v3717_v4  ;;  %3841 = vmatpush.msra.mxu2 %v3497_v41 }
0x35d3   :  { %3781 = vmatpush.msra.mxu1 %v3483_v54 }
0x35d4   :  { %3729 = vrot.lane.b32.xlu2 %v3723_v38, %s4292_s18  ;;  %3842 = vmatpush.msra.mxu2 %v3496_v58 }
0x35d5   :  { %3782 = vmatpush.msra.mxu1 %v3482_v28 }
0x35d6   :  { %3843 = vmatpush.msra.mxu2 %v3495_v30 }
0x35d7   :  { %3783 = vmatpush.msra.mxu1 %v3481_v34 }
0x35d8   :  { %3844 = vmatpush.msra.mxu2 %v3494_v1 }
0x35d9   :  { %3784 = vmatpush.msra.mxu1 %v3480_v17 }
0x35da   :  { %3845 = vmatpush.msra.mxu2 %v3493_v51 }
0x35db   :  { %3785 = vmatpush.msra.mxu1 %v3479_v52 }
0x35dc   :  { %3846 = vmatpush.msra.mxu2 %v3492_v26 }
0x35dd   :  { %3786 = vmatpush.msra.mxu1 %v3478_v12 }
0x35de   :  { %v5738_v57 = vpop.xlane.xlu0 %3459  ;;  %3847 = vmatpush.msra.mxu2 %v3491_v2 }
0x35df   :  { %vm3461_vm11 = vcmp.eq.f32.partialorder %v3458_v61, %v5738_v57  ;;  %3787 = vmatpush.msra.mxu1 %v3477_v43  ;;  %v3475_v61 = vld [vmem:[#allocation2 + $0x130] sm:$0xff]  ;;  %v3466_v63 = vcvt.f32.s32 %v5738_v57 }
0x35e0   :  { %v3462_v36 = vsel %vm3461_vm11, %v3457_v11, inf  ;;  %3848 = vmatpush.msra.mxu2 %v3490_v9 }
0x35e1   :  { %3463 = vmin.xlane.f32.xlu1 %v3462_v36  ;;  %3788 = vmatpush.msra.mxu1 %v3476_v59  ;;  %v3467_v19 = vshll.u32 %v3466_v63, 16  ;;  %v3858_v36 = vld [vmem:[#allocation2 + $0x3f0] sm:$0xff] }
0x35e2   :  { %3849 = vmatpush.msra.mxu2 %v3489_v50  ;;  %3876 = vmatpush.msra.mxu3 %v3858_v36 }
0x35e3   :  { %3789 = vmatpush.msra.mxu1 %v3475_v61 }
0x35e4   :  { %3850 = vmatpush.msra.mxu2 %v3488_v24  ;;  %3877 = vmatpush.msra.mxu3 %v3857_v32 }
0x35e5   :  { %3790 = vmatpush.msra.mxu1 %v3474_v7 }
0x35e6   :  { %3878 = vmatpush.msra.mxu3 %v3856_v29 }
0x35e7   :  { %3791 = vmatpush.msra.mxu1 %v3473_v16 }
0x35e8   :  { %3879 = vmatpush.msra.mxu3 %v3855_v53 }
0x35e9   :  { %3792 = vmatpush.msra.mxu1 %v3472_v8 }
0x362e   :  { %v3730_v6 = vpop.permute.xlu2 %3729 }
0x362f   :  { %3992 = vmatmul.msk.f32.vlgmr.msrb.gmra.mxu1 %vm182_vm5, %v3730_v6  ;;  %3993 = vmatmul.msk.f32.vlgmr.msrb.gmra.mxu2 %vm182_vm5, %v3730_v6 }
0x3654   :  { %v3464_v55 = vpop.xlane.xlu1 %3463 }
0x3655   :  { %v3465_v44 = vcvt.f32.s32 %v3464_v55 }
0x3657   :  { %v3468_v18 = vadd.s32 %v3467_v19, %v3465_v44 }
0x3659   :  { %vm3469_vm12 = vcmp.eq.s32.totalorder %v4369_v25, %v3468_v18 }
0x365a   :  { %3994 = vmatmul.msk.f32.vlgmr.msra.gmra.mxu1 %vm3469_vm12, %v6001_v5  ;;  %3996 = vmatmul.msk.f32.vlgmr.msra.gmra.mxu2 %vm3469_vm12, %v6001_v5 }
0x36ac   :  { %v3750_v47 = vpop.f32.mrf.mxu1 }
0x36d7   :  { %v3794_v15 = vpop.f32.mrf.mxu1 }
0x36d8   :  { %v3795_v35 = vadd.f32 %v3794_v15, %v5716_v31 }
0x36da   :  { %v3797_v27 = vadd.f32 %v3795_v35, %v3750_v47 }
0x36dc   :  { %4252 = vtanh.f32 %v3797_v27  ;;  %v3995_v23 = vmul.f32 -1.442695, %v3797_v27 }
0x36de   :  { %4254 = vpow2.f32 %v3995_v23 }
0x36e2   :  { %v4253_v56 = vpop.eup %4252 }
0x36e3   :  { %3820 = vrot.lane.b32.xlu2 %v4253_v56, %s4291_s17 }
0x36e4   :  { %v4255_v21 = vpop.eup %4254 }
0x36e5   :  { %v3801_v48 = vadd.f32 1.0, %v4255_v21 }
0x36e7   :  { %4256 = vrcp.f32 %v3801_v48  ;;  %v3813_v5 = vand.u32 2147483648, %v3801_v48  ;;  %vm3807_vm15 = vweird.f32 %v3801_v48  ;;  %v3811_v13 = vand.u32 2147483647, %v3801_v48 }
0x36e9   :  { %v3814_v22 = vor.u32 1.1754944e-38, %v3813_v5  ;;  %vm3812_vm1 = vcmp.eq.f32.partialorder %v3811_v13, 8.507059e+37 }
0x36ed   :  { %v4257_v3 = vpop.eup %4256 }
0x36ee   :  { %v3803_v25 = vmul.f32 %v4257_v3, %v3801_v48  ;;  %vm3808_vm14 = vweird.f32 %v4257_v3 }
0x36ef   :  { %vm3809_vm0 = vmor %vm3807_vm15, %vm3808_vm14 }
0x36f0   :  { %v3804_v49 = vsub.f32 1.0, %v3803_v25 }
0x36f2   :  { %v3805_v0 = vmul.f32 %v4257_v3, %v3804_v49 }
0x36f4   :  { %v3806_v46 = vadd.f32 %v4257_v3, %v3805_v0 }
0x36f6   :  { %v3810_v31 = vsel %vm3809_vm0, %v4257_v3, %v3806_v46 }
0x36f7   :  { %v3815_v4 = vsel %vm3812_vm1, %v3814_v22, %v3810_v31 }
0x36f8   :  { %v3818_v38 = vmul.f32 %v3815_v4, %v5704_v37  ;;  %v3774_v37 = vpop.f32.mrf.mxu2 }
0x3700   :  { %v3852_v45 = vpop.f32.mrf.mxu2 }
0x3701   :  { %v3853_v62 = vadd.f32 %v3852_v45, %v3774_v37 }
0x373d   :  { %v3821_v39 = vpop.permute.xlu2 %3820 }
0x373e   :  { %v3823_v10 = vmul.f32 %v3821_v39, %v3815_v4 }
0x3740   :  { %3825 = vrot.lane.b32.xlu2 %v3823_v10, %s4292_s18 }
0x379a   :  { %v3826_v20 = vpop.permute.xlu2 %3825 }
0x379b   :  { %v3828_v11 = vadd.f32 %v3826_v20, %v3818_v38 }
0x379d   :  { %4258 = vtanh.f32 %v3828_v11 }
0x37a3   :  { %v4259_v57 = vpop.eup %4258 }
0x37a4   :  { %3831 = vrot.lane.b32.xlu2 %v4259_v57, %s4291_s17 }
0x37fe   :  { %v3832_v42 = vpop.permute.xlu2 %3831 }
0x37ff   :  { %v3834_v33 = vmul.f32 %v3832_v42, %v3815_v4 }
0x3801   :  { %3860 = vrot.lane.b32.xlu2 %v3834_v33, %s4292_s18 }
0x385b   :  { %v3861_v40 = vpop.permute.xlu2 %3860 }
0x385c   :  { %3997 = vmatmul.msk.f32.vlgmr.msra.gmra.mxu3 %vm182_vm5, %v3861_v40 }
0x38df   :  { %v3881_v54 = vpop.f32.mrf.mxu3 }
0x38e0   :  { %v3884_v14 = vadd.f32 %v3881_v54, %v3853_v62 }
0x38e2   :  { %3998 = vst [vmem:[%s5759_s2 + $0x30] sm:$0xff] %v3884_v14 }
0x38e3   :  { %3891 = vsyncpa [#allocation3], 1 }

</bundles_post_ra>
